<compile_context>
chip_gen: v7x
topology: tpu7x:2x2x1
jax: 0.10.0
libtpu: 0.0.40
codegen_flags: <defaults>
</compile_context>

<pallas_src>
import math
import functools

import jax
import jax.numpy as jnp
from jax import lax
from jax.experimental import pallas as pl
from jax.experimental.pallas import tpu as pltpu


# ----------------------------------------------------------------------------
# Pallas kernel: multi-dilation conv (+folded BN) + bias + SiLU + branch mean
# ----------------------------------------------------------------------------
def _mspe_kernel(x_ref, w_ref, b_ref, o_ref, *, branch_taps, out_h, out_w, cout):
    """Fused MSPatchEmb body for one image.

    x_ref: (1, Hp, Wp, Cin)        f32   max-padded input image
    w_ref: (D, K*K, Cin, Cpad)     bf16  BN-folded, lane-padded weights
    b_ref: (D, 1, Cpad)            f32   BN-folded biases
    o_ref: (1, out_h*out_w, cout)  f32   output (flattened spatial)
    """
    xb = x_ref[0]                                   # (Hp, Wp, Cin) resident in VMEM
    cin = xb.shape[-1]
    cpad = w_ref.shape[-1]
    num_branch = len(branch_taps)

    total = jnp.zeros((out_h * out_w, cpad), jnp.float32)
    for di, taps in enumerate(branch_taps):
        # Accumulate the K*K taps of this dilation as shifted "1x1" matmuls (MXU),
        # reading the padded input only once -- no im2col materialisation in HBM.
        s = jnp.zeros((out_h * out_w, cpad), jnp.float32)
        for (t, roff, coff) in taps:                # all offsets are static
            a = xb[roff:roff + out_h, coff:coff + out_w, :]       # (out_h, out_w, Cin)
            a = a.reshape(out_h * out_w, cin).astype(jnp.bfloat16)
            s = s + jnp.dot(a, w_ref[di, t],                      # (Cin, Cpad) bf16
                            preferred_element_type=jnp.float32)
        # Fused epilogue: folded-BN bias + SiLU (sigmoid via approx EUP reciprocal).
        y = s + b_ref[di]                                         # (out_h*out_w, Cpad)
        y = y * pl.reciprocal(1.0 + jnp.exp(-y), approx=True)
        total = total + y

    # Mean over the dilation branches; slice lane-padding back to emb_dim.
    o_ref[0] = (total * (1.0 / num_branch))[:, :cout]


# ----------------------------------------------------------------------------
# Static geometry (PyTorch Conv2d padding / output-size formulas), stride = 1
# ----------------------------------------------------------------------------
def _geometry(h, w, kernel_size, stride, dilations):
    # TODO(synk): only stride=1 (the module default) is implemented.
    assert stride == 1
    pads = [math.ceil(((kernel_size - 1) * d + 1 - stride) / 2) for d in dilations]
    outs_h = [(h + 2 * p - d * (kernel_size - 1) - 1) // stride + 1
              for p, d in zip(pads, dilations)]
    outs_w = [(w + 2 * p - d * (kernel_size - 1) - 1) // stride + 1
              for p, d in zip(pads, dilations)]
    # torch.cat over branches requires equal spatial sizes
    assert len(set(outs_h)) == 1 and len(set(outs_w)) == 1
    max_pad = max(pads)
    branch_taps = []
    for p, d in zip(pads, dilations):
        taps = []
        for kh in range(kernel_size):
            for kw in range(kernel_size):
                taps.append((kh * kernel_size + kw,
                             max_pad - p + kh * d,
                             max_pad - p + kw * d))
        branch_taps.append(tuple(taps))
    return outs_h[0], outs_w[0], max_pad, tuple(branch_taps)


# ----------------------------------------------------------------------------
# Forward wrapper (NCHW in / NCHW out, like the PyTorch module)
# ----------------------------------------------------------------------------
def ms_patch_emb_pallas(x_nchw, w_all, b_all, *, kernel_size, stride, dilations, emb_dim):
    n, cin, h, w = x_nchw.shape
    d_num = len(dilations)
    out_h, out_w, max_pad, branch_taps = _geometry(h, w, kernel_size, stride, dilations)

    x = jnp.transpose(x_nchw, (0, 2, 3, 1))                       # NCHW -> NHWC
    xp = jnp.pad(x, ((0, 0), (max_pad, max_pad), (max_pad, max_pad), (0, 0)))
    xp = xp.astype(jnp.float32)
    hp, wp = h + 2 * max_pad, w + 2 * max_pad
    _, kk, cin_w, cpad = w_all.shape
    assert cin_w == cin

    kern = functools.partial(_mspe_kernel, branch_taps=branch_taps,
                             out_h=out_h, out_w=out_w, cout=emb_dim)
    out = pl.pallas_call(
        kern,
        out_shape=jax.ShapeDtypeStruct((n, out_h * out_w, emb_dim), jnp.float32),
        grid=(n,),                                                 # one image / step
        in_specs=[
            pl.BlockSpec((1, hp, wp, cin), lambda i: (i, 0, 0, 0)),
            pl.BlockSpec((d_num, kk, cin_w, cpad), lambda i: (0, 0, 0, 0)),  # resident
            pl.BlockSpec((d_num, 1, cpad), lambda i: (0, 0, 0)),             # resident
        ],
        out_specs=pl.BlockSpec((1, out_h * out_w, emb_dim), lambda i: (i, 0, 0)),
        compiler_params=pltpu.CompilerParams(dimension_semantics=("parallel",)),
    )(xp, w_all, b_all)

    out = out.reshape(n, out_h, out_w, emb_dim)
    return jnp.transpose(out, (0, 3, 1, 2))                       # back to NCHW


# ----------------------------------------------------------------------------
# Parameters: raw (PyTorch-like) init + trace-time folding into kernel layout
# ----------------------------------------------------------------------------
def init_raw_params(key, dim_in, emb_dim, kernel_size, c_group, dilations):
    groups = math.gcd(dim_in, emb_dim) if c_group == -1 else c_group
    assert dim_in % groups == 0 and emb_dim % groups == 0
    cin_g = dim_in // groups
    params = []
    for _ in dilations:
        key, kw_, kb_, kg_, kbe_, km_, kv_ = jax.random.split(key, 7)
        fan_in = cin_g * kernel_size * kernel_size
        w = jax.random.normal(kw_, (emb_dim, cin_g, kernel_size, kernel_size),
                              jnp.float32) / math.sqrt(fan_in)
        b = 0.02 * jax.random.normal(kb_, (emb_dim,), jnp.float32)
        # TODO(synk): BatchNorm is implemented in eval mode (running statistics).
        bn = {
            'gamma': 1.0 + 0.1 * jax.random.normal(kg_, (emb_dim,), jnp.float32),
            'beta': 0.05 * jax.random.normal(kbe_, (emb_dim,), jnp.float32),
            'mean': 0.05 * jax.random.normal(km_, (emb_dim,), jnp.float32),
            'var': 1.0 + 0.1 * jnp.abs(jax.random.normal(kv_, (emb_dim,), jnp.float32)),
        }
        params.append({'w': w, 'b': b, 'bn': bn})
    return params, groups


def fold_params(raw, groups, dim_in, emb_dim, kernel_size, eps=1e-6):
    """Fold BN into conv, expand grouped conv to dense block-diagonal, lane-pad Cout."""
    d_num = len(raw)
    kk = kernel_size * kernel_size
    cpad = ((emb_dim + 127) // 128) * 128
    cin_g = dim_in // groups
    cout_g = emb_dim // groups
    w_all = jnp.zeros((d_num, kk, dim_in, cpad), jnp.float32)
    b_all = jnp.zeros((d_num, 1, cpad), jnp.float32)
    for di, p in enumerate(raw):
        scale = p['bn']['gamma'] / jnp.sqrt(p['bn']['var'] + eps)          # (Cout,)
        shift = p['bn']['beta'] - p['bn']['mean'] * scale
        w = p['w'] * scale[:, None, None, None]                            # folded W
        b = p['b'] * scale + shift                                         # folded b
        # grouped -> dense block-diagonal (Cout, Cin, K, K)
        wd = jnp.zeros((emb_dim, dim_in, kernel_size, kernel_size), jnp.float32)
        for g in range(groups):
            wd = wd.at[g * cout_g:(g + 1) * cout_g,
                       g * cin_g:(g + 1) * cin_g].set(w[g * cout_g:(g + 1) * cout_g])
        # (Cout, Cin, K, K) -> (K*K, Cin, Cout)
        wk = jnp.transpose(wd, (2, 3, 1, 0)).reshape(kk, dim_in, emb_dim)
        w_all = w_all.at[di, :, :, :emb_dim].set(wk)
        b_all = b_all.at[di, 0, :emb_dim].set(b)
    return w_all.astype(jnp.bfloat16), b_all


# ----------------------------------------------------------------------------
# Plain-JAX reference (mirrors the PyTorch MSPatchEmb forward, eval-mode BN)
# ----------------------------------------------------------------------------
def ms_patch_emb_ref(x_nchw, raw, *, kernel_size, stride, dilations, groups, eps=1e-6):
    outs = []
    for p, d in zip(raw, dilations):
        pad = math.ceil(((kernel_size - 1) * d + 1 - stride) / 2)
        y = lax.conv_general_dilated(
            x_nchw, p['w'], window_strides=(stride, stride),
            padding=[(pad, pad), (pad, pad)], rhs_dilation=(d, d),
            feature_group_count=groups,
            dimension_numbers=('NCHW', 'OIHW', 'NCHW'))
        y = y + p['b'][None, :, None, None]
        bn = p['bn']
        y = ((y - bn['mean'][None, :, None, None])
             / jnp.sqrt(bn['var'] + eps)[None, :, None, None]
             * bn['gamma'][None, :, None, None] + bn['beta'][None, :, None, None])
        y = y * jax.nn.sigmoid(y)                                   # SiLU
        outs.append(y)
    return jnp.mean(jnp.stack(outs, axis=-1), axis=-1)


# ----------------------------------------------------------------------------
# Demo / self-check
# ----------------------------------------------------------------------------
if __name__ == "__main__":
    DIM_IN, EMB_DIM = 4, 32
    KERNEL_SIZE, STRIDE = 3, 1
    DILATIONS = (1, 2, 3)
    C_GROUP = -1                      # -> gcd(4, 32) = 4 groups, like the module default
    N, H, W = 2, 16, 16

    key = jax.random.PRNGKey(0)
    kp, kx = jax.random.split(key)
    raw_params, groups = init_raw_params(kp, DIM_IN, EMB_DIM, KERNEL_SIZE, C_GROUP, DILATIONS)
    w_all, b_all = fold_params(raw_params, groups, DIM_IN, EMB_DIM, KERNEL_SIZE)

    x = jax.random.normal(kx, (N, DIM_IN, H, W), jnp.float32)       # NCHW input

    fwd = jax.jit(functools.partial(
        ms_patch_emb_pallas, kernel_size=KERNEL_SIZE, stride=STRIDE,
        dilations=DILATIONS, emb_dim=EMB_DIM))
    out = fwd(x, w_all, b_all)
    jax.block_until_ready(out)

    ref = ms_patch_emb_ref(x, raw_params, kernel_size=KERNEL_SIZE, stride=STRIDE,
                           dilations=DILATIONS, groups=groups)

    assert out.shape == (N, EMB_DIM, H, W), out.shape
    assert bool(jnp.all(jnp.isfinite(out)))
    assert bool(jnp.allclose(out, ref, atol=5e-2, rtol=5e-2))
    print("KERNEL_OK")
</pallas_src>

<mosaic_0001>
module attributes {stable_mosaic.version = 11 : i64} {
  func.func @_mspe_kernel(%arg0: i32, %arg1: memref<1x22x22x4xf32, #tpu.memory_space<vmem>>, %arg2: memref<3x9x4x128xbf16, #tpu.memory_space<vmem>>, %arg3: memref<3x1x128xf32, #tpu.memory_space<vmem>>, %arg4: memref<1x256x32xf32, #tpu.memory_space<vmem>>) attributes {dimension_semantics = [#tpu.dimension_semantics<parallel>], iteration_bounds = array<i64: 2>, scalar_prefetch = 0 : i64, scratch_operands = 0 : i64, tpu.core_type = #tpu.core_type<tc>, window_params = [{transform_indices = @transform_0, window_bounds = array<i64: 1, 22, 22, 4>}, {pipeline_mode = #tpu.pipeline_mode<synchronous>, transform_indices = @transform_1, window_bounds = array<i64: 3, 9, 4, 128>}, {pipeline_mode = #tpu.pipeline_mode<synchronous>, transform_indices = @transform_2, window_bounds = array<i64: 3, 1, 128>}, {transform_indices = @transform_3, window_bounds = array<i64: 1, 256, 32>}]} {
    %c0 = arith.constant 0 : index
    %c0_0 = arith.constant 0 : index
    %c0_1 = arith.constant 0 : index
    %c0_2 = arith.constant 0 : index
    %0 = vector.load %arg1[%c0, %c0_0, %c0_1, %c0_2] : memref<1x22x22x4xf32, #tpu.memory_space<vmem>>, vector<1x22x22x4xf32>
    %1 = vector.shape_cast %0 : vector<1x22x22x4xf32> to vector<22x22x4xf32>
    %cst = arith.constant 0.000000e+00 : f32
    %2 = vector.broadcast %cst : f32 to vector<256x128xf32>
    %cst_3 = arith.constant 0.000000e+00 : f32
    %3 = vector.broadcast %cst_3 : f32 to vector<256x128xf32>
    %4 = vector.extract_strided_slice %1 {offsets = [2, 2, 0], sizes = [16, 16, 4], strides = [1, 1, 1]} : vector<22x22x4xf32> to vector<16x16x4xf32>
    %5 = vector.shape_cast %4 : vector<16x16x4xf32> to vector<256x4xf32>
    %6 = arith.truncf %5 : vector<256x4xf32> to vector<256x4xbf16>
    %c0_4 = arith.constant 0 : index
    %c0_5 = arith.constant 0 : index
    %c0_6 = arith.constant 0 : index
    %c0_7 = arith.constant 0 : index
    %7 = vector.load %arg2[%c0_4, %c0_5, %c0_6, %c0_7] : memref<3x9x4x128xbf16, #tpu.memory_space<vmem>>, vector<1x1x4x128xbf16>
    %8 = vector.shape_cast %7 : vector<1x1x4x128xbf16> to vector<4x128xbf16>
    %cst_8 = arith.constant dense<0.000000e+00> : vector<256x128xf32>
    %9 = tpu.matmul %6, %8, %cst_8 {dimension_numbers = #tpu.dot_dimension_numbers<[1], [0], [0], [1], [0, 0, 1, 1], [], []>} : vector<256x4xbf16>, vector<4x128xbf16>, vector<256x128xf32> -> vector<256x128xf32>
    %10 = arith.addf %3, %9 : vector<256x128xf32>
    %11 = vector.extract_strided_slice %1 {offsets = [2, 3, 0], sizes = [16, 16, 4], strides = [1, 1, 1]} : vector<22x22x4xf32> to vector<16x16x4xf32>
    %12 = vector.shape_cast %11 : vector<16x16x4xf32> to vector<256x4xf32>
    %13 = arith.truncf %12 : vector<256x4xf32> to vector<256x4xbf16>
    %c0_9 = arith.constant 0 : index
    %c1 = arith.constant 1 : index
    %c0_10 = arith.constant 0 : index
    %c0_11 = arith.constant 0 : index
    %14 = vector.load %arg2[%c0_9, %c1, %c0_10, %c0_11] : memref<3x9x4x128xbf16, #tpu.memory_space<vmem>>, vector<1x1x4x128xbf16>
    %15 = vector.shape_cast %14 : vector<1x1x4x128xbf16> to vector<4x128xbf16>
    %cst_12 = arith.constant dense<0.000000e+00> : vector<256x128xf32>
    %16 = tpu.matmul %13, %15, %cst_12 {dimension_numbers = #tpu.dot_dimension_numbers<[1], [0], [0], [1], [0, 0, 1, 1], [], []>} : vector<256x4xbf16>, vector<4x128xbf16>, vector<256x128xf32> -> vector<256x128xf32>
    %17 = arith.addf %10, %16 : vector<256x128xf32>
    %18 = vector.extract_strided_slice %1 {offsets = [2, 4, 0], sizes = [16, 16, 4], strides = [1, 1, 1]} : vector<22x22x4xf32> to vector<16x16x4xf32>
    %19 = vector.shape_cast %18 : vector<16x16x4xf32> to vector<256x4xf32>
    %20 = arith.truncf %19 : vector<256x4xf32> to vector<256x4xbf16>
    %c0_13 = arith.constant 0 : index
    %c2 = arith.constant 2 : index
    %c0_14 = arith.constant 0 : index
    %c0_15 = arith.constant 0 : index
    %21 = vector.load %arg2[%c0_13, %c2, %c0_14, %c0_15] : memref<3x9x4x128xbf16, #tpu.memory_space<vmem>>, vector<1x1x4x128xbf16>
    %22 = vector.shape_cast %21 : vector<1x1x4x128xbf16> to vector<4x128xbf16>
    %cst_16 = arith.constant dense<0.000000e+00> : vector<256x128xf32>
    %23 = tpu.matmul %20, %22, %cst_16 {dimension_numbers = #tpu.dot_dimension_numbers<[1], [0], [0], [1], [0, 0, 1, 1], [], []>} : vector<256x4xbf16>, vector<4x128xbf16>, vector<256x128xf32> -> vector<256x128xf32>
    %24 = arith.addf %17, %23 : vector<256x128xf32>
    %25 = vector.extract_strided_slice %1 {offsets = [3, 2, 0], sizes = [16, 16, 4], strides = [1, 1, 1]} : vector<22x22x4xf32> to vector<16x16x4xf32>
    %26 = vector.shape_cast %25 : vector<16x16x4xf32> to vector<256x4xf32>
    %27 = arith.truncf %26 : vector<256x4xf32> to vector<256x4xbf16>
    %c0_17 = arith.constant 0 : index
    %c3 = arith.constant 3 : index
    %c0_18 = arith.constant 0 : index
    %c0_19 = arith.constant 0 : index
    %28 = vector.load %arg2[%c0_17, %c3, %c0_18, %c0_19] : memref<3x9x4x128xbf16, #tpu.memory_space<vmem>>, vector<1x1x4x128xbf16>
    %29 = vector.shape_cast %28 : vector<1x1x4x128xbf16> to vector<4x128xbf16>
    %cst_20 = arith.constant dense<0.000000e+00> : vector<256x128xf32>
    %30 = tpu.matmul %27, %29, %cst_20 {dimension_numbers = #tpu.dot_dimension_numbers<[1], [0], [0], [1], [0, 0, 1, 1], [], []>} : vector<256x4xbf16>, vector<4x128xbf16>, vector<256x128xf32> -> vector<256x128xf32>
    %31 = arith.addf %24, %30 : vector<256x128xf32>
    %32 = vector.extract_strided_slice %1 {offsets = [3, 3, 0], sizes = [16, 16, 4], strides = [1, 1, 1]} : vector<22x22x4xf32> to vector<16x16x4xf32>
    %33 = vector.shape_cast %32 : vector<16x16x4xf32> to vector<256x4xf32>
    %34 = arith.truncf %33 : vector<256x4xf32> to vector<256x4xbf16>
    %c0_21 = arith.constant 0 : index
    %c4 = arith.constant 4 : index
    %c0_22 = arith.constant 0 : index
    %c0_23 = arith.constant 0 : index
    %35 = vector.load %arg2[%c0_21, %c4, %c0_22, %c0_23] : memref<3x9x4x128xbf16, #tpu.memory_space<vmem>>, vector<1x1x4x128xbf16>
    %36 = vector.shape_cast %35 : vector<1x1x4x128xbf16> to vector<4x128xbf16>
    %cst_24 = arith.constant dense<0.000000e+00> : vector<256x128xf32>
    %37 = tpu.matmul %34, %36, %cst_24 {dimension_numbers = #tpu.dot_dimension_numbers<[1], [0], [0], [1], [0, 0, 1, 1], [], []>} : vector<256x4xbf16>, vector<4x128xbf16>, vector<256x128xf32> -> vector<256x128xf32>
    %38 = arith.addf %31, %37 : vector<256x128xf32>
    %39 = vector.extract_strided_slice %1 {offsets = [3, 4, 0], sizes = [16, 16, 4], strides = [1, 1, 1]} : vector<22x22x4xf32> to vector<16x16x4xf32>
    %40 = vector.shape_cast %39 : vector<16x16x4xf32> to vector<256x4xf32>
    %41 = arith.truncf %40 : vector<256x4xf32> to vector<256x4xbf16>
    %c0_25 = arith.constant 0 : index
    %c5 = arith.constant 5 : index
    %c0_26 = arith.constant 0 : index
    %c0_27 = arith.constant 0 : index
    %42 = vector.load %arg2[%c0_25, %c5, %c0_26, %c0_27] : memref<3x9x4x128xbf16, #tpu.memory_space<vmem>>, vector<1x1x4x128xbf16>
    %43 = vector.shape_cast %42 : vector<1x1x4x128xbf16> to vector<4x128xbf16>
    %cst_28 = arith.constant dense<0.000000e+00> : vector<256x128xf32>
    %44 = tpu.matmul %41, %43, %cst_28 {dimension_numbers = #tpu.dot_dimension_numbers<[1], [0], [0], [1], [0, 0, 1, 1], [], []>} : vector<256x4xbf16>, vector<4x128xbf16>, vector<256x128xf32> -> vector<256x128xf32>
    %45 = arith.addf %38, %44 : vector<256x128xf32>
    %46 = vector.extract_strided_slice %1 {offsets = [4, 2, 0], sizes = [16, 16, 4], strides = [1, 1, 1]} : vector<22x22x4xf32> to vector<16x16x4xf32>
    %47 = vector.shape_cast %46 : vector<16x16x4xf32> to vector<256x4xf32>
    %48 = arith.truncf %47 : vector<256x4xf32> to vector<256x4xbf16>
    %c0_29 = arith.constant 0 : index
    %c6 = arith.constant 6 : index
    %c0_30 = arith.constant 0 : index
    %c0_31 = arith.constant 0 : index
    %49 = vector.load %arg2[%c0_29, %c6, %c0_30, %c0_31] : memref<3x9x4x128xbf16, #tpu.memory_space<vmem>>, vector<1x1x4x128xbf16>
    %50 = vector.shape_cast %49 : vector<1x1x4x128xbf16> to vector<4x128xbf16>
    %cst_32 = arith.constant dense<0.000000e+00> : vector<256x128xf32>
    %51 = tpu.matmul %48, %50, %cst_32 {dimension_numbers = #tpu.dot_dimension_numbers<[1], [0], [0], [1], [0, 0, 1, 1], [], []>} : vector<256x4xbf16>, vector<4x128xbf16>, vector<256x128xf32> -> vector<256x128xf32>
    %52 = arith.addf %45, %51 : vector<256x128xf32>
    %53 = vector.extract_strided_slice %1 {offsets = [4, 3, 0], sizes = [16, 16, 4], strides = [1, 1, 1]} : vector<22x22x4xf32> to vector<16x16x4xf32>
    %54 = vector.shape_cast %53 : vector<16x16x4xf32> to vector<256x4xf32>
    %55 = arith.truncf %54 : vector<256x4xf32> to vector<256x4xbf16>
    %c0_33 = arith.constant 0 : index
    %c7 = arith.constant 7 : index
    %c0_34 = arith.constant 0 : index
    %c0_35 = arith.constant 0 : index
    %56 = vector.load %arg2[%c0_33, %c7, %c0_34, %c0_35] : memref<3x9x4x128xbf16, #tpu.memory_space<vmem>>, vector<1x1x4x128xbf16>
    %57 = vector.shape_cast %56 : vector<1x1x4x128xbf16> to vector<4x128xbf16>
    %cst_36 = arith.constant dense<0.000000e+00> : vector<256x128xf32>
    %58 = tpu.matmul %55, %57, %cst_36 {dimension_numbers = #tpu.dot_dimension_numbers<[1], [0], [0], [1], [0, 0, 1, 1], [], []>} : vector<256x4xbf16>, vector<4x128xbf16>, vector<256x128xf32> -> vector<256x128xf32>
    %59 = arith.addf %52, %58 : vector<256x128xf32>
    %60 = vector.extract_strided_slice %1 {offsets = [4, 4, 0], sizes = [16, 16, 4], strides = [1, 1, 1]} : vector<22x22x4xf32> to vector<16x16x4xf32>
    %61 = vector.shape_cast %60 : vector<16x16x4xf32> to vector<256x4xf32>
    %62 = arith.truncf %61 : vector<256x4xf32> to vector<256x4xbf16>
    %c0_37 = arith.constant 0 : index
    %c8 = arith.constant 8 : index
    %c0_38 = arith.constant 0 : index
    %c0_39 = arith.constant 0 : index
    %63 = vector.load %arg2[%c0_37, %c8, %c0_38, %c0_39] : memref<3x9x4x128xbf16, #tpu.memory_space<vmem>>, vector<1x1x4x128xbf16>
    %64 = vector.shape_cast %63 : vector<1x1x4x128xbf16> to vector<4x128xbf16>
    %cst_40 = arith.constant dense<0.000000e+00> : vector<256x128xf32>
    %65 = tpu.matmul %62, %64, %cst_40 {dimension_numbers = #tpu.dot_dimension_numbers<[1], [0], [0], [1], [0, 0, 1, 1], [], []>} : vector<256x4xbf16>, vector<4x128xbf16>, vector<256x128xf32> -> vector<256x128xf32>
    %66 = arith.addf %59, %65 : vector<256x128xf32>
    %c0_41 = arith.constant 0 : index
    %c0_42 = arith.constant 0 : index
    %c0_43 = arith.constant 0 : index
    %67 = vector.load %arg3[%c0_41, %c0_42, %c0_43] : memref<3x1x128xf32, #tpu.memory_space<vmem>>, vector<1x1x128xf32>
    %68 = vector.shape_cast %67 : vector<1x1x128xf32> to vector<1x128xf32>
    %69 = vector.broadcast %68 : vector<1x128xf32> to vector<256x128xf32>
    %70 = arith.addf %66, %69 : vector<256x128xf32>
    %cst_44 = arith.constant 0.000000e+00 : f32
    %71 = vector.broadcast %cst_44 : f32 to vector<256x128xf32>
    %72 = arith.subf %71, %70 : vector<256x128xf32>
    %73 = math.exp %72 : vector<256x128xf32>
    %cst_45 = arith.constant 1.000000e+00 : f32
    %74 = vector.broadcast %cst_45 : f32 to vector<256x128xf32>
    %75 = arith.addf %74, %73 : vector<256x128xf32>
    %76 = tpu.reciprocal %75 {approx = true} : vector<256x128xf32> -> vector<256x128xf32>
    %77 = arith.mulf %70, %76 : vector<256x128xf32>
    %78 = arith.addf %2, %77 : vector<256x128xf32>
    %cst_46 = arith.constant 0.000000e+00 : f32
    %79 = vector.broadcast %cst_46 : f32 to vector<256x128xf32>
    %80 = vector.extract_strided_slice %1 {offsets = [1, 1, 0], sizes = [16, 16, 4], strides = [1, 1, 1]} : vector<22x22x4xf32> to vector<16x16x4xf32>
    %81 = vector.shape_cast %80 : vector<16x16x4xf32> to vector<256x4xf32>
    %82 = arith.truncf %81 : vector<256x4xf32> to vector<256x4xbf16>
    %c1_47 = arith.constant 1 : index
    %c0_48 = arith.constant 0 : index
    %c0_49 = arith.constant 0 : index
    %c0_50 = arith.constant 0 : index
    %83 = vector.load %arg2[%c1_47, %c0_48, %c0_49, %c0_50] : memref<3x9x4x128xbf16, #tpu.memory_space<vmem>>, vector<1x1x4x128xbf16>
    %84 = vector.shape_cast %83 : vector<1x1x4x128xbf16> to vector<4x128xbf16>
    %cst_51 = arith.constant dense<0.000000e+00> : vector<256x128xf32>
    %85 = tpu.matmul %82, %84, %cst_51 {dimension_numbers = #tpu.dot_dimension_numbers<[1], [0], [0], [1], [0, 0, 1, 1], [], []>} : vector<256x4xbf16>, vector<4x128xbf16>, vector<256x128xf32> -> vector<256x128xf32>
    %86 = arith.addf %79, %85 : vector<256x128xf32>
    %87 = vector.extract_strided_slice %1 {offsets = [1, 3, 0], sizes = [16, 16, 4], strides = [1, 1, 1]} : vector<22x22x4xf32> to vector<16x16x4xf32>
    %88 = vector.shape_cast %87 : vector<16x16x4xf32> to vector<256x4xf32>
    %89 = arith.truncf %88 : vector<256x4xf32> to vector<256x4xbf16>
    %c1_52 = arith.constant 1 : index
    %c1_53 = arith.constant 1 : index
    %c0_54 = arith.constant 0 : index
    %c0_55 = arith.constant 0 : index
    %90 = vector.load %arg2[%c1_52, %c1_53, %c0_54, %c0_55] : memref<3x9x4x128xbf16, #tpu.memory_space<vmem>>, vector<1x1x4x128xbf16>
    %91 = vector.shape_cast %90 : vector<1x1x4x128xbf16> to vector<4x128xbf16>
    %cst_56 = arith.constant dense<0.000000e+00> : vector<256x128xf32>
    %92 = tpu.matmul %89, %91, %cst_56 {dimension_numbers = #tpu.dot_dimension_numbers<[1], [0], [0], [1], [0, 0, 1, 1], [], []>} : vector<256x4xbf16>, vector<4x128xbf16>, vector<256x128xf32> -> vector<256x128xf32>
    %93 = arith.addf %86, %92 : vector<256x128xf32>
    %94 = vector.extract_strided_slice %1 {offsets = [1, 5, 0], sizes = [16, 16, 4], strides = [1, 1, 1]} : vector<22x22x4xf32> to vector<16x16x4xf32>
    %95 = vector.shape_cast %94 : vector<16x16x4xf32> to vector<256x4xf32>
    %96 = arith.truncf %95 : vector<256x4xf32> to vector<256x4xbf16>
    %c1_57 = arith.constant 1 : index
    %c2_58 = arith.constant 2 : index
    %c0_59 = arith.constant 0 : index
    %c0_60 = arith.constant 0 : index
    %97 = vector.load %arg2[%c1_57, %c2_58, %c0_59, %c0_60] : memref<3x9x4x128xbf16, #tpu.memory_space<vmem>>, vector<1x1x4x128xbf16>
    %98 = vector.shape_cast %97 : vector<1x1x4x128xbf16> to vector<4x128xbf16>
    %cst_61 = arith.constant dense<0.000000e+00> : vector<256x128xf32>
    %99 = tpu.matmul %96, %98, %cst_61 {dimension_numbers = #tpu.dot_dimension_numbers<[1], [0], [0], [1], [0, 0, 1, 1], [], []>} : vector<256x4xbf16>, vector<4x128xbf16>, vector<256x128xf32> -> vector<256x128xf32>
    %100 = arith.addf %93, %99 : vector<256x128xf32>
    %101 = vector.extract_strided_slice %1 {offsets = [3, 1, 0], sizes = [16, 16, 4], strides = [1, 1, 1]} : vector<22x22x4xf32> to vector<16x16x4xf32>
    %102 = vector.shape_cast %101 : vector<16x16x4xf32> to vector<256x4xf32>
    %103 = arith.truncf %102 : vector<256x4xf32> to vector<256x4xbf16>
    %c1_62 = arith.constant 1 : index
    %c3_63 = arith.constant 3 : index
    %c0_64 = arith.constant 0 : index
    %c0_65 = arith.constant 0 : index
    %104 = vector.load %arg2[%c1_62, %c3_63, %c0_64, %c0_65] : memref<3x9x4x128xbf16, #tpu.memory_space<vmem>>, vector<1x1x4x128xbf16>
    %105 = vector.shape_cast %104 : vector<1x1x4x128xbf16> to vector<4x128xbf16>
    %cst_66 = arith.constant dense<0.000000e+00> : vector<256x128xf32>
    %106 = tpu.matmul %103, %105, %cst_66 {dimension_numbers = #tpu.dot_dimension_numbers<[1], [0], [0], [1], [0, 0, 1, 1], [], []>} : vector<256x4xbf16>, vector<4x128xbf16>, vector<256x128xf32> -> vector<256x128xf32>
    %107 = arith.addf %100, %106 : vector<256x128xf32>
    %108 = vector.extract_strided_slice %1 {offsets = [3, 3, 0], sizes = [16, 16, 4], strides = [1, 1, 1]} : vector<22x22x4xf32> to vector<16x16x4xf32>
    %109 = vector.shape_cast %108 : vector<16x16x4xf32> to vector<256x4xf32>
    %110 = arith.truncf %109 : vector<256x4xf32> to vector<256x4xbf16>
    %c1_67 = arith.constant 1 : index
    %c4_68 = arith.constant 4 : index
    %c0_69 = arith.constant 0 : index
    %c0_70 = arith.constant 0 : index
    %111 = vector.load %arg2[%c1_67, %c4_68, %c0_69, %c0_70] : memref<3x9x4x128xbf16, #tpu.memory_space<vmem>>, vector<1x1x4x128xbf16>
    %112 = vector.shape_cast %111 : vector<1x1x4x128xbf16> to vector<4x128xbf16>
    %cst_71 = arith.constant dense<0.000000e+00> : vector<256x128xf32>
    %113 = tpu.matmul %110, %112, %cst_71 {dimension_numbers = #tpu.dot_dimension_numbers<[1], [0], [0], [1], [0, 0, 1, 1], [], []>} : vector<256x4xbf16>, vector<4x128xbf16>, vector<256x128xf32> -> vector<256x128xf32>
    %114 = arith.addf %107, %113 : vector<256x128xf32>
    %115 = vector.extract_strided_slice %1 {offsets = [3, 5, 0], sizes = [16, 16, 4], strides = [1, 1, 1]} : vector<22x22x4xf32> to vector<16x16x4xf32>
    %116 = vector.shape_cast %115 : vector<16x16x4xf32> to vector<256x4xf32>
    %117 = arith.truncf %116 : vector<256x4xf32> to vector<256x4xbf16>
    %c1_72 = arith.constant 1 : index
    %c5_73 = arith.constant 5 : index
    %c0_74 = arith.constant 0 : index
    %c0_75 = arith.constant 0 : index
    %118 = vector.load %arg2[%c1_72, %c5_73, %c0_74, %c0_75] : memref<3x9x4x128xbf16, #tpu.memory_space<vmem>>, vector<1x1x4x128xbf16>
    %119 = vector.shape_cast %118 : vector<1x1x4x128xbf16> to vector<4x128xbf16>
    %cst_76 = arith.constant dense<0.000000e+00> : vector<256x128xf32>
    %120 = tpu.matmul %117, %119, %cst_76 {dimension_numbers = #tpu.dot_dimension_numbers<[1], [0], [0], [1], [0, 0, 1, 1], [], []>} : vector<256x4xbf16>, vector<4x128xbf16>, vector<256x128xf32> -> vector<256x128xf32>
    %121 = arith.addf %114, %120 : vector<256x128xf32>
    %122 = vector.extract_strided_slice %1 {offsets = [5, 1, 0], sizes = [16, 16, 4], strides = [1, 1, 1]} : vector<22x22x4xf32> to vector<16x16x4xf32>
    %123 = vector.shape_cast %122 : vector<16x16x4xf32> to vector<256x4xf32>
    %124 = arith.truncf %123 : vector<256x4xf32> to vector<256x4xbf16>
    %c1_77 = arith.constant 1 : index
    %c6_78 = arith.constant 6 : index
    %c0_79 = arith.constant 0 : index
    %c0_80 = arith.constant 0 : index
    %125 = vector.load %arg2[%c1_77, %c6_78, %c0_79, %c0_80] : memref<3x9x4x128xbf16, #tpu.memory_space<vmem>>, vector<1x1x4x128xbf16>
    %126 = vector.shape_cast %125 : vector<1x1x4x128xbf16> to vector<4x128xbf16>
    %cst_81 = arith.constant dense<0.000000e+00> : vector<256x128xf32>
    %127 = tpu.matmul %124, %126, %cst_81 {dimension_numbers = #tpu.dot_dimension_numbers<[1], [0], [0], [1], [0, 0, 1, 1], [], []>} : vector<256x4xbf16>, vector<4x128xbf16>, vector<256x128xf32> -> vector<256x128xf32>
    %128 = arith.addf %121, %127 : vector<256x128xf32>
    %129 = vector.extract_strided_slice %1 {offsets = [5, 3, 0], sizes = [16, 16, 4], strides = [1, 1, 1]} : vector<22x22x4xf32> to vector<16x16x4xf32>
    %130 = vector.shape_cast %129 : vector<16x16x4xf32> to vector<256x4xf32>
    %131 = arith.truncf %130 : vector<256x4xf32> to vector<256x4xbf16>
    %c1_82 = arith.constant 1 : index
    %c7_83 = arith.constant 7 : index
    %c0_84 = arith.constant 0 : index
    %c0_85 = arith.constant 0 : index
    %132 = vector.load %arg2[%c1_82, %c7_83, %c0_84, %c0_85] : memref<3x9x4x128xbf16, #tpu.memory_space<vmem>>, vector<1x1x4x128xbf16>
    %133 = vector.shape_cast %132 : vector<1x1x4x128xbf16> to vector<4x128xbf16>
    %cst_86 = arith.constant dense<0.000000e+00> : vector<256x128xf32>
    %134 = tpu.matmul %131, %133, %cst_86 {dimension_numbers = #tpu.dot_dimension_numbers<[1], [0], [0], [1], [0, 0, 1, 1], [], []>} : vector<256x4xbf16>, vector<4x128xbf16>, vector<256x128xf32> -> vector<256x128xf32>
    %135 = arith.addf %128, %134 : vector<256x128xf32>
    %136 = vector.extract_strided_slice %1 {offsets = [5, 5, 0], sizes = [16, 16, 4], strides = [1, 1, 1]} : vector<22x22x4xf32> to vector<16x16x4xf32>
    %137 = vector.shape_cast %136 : vector<16x16x4xf32> to vector<256x4xf32>
    %138 = arith.truncf %137 : vector<256x4xf32> to vector<256x4xbf16>
    %c1_87 = arith.constant 1 : index
    %c8_88 = arith.constant 8 : index
    %c0_89 = arith.constant 0 : index
    %c0_90 = arith.constant 0 : index
    %139 = vector.load %arg2[%c1_87, %c8_88, %c0_89, %c0_90] : memref<3x9x4x128xbf16, #tpu.memory_space<vmem>>, vector<1x1x4x128xbf16>
    %140 = vector.shape_cast %139 : vector<1x1x4x128xbf16> to vector<4x128xbf16>
    %cst_91 = arith.constant dense<0.000000e+00> : vector<256x128xf32>
    %141 = tpu.matmul %138, %140, %cst_91 {dimension_numbers = #tpu.dot_dimension_numbers<[1], [0], [0], [1], [0, 0, 1, 1], [], []>} : vector<256x4xbf16>, vector<4x128xbf16>, vector<256x128xf32> -> vector<256x128xf32>
    %142 = arith.addf %135, %141 : vector<256x128xf32>
    %c1_92 = arith.constant 1 : index
    %c0_93 = arith.constant 0 : index
    %c0_94 = arith.constant 0 : index
    %143 = vector.load %arg3[%c1_92, %c0_93, %c0_94] : memref<3x1x128xf32, #tpu.memory_space<vmem>>, vector<1x1x128xf32>
    %144 = vector.shape_cast %143 : vector<1x1x128xf32> to vector<1x128xf32>
    %145 = vector.broadcast %144 : vector<1x128xf32> to vector<256x128xf32>
    %146 = arith.addf %142, %145 : vector<256x128xf32>
    %cst_95 = arith.constant 0.000000e+00 : f32
    %147 = vector.broadcast %cst_95 : f32 to vector<256x128xf32>
    %148 = arith.subf %147, %146 : vector<256x128xf32>
    %149 = math.exp %148 : vector<256x128xf32>
    %cst_96 = arith.constant 1.000000e+00 : f32
    %150 = vector.broadcast %cst_96 : f32 to vector<256x128xf32>
    %151 = arith.addf %150, %149 : vector<256x128xf32>
    %152 = tpu.reciprocal %151 {approx = true} : vector<256x128xf32> -> vector<256x128xf32>
    %153 = arith.mulf %146, %152 : vector<256x128xf32>
    %154 = arith.addf %78, %153 : vector<256x128xf32>
    %cst_97 = arith.constant 0.000000e+00 : f32
    %155 = vector.broadcast %cst_97 : f32 to vector<256x128xf32>
    %156 = vector.extract_strided_slice %1 {offsets = [0, 0, 0], sizes = [16, 16, 4], strides = [1, 1, 1]} : vector<22x22x4xf32> to vector<16x16x4xf32>
    %157 = vector.shape_cast %156 : vector<16x16x4xf32> to vector<256x4xf32>
    %158 = arith.truncf %157 : vector<256x4xf32> to vector<256x4xbf16>
    %c2_98 = arith.constant 2 : index
    %c0_99 = arith.constant 0 : index
    %c0_100 = arith.constant 0 : index
    %c0_101 = arith.constant 0 : index
    %159 = vector.load %arg2[%c2_98, %c0_99, %c0_100, %c0_101] : memref<3x9x4x128xbf16, #tpu.memory_space<vmem>>, vector<1x1x4x128xbf16>
    %160 = vector.shape_cast %159 : vector<1x1x4x128xbf16> to vector<4x128xbf16>
    %cst_102 = arith.constant dense<0.000000e+00> : vector<256x128xf32>
    %161 = tpu.matmul %158, %160, %cst_102 {dimension_numbers = #tpu.dot_dimension_numbers<[1], [0], [0], [1], [0, 0, 1, 1], [], []>} : vector<256x4xbf16>, vector<4x128xbf16>, vector<256x128xf32> -> vector<256x128xf32>
    %162 = arith.addf %155, %161 : vector<256x128xf32>
    %163 = vector.extract_strided_slice %1 {offsets = [0, 3, 0], sizes = [16, 16, 4], strides = [1, 1, 1]} : vector<22x22x4xf32> to vector<16x16x4xf32>
    %164 = vector.shape_cast %163 : vector<16x16x4xf32> to vector<256x4xf32>
    %165 = arith.truncf %164 : vector<256x4xf32> to vector<256x4xbf16>
    %c2_103 = arith.constant 2 : index
    %c1_104 = arith.constant 1 : index
    %c0_105 = arith.constant 0 : index
    %c0_106 = arith.constant 0 : index
    %166 = vector.load %arg2[%c2_103, %c1_104, %c0_105, %c0_106] : memref<3x9x4x128xbf16, #tpu.memory_space<vmem>>, vector<1x1x4x128xbf16>
    %167 = vector.shape_cast %166 : vector<1x1x4x128xbf16> to vector<4x128xbf16>
    %cst_107 = arith.constant dense<0.000000e+00> : vector<256x128xf32>
    %168 = tpu.matmul %165, %167, %cst_107 {dimension_numbers = #tpu.dot_dimension_numbers<[1], [0], [0], [1], [0, 0, 1, 1], [], []>} : vector<256x4xbf16>, vector<4x128xbf16>, vector<256x128xf32> -> vector<256x128xf32>
    %169 = arith.addf %162, %168 : vector<256x128xf32>
    %170 = vector.extract_strided_slice %1 {offsets = [0, 6, 0], sizes = [16, 16, 4], strides = [1, 1, 1]} : vector<22x22x4xf32> to vector<16x16x4xf32>
    %171 = vector.shape_cast %170 : vector<16x16x4xf32> to vector<256x4xf32>
    %172 = arith.truncf %171 : vector<256x4xf32> to vector<256x4xbf16>
    %c2_108 = arith.constant 2 : index
    %c2_109 = arith.constant 2 : index
    %c0_110 = arith.constant 0 : index
    %c0_111 = arith.constant 0 : index
    %173 = vector.load %arg2[%c2_108, %c2_109, %c0_110, %c0_111] : memref<3x9x4x128xbf16, #tpu.memory_space<vmem>>, vector<1x1x4x128xbf16>
    %174 = vector.shape_cast %173 : vector<1x1x4x128xbf16> to vector<4x128xbf16>
    %cst_112 = arith.constant dense<0.000000e+00> : vector<256x128xf32>
    %175 = tpu.matmul %172, %174, %cst_112 {dimension_numbers = #tpu.dot_dimension_numbers<[1], [0], [0], [1], [0, 0, 1, 1], [], []>} : vector<256x4xbf16>, vector<4x128xbf16>, vector<256x128xf32> -> vector<256x128xf32>
    %176 = arith.addf %169, %175 : vector<256x128xf32>
    %177 = vector.extract_strided_slice %1 {offsets = [3, 0, 0], sizes = [16, 16, 4], strides = [1, 1, 1]} : vector<22x22x4xf32> to vector<16x16x4xf32>
    %178 = vector.shape_cast %177 : vector<16x16x4xf32> to vector<256x4xf32>
    %179 = arith.truncf %178 : vector<256x4xf32> to vector<256x4xbf16>
    %c2_113 = arith.constant 2 : index
    %c3_114 = arith.constant 3 : index
    %c0_115 = arith.constant 0 : index
    %c0_116 = arith.constant 0 : index
    %180 = vector.load %arg2[%c2_113, %c3_114, %c0_115, %c0_116] : memref<3x9x4x128xbf16, #tpu.memory_space<vmem>>, vector<1x1x4x128xbf16>
    %181 = vector.shape_cast %180 : vector<1x1x4x128xbf16> to vector<4x128xbf16>
    %cst_117 = arith.constant dense<0.000000e+00> : vector<256x128xf32>
    %182 = tpu.matmul %179, %181, %cst_117 {dimension_numbers = #tpu.dot_dimension_numbers<[1], [0], [0], [1], [0, 0, 1, 1], [], []>} : vector<256x4xbf16>, vector<4x128xbf16>, vector<256x128xf32> -> vector<256x128xf32>
    %183 = arith.addf %176, %182 : vector<256x128xf32>
    %184 = vector.extract_strided_slice %1 {offsets = [3, 3, 0], sizes = [16, 16, 4], strides = [1, 1, 1]} : vector<22x22x4xf32> to vector<16x16x4xf32>
    %185 = vector.shape_cast %184 : vector<16x16x4xf32> to vector<256x4xf32>
    %186 = arith.truncf %185 : vector<256x4xf32> to vector<256x4xbf16>
    %c2_118 = arith.constant 2 : index
    %c4_119 = arith.constant 4 : index
    %c0_120 = arith.constant 0 : index
    %c0_121 = arith.constant 0 : index
    %187 = vector.load %arg2[%c2_118, %c4_119, %c0_120, %c0_121] : memref<3x9x4x128xbf16, #tpu.memory_space<vmem>>, vector<1x1x4x128xbf16>
    %188 = vector.shape_cast %187 : vector<1x1x4x128xbf16> to vector<4x128xbf16>
    %cst_122 = arith.constant dense<0.000000e+00> : vector<256x128xf32>
    %189 = tpu.matmul %186, %188, %cst_122 {dimension_numbers = #tpu.dot_dimension_numbers<[1], [0], [0], [1], [0, 0, 1, 1], [], []>} : vector<256x4xbf16>, vector<4x128xbf16>, vector<256x128xf32> -> vector<256x128xf32>
    %190 = arith.addf %183, %189 : vector<256x128xf32>
    %191 = vector.extract_strided_slice %1 {offsets = [3, 6, 0], sizes = [16, 16, 4], strides = [1, 1, 1]} : vector<22x22x4xf32> to vector<16x16x4xf32>
    %192 = vector.shape_cast %191 : vector<16x16x4xf32> to vector<256x4xf32>
    %193 = arith.truncf %192 : vector<256x4xf32> to vector<256x4xbf16>
    %c2_123 = arith.constant 2 : index
    %c5_124 = arith.constant 5 : index
    %c0_125 = arith.constant 0 : index
    %c0_126 = arith.constant 0 : index
    %194 = vector.load %arg2[%c2_123, %c5_124, %c0_125, %c0_126] : memref<3x9x4x128xbf16, #tpu.memory_space<vmem>>, vector<1x1x4x128xbf16>
    %195 = vector.shape_cast %194 : vector<1x1x4x128xbf16> to vector<4x128xbf16>
    %cst_127 = arith.constant dense<0.000000e+00> : vector<256x128xf32>
    %196 = tpu.matmul %193, %195, %cst_127 {dimension_numbers = #tpu.dot_dimension_numbers<[1], [0], [0], [1], [0, 0, 1, 1], [], []>} : vector<256x4xbf16>, vector<4x128xbf16>, vector<256x128xf32> -> vector<256x128xf32>
    %197 = arith.addf %190, %196 : vector<256x128xf32>
    %198 = vector.extract_strided_slice %1 {offsets = [6, 0, 0], sizes = [16, 16, 4], strides = [1, 1, 1]} : vector<22x22x4xf32> to vector<16x16x4xf32>
    %199 = vector.shape_cast %198 : vector<16x16x4xf32> to vector<256x4xf32>
    %200 = arith.truncf %199 : vector<256x4xf32> to vector<256x4xbf16>
    %c2_128 = arith.constant 2 : index
    %c6_129 = arith.constant 6 : index
    %c0_130 = arith.constant 0 : index
    %c0_131 = arith.constant 0 : index
    %201 = vector.load %arg2[%c2_128, %c6_129, %c0_130, %c0_131] : memref<3x9x4x128xbf16, #tpu.memory_space<vmem>>, vector<1x1x4x128xbf16>
    %202 = vector.shape_cast %201 : vector<1x1x4x128xbf16> to vector<4x128xbf16>
    %cst_132 = arith.constant dense<0.000000e+00> : vector<256x128xf32>
    %203 = tpu.matmul %200, %202, %cst_132 {dimension_numbers = #tpu.dot_dimension_numbers<[1], [0], [0], [1], [0, 0, 1, 1], [], []>} : vector<256x4xbf16>, vector<4x128xbf16>, vector<256x128xf32> -> vector<256x128xf32>
    %204 = arith.addf %197, %203 : vector<256x128xf32>
    %205 = vector.extract_strided_slice %1 {offsets = [6, 3, 0], sizes = [16, 16, 4], strides = [1, 1, 1]} : vector<22x22x4xf32> to vector<16x16x4xf32>
    %206 = vector.shape_cast %205 : vector<16x16x4xf32> to vector<256x4xf32>
    %207 = arith.truncf %206 : vector<256x4xf32> to vector<256x4xbf16>
    %c2_133 = arith.constant 2 : index
    %c7_134 = arith.constant 7 : index
    %c0_135 = arith.constant 0 : index
    %c0_136 = arith.constant 0 : index
    %208 = vector.load %arg2[%c2_133, %c7_134, %c0_135, %c0_136] : memref<3x9x4x128xbf16, #tpu.memory_space<vmem>>, vector<1x1x4x128xbf16>
    %209 = vector.shape_cast %208 : vector<1x1x4x128xbf16> to vector<4x128xbf16>
    %cst_137 = arith.constant dense<0.000000e+00> : vector<256x128xf32>
    %210 = tpu.matmul %207, %209, %cst_137 {dimension_numbers = #tpu.dot_dimension_numbers<[1], [0], [0], [1], [0, 0, 1, 1], [], []>} : vector<256x4xbf16>, vector<4x128xbf16>, vector<256x128xf32> -> vector<256x128xf32>
    %211 = arith.addf %204, %210 : vector<256x128xf32>
    %212 = vector.extract_strided_slice %1 {offsets = [6, 6, 0], sizes = [16, 16, 4], strides = [1, 1, 1]} : vector<22x22x4xf32> to vector<16x16x4xf32>
    %213 = vector.shape_cast %212 : vector<16x16x4xf32> to vector<256x4xf32>
    %214 = arith.truncf %213 : vector<256x4xf32> to vector<256x4xbf16>
    %c2_138 = arith.constant 2 : index
    %c8_139 = arith.constant 8 : index
    %c0_140 = arith.constant 0 : index
    %c0_141 = arith.constant 0 : index
    %215 = vector.load %arg2[%c2_138, %c8_139, %c0_140, %c0_141] : memref<3x9x4x128xbf16, #tpu.memory_space<vmem>>, vector<1x1x4x128xbf16>
    %216 = vector.shape_cast %215 : vector<1x1x4x128xbf16> to vector<4x128xbf16>
    %cst_142 = arith.constant dense<0.000000e+00> : vector<256x128xf32>
    %217 = tpu.matmul %214, %216, %cst_142 {dimension_numbers = #tpu.dot_dimension_numbers<[1], [0], [0], [1], [0, 0, 1, 1], [], []>} : vector<256x4xbf16>, vector<4x128xbf16>, vector<256x128xf32> -> vector<256x128xf32>
    %218 = arith.addf %211, %217 : vector<256x128xf32>
    %c2_143 = arith.constant 2 : index
    %c0_144 = arith.constant 0 : index
    %c0_145 = arith.constant 0 : index
    %219 = vector.load %arg3[%c2_143, %c0_144, %c0_145] : memref<3x1x128xf32, #tpu.memory_space<vmem>>, vector<1x1x128xf32>
    %220 = vector.shape_cast %219 : vector<1x1x128xf32> to vector<1x128xf32>
    %221 = vector.broadcast %220 : vector<1x128xf32> to vector<256x128xf32>
    %222 = arith.addf %218, %221 : vector<256x128xf32>
    %cst_146 = arith.constant 0.000000e+00 : f32
    %223 = vector.broadcast %cst_146 : f32 to vector<256x128xf32>
    %224 = arith.subf %223, %222 : vector<256x128xf32>
    %225 = math.exp %224 : vector<256x128xf32>
    %cst_147 = arith.constant 1.000000e+00 : f32
    %226 = vector.broadcast %cst_147 : f32 to vector<256x128xf32>
    %227 = arith.addf %226, %225 : vector<256x128xf32>
    %228 = tpu.reciprocal %227 {approx = true} : vector<256x128xf32> -> vector<256x128xf32>
    %229 = arith.mulf %222, %228 : vector<256x128xf32>
    %230 = arith.addf %154, %229 : vector<256x128xf32>
    %cst_148 = arith.constant 0.333333343 : f32
    %231 = vector.broadcast %cst_148 : f32 to vector<256x128xf32>
    %232 = arith.mulf %230, %231 : vector<256x128xf32>
    %233 = vector.extract_strided_slice %232 {offsets = [0, 0], sizes = [256, 32], strides = [1, 1]} : vector<256x128xf32> to vector<256x32xf32>
    %c0_149 = arith.constant 0 : index
    %c0_150 = arith.constant 0 : index
    %c0_151 = arith.constant 0 : index
    %234 = vector.load %arg4[%c0_149, %c0_150, %c0_151] : memref<1x256x32xf32, #tpu.memory_space<vmem>>, vector<1x256x32xf32>
    %235 = vector.shape_cast %234 : vector<1x256x32xf32> to vector<256x32xf32>
    %236 = vector.shape_cast %233 : vector<256x32xf32> to vector<1x256x32xf32>
    tpu.vector_store %arg4[%c0_149, %c0_150, %c0_151], %236 {strides = array<i32>} : memref<1x256x32xf32, #tpu.memory_space<vmem>>, vector<1x256x32xf32>,
    return
  }
  func.func @transform_0(%arg0: i32) -> (i32, i32, i32, i32) {
    %c0_i32 = arith.constant 0 : i32
    %c0_i32_0 = arith.constant 0 : i32
    %c0_i32_1 = arith.constant 0 : i32
    %c0_i32_2 = arith.constant 0 : i32
    return %arg0, %c0_i32, %c0_i32_0, %c0_i32_1 : i32, i32, i32, i32
  }
  func.func @transform_1(%arg0: i32) -> (i32, i32, i32, i32) {
    %c0_i32 = arith.constant 0 : i32
    %c0_i32_0 = arith.constant 0 : i32
    %c0_i32_1 = arith.constant 0 : i32
    %c0_i32_2 = arith.constant 0 : i32
    %c0_i32_3 = arith.constant 0 : i32
    return %c0_i32, %c0_i32_0, %c0_i32_1, %c0_i32_2 : i32, i32, i32, i32
  }
  func.func @transform_2(%arg0: i32) -> (i32, i32, i32) {
    %c0_i32 = arith.constant 0 : i32
    %c0_i32_0 = arith.constant 0 : i32
    %c0_i32_1 = arith.constant 0 : i32
    %c0_i32_2 = arith.constant 0 : i32
    return %c0_i32, %c0_i32_0, %c0_i32_1 : i32, i32, i32
  }
  func.func @transform_3(%arg0: i32) -> (i32, i32, i32) {
    %c0_i32 = arith.constant 0 : i32
    %c0_i32_0 = arith.constant 0 : i32
    %c0_i32_1 = arith.constant 0 : i32
    return %arg0, %c0_i32, %c0_i32_0 : i32, i32, i32
  }
}

</mosaic_0001>

<bundles_post_ra>
// kernel: ms_patch_emb_pallas.1
= control target key start
LH: loop header
LB: loop body
LE: loop exit
PB: predicated region body
PF: predicated region fallthrough
CT: control target
= control target key end

     0   :  { %8 = vsyncpa [#allocation3], 0  ;;  %s14415_s0 = inlined_call_operand.vmem [shape: f32[2,22,22,4], index: 0, kind: input, shape index: {}]   ;;  %s14416_s1 = inlined_call_operand.vmem [shape: bf16[3,9,4,128], index: 1, kind: input, shape index: {}]   ;;  %s14417_s2 = inlined_call_operand.vmem [shape: f32[3,1,128], index: 2, kind: input, shape index: {}]   ;;  %s14418_s3 = inlined_call_operand.hbm [shape: f32[2,256,32], index: 3, kind: output, shape index: {}]  }
   0x1   :  { %10 = vsyncpa [#allocation3 + $0x1], 0  ;;  %s11021_s12 = smov 0   ;;  %s11023_s13 = smov 0  }
   0x2   :  { %s11025_s14 = smov 0   ;;  %s11027_s15 = smov 0  }
   0x3 LB: > { %s11042_s16 = sadd.s32 4294967295, %s10996_s15   ;;  %s7802_s17 = sadd.s32 4294967294, %s10996_s15   ;;  %s10996_s15 = sphi %s11027_s15, %s14938_s15   ;;  %s10992_s14 = sphi %s11025_s14, %s14937_s14   ;;  %s10988_s13 = sphi %s11023_s13, %s14936_s13   ;;  %s10984_s12 = sphi %s11021_s12, %s14935_s12  }
   0x4   : > { %s11046_s18 = sadd.s32 1, %s10996_s15   ;;  %s91_s19 = sadd.s32 1, %s10992_s14 }
   0x5   : > { %s88_s20 = ssub.s32 %s10996_s15, %s11046_s18  ;;  %p101_p0 = scmp.ne.s32.totalorder %s10992_s14, %s10988_s13 }
   0x6   : > { %p89_p1 = scmp.eq.s32.totalorder %s88_s20, 0  ;;  %p102_p2 = scmp.eq.s32.totalorder %s11042_s16, 1 }
   0x7   : > { %p107_p3 = scmp.ne.s32.totalorder %s10988_s13, %s10984_s12  ;;  %p108_p4 = scmp.eq.s32.totalorder %s7802_s17, 1 }
   0x8   : > { %s11057_s21 = scalar_select %p89_p1, %s10992_s14, %s91_s19  }
   0x9   : > { %p11059_p5 = por %p102_p2, %p101_p0  ;;  %p11063_p6 = por %p108_p4, %p107_p3 }
   0xa   : > { %p7805_p7 = scmp.ge.s32.totalorder %s10996_s15, 1  ;;  %p140_p8 = scmp.lt.s32.totalorder %s10996_s15, 3 }
   0xc   : > { %p141_p9 = pnand %p7805_p7, %p140_p8 }
   0xe   : > { %144 = sbr.rel (%p141_p9) target bundleno = 1228 (0x4cc), region = 32 }
  0x15   : > { %v7808_v0 = vld [vmem:[%s14416_s1 + $0x2] sm:$0x3]  ;;  %vm594_vm0 = vcmask 1041408   ;;  %v11075_v1 = vld [vmem:[%s14416_s1 + $0x8] sm:$0x3]  ;;  %p164_p10 = scmp.lt.s32.totalorder %s11042_s16, 1 }
  0x16   : > { %14598 = vst [vmem:[#allocation5_spill] sm:$0xff] %v11075_v1  ;;  %10424 = vmatprep.subr.msk.bf16.mxu1 %vm594_vm0, %v7808_v0  ;;  %v596_v2 = vsel %vm594_vm0, %v7808_v0, 0  ;;  %10428 = vmatprep.subr.msk.bf16.mxu0 %vm594_vm0, %v11075_v1  ;;  %v11084_v3 = vsel %vm594_vm0, %v11075_v1, 0  ;;  %v413_v4 = vld [vmem:[%s14416_s1] sm:$0x3]  ;;  %vm414_vm1 = vcmask 1044480  }
  0x17   : > { %14599 = vst [vmem:[#allocation6_spill] sm:$0xff] %v11084_v3  ;;  %8737 = vmatpush3.bf16.msra.mxu1 %v596_v2  ;;  %8873 = vmatpush3.bf16.msra.mxu0 %v11084_v3  ;;  %s165_s30 = scalar_select %p164_p10, %s11042_s16, 1  ;;  %v7892_v5 = vld [vmem:[%s14416_s1 + $0xa] sm:$0x3]  ;;  %vm545_vm2 = vcmask 31744   ;;  %v808_v9 = vsel %vm594_vm0, %v413_v4, 0 }
  0x18   : > { %10425 = vmatprep.subr.msk.bf16.mxu1 %vm594_vm0, %v413_v4  ;;  %10430 = vmatprep.subr.msk.bf16.mxu0 %vm594_vm0, %v7892_v5  ;;  %v1781_v10 = vsel %vm594_vm0, %v7892_v5, 0  ;;  %v11199_v55 = vld [vmem:[%s14416_s1 + $0xc] sm:$0x3]  ;;  %v11207_v57 = vld [vmem:[%s14416_s1 + $0x4] sm:$0x3]  ;;  %vm971_vm3 = vcmask 1043456  }
  0x19   : > { %s10452_s6 = smul.u32 528, %s165_s30  ;;  %vm284_vm4 = vcmask 1045504   ;;  %vm2872_vm5 = vcmask 1046528   ;;  %vm3392_vm6 = vcmask 1042432   ;;  %vm7693_vm7 = vcmask 261120   ;;  %s161_s10 = sand.u32 1, %s10988_s13  }
  0x1a   : > { %s13877_s11 = sshll.u32 %s161_s10, 8  ;;  %s8276_s26 = sshll.u32 %s11042_s16, 12 }
  0x1b   : > { %s11099_s9 = scalar_lea.vmem %s14415_s0, %s10452_s6  ;;  %s13920_s17 = scalar_lea.vmem [#allocation2], %s13877_s11 }
  0x1c   : > { %v11102_v6 = vld [vmem:[%s11099_s9 + $0x30] sm:$0xff]  ;;  %v11105_v7 = vld [vmem:[%s11099_s9 + $0x38] sm:$0xff]  ;;  %v11108_v8 = vld [vmem:[%s11099_s9 + $0x40] sm:$0x3f]  ;;  %s7740_s27 = sshll.u32 %s13920_s17, 4  ;;  %s14366_s30 = scalar_lea.hbm %s14418_s3, %s8276_s26  ;;  %s14368_s27 = int_to_ptr.vmem [resolvable:$true] %s7740_s27 }
  0x1d   : > { %v415_v11 = vrot.slane %v11102_v6, 3  ;;  %v416_v12 = vrot.slane %v11105_v7, 3  ;;  %v418_v13 = vrot.slane %v11108_v8, 3  ;;  %v11116_v14 = vld [vmem:[%s11099_s9 + $0x48] sm:$0xff]  ;;  %v11119_v15 = vld [vmem:[%s11099_s9 + $0x50] sm:$0xff]  ;;  %v11122_v16 = vld [vmem:[%s11099_s9 + $0x60] sm:$0xff] }
  0x1e   : > { %v11125_v17 = vld [vmem:[%s11099_s9 + $0x58] sm:$0x3f]  ;;  %v420_v18 = vrot.slane %v11116_v14, 3  ;;  %v421_v19 = vrot.slane %v11119_v15, 3  ;;  %v11130_v20 = vld [vmem:[%s11099_s9 + $0x68] sm:$0xff]  ;;  %v425_v21 = vrot.slane %v11122_v16, 3 }
  0x1f   : > { %v417_v22 = vsel %vm414_vm1, %v415_v11, %v416_v12  ;;  %v419_v23 = vsel %vm414_vm1, %v416_v12, %v418_v13  ;;  %v423_v24 = vrot.slane %v11125_v17, 3  ;;  %v11137_v25 = vld [vmem:[%s11099_s9 + $0x70] sm:$0x3f]  ;;  %v426_v26 = vrot.slane %v11130_v20, 3  ;;  %v11141_v27 = vld [vmem:[%s11099_s9 + $0x78] sm:$0xff]  ;;  %v11144_v28 = vld [vmem:[%s11099_s9 + $0x80] sm:$0xff] }
  0x20   : > { %v11146_v29 = vpack.c.bf16 %v419_v23, %v417_v22  ;;  %v422_v30 = vsel %vm414_vm1, %v420_v18, %v421_v19  ;;  %v428_v31 = vrot.slane %v11137_v25, 3  ;;  %v11151_v32 = vld [vmem:[%s11099_s9 + $0x88] sm:$0x3f]  ;;  %v430_v33 = vrot.slane %v11141_v27, 3  ;;  %v11155_v34 = vld [vmem:[%s11099_s9 + $0x90] sm:$0xff]  ;;  %v11158_v35 = vld [vmem:[%s11099_s9 + $0x98] sm:$0xff] }
  0x21   : > { %v424_v36 = vsel %vm414_vm1, %v421_v19, %v423_v24  ;;  %v427_v37 = vsel %vm414_vm1, %v425_v21, %v426_v26  ;;  %v431_v38 = vrot.slane %v11144_v28, 3  ;;  %v433_v39 = vrot.slane %v11151_v32, 3  ;;  %v11165_v40 = vld [vmem:[%s11099_s9 + $0xa0] sm:$0x3f]  ;;  %v11168_v41 = vld [vmem:[%s11099_s9 + $0xa8] sm:$0xff]  ;;  %v11171_v42 = vld [vmem:[%s11099_s9 + $0xb0] sm:$0xff] }
  0x22   : > { %14600 = vst [vmem:[#allocation7_spill] sm:$0xff] %v11146_v29  ;;  %8738 = vmatprep.mubr.msk.bf16.mxu1 %vm545_vm2, %v11146_v29  ;;  %v11175_v43 = vpack.c.bf16 %v424_v36, %v422_v30  ;;  %v429_v44 = vsel %vm414_vm1, %v426_v26, %v428_v31  ;;  %v435_v45 = vrot.slane %v11155_v34, 3  ;;  %v436_v46 = vrot.slane %v11158_v35, 3  ;;  %v11181_v47 = vld [vmem:[%s11099_s9 + $0xb8] sm:$0x3f]  ;;  %v11218_v62 = vld [vmem:[%s11099_s9 + $0xc0] sm:$0xff] }
  0x23   : > { %14602 = vst [vmem:[#allocation9_spill] sm:$0xff] %v11181_v47  ;;  %v11183_v48 = vpack.c.bf16 %v429_v44, %v427_v37  ;;  %v432_v49 = vsel %vm414_vm1, %v430_v33, %v431_v38  ;;  %v434_v50 = vsel %vm414_vm1, %v431_v38, %v433_v39  ;;  %v438_v51 = vrot.slane %v11165_v40, 3  ;;  %14605 = vst [vmem:[#allocation12_spill] sm:$0xff] %v11218_v62  ;;  %v11221_v63 = vld [vmem:[%s11099_s9 + $0xc8] sm:$0xff]  ;;  %v11224_v0 = vld [vmem:[%s11099_s9 + $0xd0] sm:$0x3f] }
  0x24   : > { %14601 = vst [vmem:[#allocation8_spill] sm:$0xff] %v11175_v43  ;;  %8874 = vmatprep.mubr.msk.bf16.mxu0 %vm545_vm2, %v11175_v43  ;;  %8739 = vmatmul.mubr.msk.bf16.vlgmr.msra.gmra.mrb[0].mxu1 %vm545_vm2, %v11175_v43  ;;  %v11192_v52 = vpack.c.bf16 %v434_v50, %v432_v49  ;;  %v440_v53 = vrot.slane %v11168_v41, 3  ;;  %v441_v54 = vrot.slane %v11171_v42, 3  ;;  %v443_v56 = vrot.slane %v11181_v47, 3  ;;  %14606 = vst [vmem:[#allocation13_spill] sm:$0xff] %v11221_v63  ;;  %v11229_v2 = vld [vmem:[%s11099_s9 + $0xd8] sm:$0xff] }
  0x25   : > { %14603 = vst [vmem:[#allocation10_spill] sm:$0xff] %v11183_v48  ;;  %8771 = vmatpush3.bf16.msra.mxu1 %v808_v9  ;;  %8875 = vmatmul.mubr.msk.bf16.vlgmr.msra.gmra.mrb[0].mxu0 %vm545_vm2, %v11183_v48  ;;  %v437_v58 = vsel %vm414_vm1, %v435_v45, %v436_v46  ;;  %v439_v59 = vsel %vm414_vm1, %v436_v46, %v438_v51  ;;  %14607 = vst [vmem:[#allocation14_spill] sm:$0xff] %v11224_v0  ;;  %v11232_v4 = vld [vmem:[%s11099_s9 + $0xe0] sm:$0xff]  ;;  %v11235_v5 = vld [vmem:[%s11099_s9 + $0xe8] sm:$0x3f]  ;;  %v445_v11 = vrot.slane %v11218_v62, 3 }
  0x26   : > { %14604 = vst [vmem:[#allocation11_spill] sm:$0xff] %v11192_v52  ;;  %8907 = vmatpush3.bf16.msra.mxu0 %v1781_v10  ;;  %8742 = vmatprep.mubr.msk.bf16.mxu1 %vm545_vm2, %v11183_v48  ;;  %v442_v60 = vsel %vm414_vm1, %v440_v53, %v441_v54  ;;  %v444_v61 = vsel %vm414_vm1, %v441_v54, %v443_v56  ;;  %14608 = vst [vmem:[#allocation15_spill] sm:$0xff] %v11229_v2  ;;  %v446_v12 = vrot.slane %v11221_v63, 3  ;;  %v11260_v24 = vld [vmem:[%s11099_s9 + $0xf0] sm:$0xff]  ;;  %v11263_v26 = vld [vmem:[%s11099_s9 + $0xf8] sm:$0xff]  ;;  %s14374_s4 = scalar_lea.sflag [#allocation3], %s161_s10 }
  0x27   : > { %8878 = vmatprep.mubr.msk.bf16.mxu0 %vm545_vm2, %v11192_v52  ;;  %10431 = vmatprep.subr.msk.bf16.mxu0 %vm594_vm0, %v11199_v55  ;;  %14609 = vst [vmem:[#allocation16_spill] sm:$0xff] %v11232_v4  ;;  %14610 = vst [vmem:[#allocation17_spill] sm:$0xff] %v11235_v5  ;;  %v11239_v9 = vpack.c.bf16 %v439_v59, %v437_v58  ;;  %v11241_v10 = vpack.c.bf16 %v444_v61, %v442_v60  ;;  %v448_v13 = vrot.slane %v11224_v0, 3  ;;  %v11266_v30 = vld [vmem:[%s11099_s9 + $0x100] sm:$0x3f]  ;;  %v11283_v50 = vld [vmem:[%s11099_s9 + $0x108] sm:$0xff] }
  0x28   : > { %10426 = vmatprep.subr.msk.bf16.mxu1 %vm594_vm0, %v11207_v57  ;;  %v450_v18 = vrot.slane %v11229_v2, 3  ;;  %v451_v19 = vrot.slane %v11232_v4, 3  ;;  %v453_v21 = vrot.slane %v11235_v5, 3  ;;  %v447_v22 = vsel %vm414_vm1, %v445_v11, %v446_v12  ;;  %14613 = vst [vmem:[#allocation20_spill] sm:$0xff] %v11260_v24  ;;  %14614 = vst [vmem:[#allocation21_spill] sm:$0xff] %v11263_v26  ;;  %v11286_v51 = vld [vmem:[%s11099_s9 + $0x110] sm:$0xff] }
  0x29   : > { %14611 = vst [vmem:[#allocation18_spill] sm:$0xff] %v11239_v9  ;;  %14612 = vst [vmem:[#allocation19_spill] sm:$0xff] %v11241_v10  ;;  %v449_v23 = vsel %vm414_vm1, %v446_v12, %v448_v13  ;;  %v455_v37 = vrot.slane %v11260_v24, 3  ;;  %v456_v38 = vrot.slane %v11263_v26, 3  ;;  %v458_v39 = vrot.slane %v11266_v30, 3  ;;  %v11300_v58 = vld [vmem:[%s11099_s9 + $0x120] sm:$0xff] }
  0x2a   : > { %v452_v31 = vsel %vm414_vm1, %v450_v18, %v451_v19  ;;  %v454_v33 = vsel %vm414_vm1, %v451_v19, %v453_v21  ;;  %v11270_v36 = vpack.c.bf16 %v449_v23, %v447_v22  ;;  %v977_v45 = vrot.slane %v11116_v14, 4  ;;  %v11295_v56 = vld [vmem:[%s11099_s9 + $0x118] sm:$0x3f]  ;;  %v11303_v59 = vld [vmem:[%s11099_s9 + $0x128] sm:$0xff]  ;;  %v11306_v60 = vld [vmem:[%s11099_s9 + $0x130] sm:$0x3f] }
  0x2b   : > { %v11275_v44 = vpack.c.bf16 %v454_v33, %v452_v31  ;;  %v978_v46 = vrot.slane %v11119_v15, 4  ;;  %v980_v49 = vrot.slane %v11125_v17, 4  ;;  %v457_v53 = vsel %vm414_vm1, %v455_v37, %v456_v38  ;;  %s10934_s16 = scalar_lea.vmem %s14368_s27, 4096  ;;  %s10998_s5 = smov [#allocation2]  }
  0x2c   : > { %8743 = vmatmul.mubr.msk.bf16.gmra.mrb[4].mxu1 %vm545_vm2, %v11192_v52  ;;  %14615 = vst [vmem:[#allocation22_spill] sm:$0xff] %v11270_v36  ;;  %v459_v54 = vsel %vm414_vm1, %v456_v38, %v458_v39  ;;  %v460_v12 = vrot.slane %v11283_v50, 3  ;;  %v461_v13 = vrot.slane %v11286_v51, 3  ;;  %v463_v19 = vrot.slane %v11295_v56, 3  ;;  %v11324_v39 = vld [vmem:[%s11099_s9 + $0x138] sm:$0xff]  ;;  %p10935_p11 = scmp.ne.s32.totalorder %s14368_s27, %s10934_s16 }
  0x2d   : > { %8879 = vmatmul.mubr.msk.bf16.gmra.mrb[4].mxu0 %vm545_vm2, %v11239_v9  ;;  %8746 = vmatprep.mubr.msk.bf16.mxu1 %vm545_vm2, %v11239_v9  ;;  %14616 = vst [vmem:[#allocation23_spill] sm:$0xff] %v11275_v44  ;;  %v979_v61 = vsel %vm971_vm3, %v977_v45, %v978_v46  ;;  %v981_v11 = vsel %vm971_vm3, %v978_v46, %v980_v49  ;;  %v982_v21 = vrot.slane %v11122_v16, 4  ;;  %v983_v22 = vrot.slane %v11130_v20, 4 }
  0x2e   : > { %8882 = vmatprep.mubr.msk.bf16.mxu0 %vm545_vm2, %v11241_v10  ;;  %v11312_v18 = vpack.c.bf16 %v459_v54, %v457_v53  ;;  %v985_v23 = vrot.slane %v11137_v25, 4  ;;  %v465_v31 = vrot.slane %v11300_v58, 3  ;;  %v466_v33 = vrot.slane %v11303_v59, 3  ;;  %v11330_v53 = vld [vmem:[%s11099_s9 + $0x140] sm:$0xff]  ;;  %v11333_v54 = vld [vmem:[%s11099_s9 + $0x148] sm:$0x3f]  ;;  %p10936_p12 = pnand %p10935_p11, %p11059_p5 }
  0x2f   : > { %v468_v37 = vrot.slane %v11306_v60, 3  ;;  %v11321_v38 = vpack.c.bf16 %v981_v11, %v979_v61  ;;  %v987_v45 = vrot.slane %v11141_v27, 4  ;;  %v988_v46 = vrot.slane %v11144_v28, 4 }
  0x30   : > { %14617 = vst [vmem:[#allocation24_spill] sm:$0xff] %v11312_v18  ;;  %v990_v49 = vrot.slane %v11151_v32, 4  ;;  %v462_v61 = vsel %vm414_vm1, %v460_v12, %v461_v13  ;;  %v464_v11 = vsel %vm414_vm1, %v461_v13, %v463_v19  ;;  %v984_v43 = vsel %vm971_vm3, %v982_v21, %v983_v22  ;;  %v11349_v12 = vld [vmem:[%s11099_s9 + $0x150] sm:$0xff]  ;;  %p10937_p13 = pneg %p10936_p12 }
  0x31   : > { %14618 = vst [vmem:[#allocation25_spill] sm:$0xff] %v11321_v38  ;;  %v986_v29 = vsel %vm971_vm3, %v983_v22, %v985_v23  ;;  %v467_v3 = vsel %vm414_vm1, %v465_v31, %v466_v33  ;;  %v471_v13 = vrot.slane %v11330_v53, 3  ;;  %v473_v19 = vrot.slane %v11333_v54, 3  ;;  %v11361_v23 = vld [vmem:[%s11099_s9 + $0x160] sm:$0x3f] }
  0x32   : > { %v992_v21 = vrot.slane %v11155_v34, 4  ;;  %v993_v22 = vrot.slane %v11158_v35, 4  ;;  %v989_v31 = vsel %vm971_vm3, %v987_v45, %v988_v46  ;;  %v11368_v9 = vpack.c.bf16 %v986_v29, %v984_v43 }
  0x33   : > { %v1993_v52 = vsel %vm594_vm0, %v11199_v55, 0  ;;  %v475_v1 = vrot.slane %v11349_v12, 3  ;;  %v478_v45 = vrot.slane %v11361_v23, 3  ;;  %v474_v29 = vsel %vm414_vm1, %v471_v13, %v473_v19 }
  0x34   : > { %8747 = vmatmul.mubr.msk.bf16.gmra.mrb[8].mxu1 %vm545_vm2, %v11241_v10  ;;  %v11352_v10 = vld [vmem:[%s11099_s9 + $0x158] sm:$0xff]  ;;  %14620 = vst [vmem:[#allocation27_spill] sm:$0xff] %v11368_v9  ;;  %v994_v43 = vsel %vm971_vm3, %v992_v21, %v993_v22  ;;  %v998_v55 = vrot.slane %v11171_v42, 4 }
  0x35   : > { %8883 = vmatmul.mubr.msk.bf16.gmra.mrb[8].mxu0 %vm545_vm2, %v11270_v36  ;;  %8750 = vmatprep.mubr.msk.bf16.mxu1 %vm545_vm2, %v11270_v36  ;;  %v469_v36 = vsel %vm414_vm1, %v466_v33, %v468_v37  ;;  %v991_v33 = vsel %vm971_vm3, %v988_v46, %v990_v49  ;;  %v995_v37 = vrot.slane %v11165_v40, 4 }
  0x36   : > { %8886 = vmatprep.mubr.msk.bf16.mxu0 %vm545_vm2, %v11275_v44  ;;  %v11372_v48 = vpack.c.bf16 %v469_v36, %v467_v3  ;;  %v11377_v46 = vpack.c.bf16 %v991_v33, %v989_v31  ;;  %v997_v3 = vrot.slane %v11168_v41, 4  ;;  %v1000_v36 = vrot.slane %v11181_v47, 4  ;;  %v11441_v47 = vld [vmem:[%s11099_s9 + $0x198] sm:$0xff] }
  0x38   : > { %14621 = vst [vmem:[#allocation28_spill] sm:$0xff] %v11372_v48  ;;  %14622 = vst [vmem:[#allocation29_spill] sm:$0xff] %v11377_v46 }
  0x3c   : > { %8751 = vmatmul.mubr.msk.bf16.gmra.mrb[12].mxu1 %vm545_vm2, %v11275_v44  ;;  %v470_v44 = vrot.slane %v11324_v39, 3 }
  0x3d   : > { %8887 = vmatmul.mubr.msk.bf16.gmra.mrb[12].mxu0 %vm545_vm2, %v11312_v18  ;;  %8754 = vmatprep.mubr.msk.bf16.mxu1 %vm545_vm2, %v11312_v18  ;;  %v11366_v18 = vpack.c.bf16 %v464_v11, %v462_v61  ;;  %v996_v61 = vsel %vm971_vm3, %v993_v22, %v995_v37  ;;  %v11389_v11 = vld [vmem:[%s11099_s9 + $0x168] sm:$0xff]  ;;  %v11406_v22 = vld [vmem:[%s11099_s9 + $0x178] sm:$0x3f]  ;;  %v11415_v37 = vld [vmem:[%s11099_s9 + $0x180] sm:$0xff] }
  0x3e   : > { %8908 = vmatprep.mubr.msk.bf16.mxu0 %vm545_vm2, %v11321_v38  ;;  %v476_v38 = vrot.slane %v11352_v10, 3  ;;  %v472_v49 = vsel %vm414_vm1, %v470_v44, %v471_v13  ;;  %v11392_v44 = vld [vmem:[%s11099_s9 + $0x170] sm:$0xff]  ;;  %v11397_v13 = vld [vmem:[%s14416_s1 + $0xe] sm:$0x3]  ;;  %v11412_v33 = vpack.c.bf16 %v996_v61, %v994_v43  ;;  %v1002_v43 = vrot.slane %v11218_v62, 4  ;;  %v11447_v62 = vld [vmem:[%s11099_s9 + $0x1a0] sm:$0xff] }
  0x3f   : > { %14619 = vst [vmem:[#allocation26_spill] sm:$0xff] %v11366_v18  ;;  %14623 = vst [vmem:[#allocation30_spill] sm:$0xff] %v11397_v13  ;;  %v11410_v31 = vpack.c.bf16 %v474_v29, %v472_v49  ;;  %v483_v29 = vrot.slane %v11406_v22, 3  ;;  %v1003_v61 = vrot.slane %v11221_v63, 4  ;;  %v11450_v63 = vld [vmem:[%s11099_s9 + $0x1a8] sm:$0x3f] }
  0x40   : > { %v477_v19 = vsel %vm414_vm1, %v475_v1, %v476_v38  ;;  %v479_v21 = vsel %vm414_vm1, %v476_v38, %v478_v45  ;;  %14625 = vst [vmem:[#allocation32_spill] sm:$0xff] %v11412_v33  ;;  %v999_v1 = vsel %vm971_vm3, %v997_v3, %v998_v55  ;;  %v1001_v38 = vsel %vm971_vm3, %v998_v55, %v1000_v36 }
  0x41   : > { %14624 = vst [vmem:[#allocation31_spill] sm:$0xff] %v11410_v31  ;;  %v481_v45 = vrot.slane %v11392_v44, 3  ;;  %v11429_v49 = vpack.c.bf16 %v479_v21, %v477_v19  ;;  %v1005_v3 = vrot.slane %v11224_v0, 4  ;;  %v485_v55 = vrot.slane %v11415_v37, 3 }
  0x42   : > { %v1007_v19 = vrot.slane %v11229_v2, 4  ;;  %v1008_v21 = vrot.slane %v11232_v4, 4 }
  0x43   : > { %14626 = vst [vmem:[#allocation33_spill] sm:$0xff] %v11429_v49 }
  0x44   : > { %8755 = vmatmul.mubr.msk.bf16.gmra.mrb[16].mxu1 %vm545_vm2, %v11366_v18  ;;  %v11418_v18 = vld [vmem:[%s11099_s9 + $0x188] sm:$0xff] }
  0x45   : > { %8909 = vmatmul.mubr.msk.bf16.vlgmr.msra.gmra.mrb[0].mxu0 %vm545_vm2, %v11368_v9  ;;  %8758 = vmatprep.mubr.msk.bf16.mxu1 %vm545_vm2, %v11372_v48  ;;  %v11421_v48 = vld [vmem:[%s11099_s9 + $0x190] sm:$0x3f]  ;;  %v486_v36 = vrot.slane %v11418_v18, 3  ;;  %v11438_v9 = vpack.c.bf16 %v1001_v38, %v999_v1  ;;  %v484_v1 = vsel %vm414_vm1, %v481_v45, %v483_v29  ;;  %v1004_v38 = vsel %vm971_vm3, %v1002_v43, %v1003_v61 }
  0x46   : > { %8941 = vmatpush3.bf16.msra.mxu0 %v1993_v52  ;;  %8912 = vmatprep.mubr.msk.bf16.mxu0 %vm545_vm2, %v11377_v46  ;;  %v480_v52 = vrot.slane %v11389_v11, 3  ;;  %v488_v46 = vrot.slane %v11421_v48, 3  ;;  %v1012_v29 = vrot.slane %v11260_v24, 4  ;;  %v1013_v43 = vrot.slane %v11263_v26, 4 }
  0x47   : > { %10432 = vmatprep.subr.msk.bf16.mxu0 %vm594_vm0, %v11397_v13  ;;  %14627 = vst [vmem:[#allocation34_spill] sm:$0xff] %v11438_v9  ;;  %v1010_v13 = vrot.slane %v11235_v5, 4  ;;  %v1006_v5 = vsel %vm971_vm3, %v1003_v61, %v1005_v3  ;;  %v487_v4 = vsel %vm414_vm1, %v485_v55, %v486_v36  ;;  %v1015_v3 = vrot.slane %v11266_v30, 4 }
  0x48   : > { %v482_v0 = vsel %vm414_vm1, %v480_v52, %v481_v45  ;;  %v489_v2 = vsel %vm414_vm1, %v486_v36, %v488_v46  ;;  %v491_v52 = vrot.slane %v11447_v62, 3  ;;  %v493_v45 = vrot.slane %v11450_v63, 3 }
  0x49   : > { %v1011_v61 = vsel %vm971_vm3, %v1008_v21, %v1010_v13  ;;  %v11474_v46 = vpack.c.bf16 %v484_v1, %v482_v0  ;;  %v11476_v55 = vpack.c.bf16 %v1006_v5, %v1004_v38  ;;  %v11478_v36 = vpack.c.bf16 %v489_v2, %v487_v4 }
  0x4a   : > { %v288_v24 = vrot.slane %v11108_v8, 2  ;;  %v494_v13 = vsel %vm414_vm1, %v491_v52, %v493_v45  ;;  %v1014_v0 = vsel %vm971_vm3, %v1012_v29, %v1013_v43  ;;  %v1016_v5 = vsel %vm971_vm3, %v1013_v43, %v1015_v3 }
  0x4b   : > { %14628 = vst [vmem:[#allocation35_spill] sm:$0xff] %v11474_v46  ;;  %14629 = vst [vmem:[#allocation36_spill] sm:$0xff] %v11478_v36  ;;  %v1018_v2 = vrot.slane %v11286_v51, 4  ;;  %v1020_v4 = vrot.slane %v11295_v56, 4  ;;  %v11504_v38 = vpack.c.bf16 %v1016_v5, %v1014_v0  ;;  %v290_v29 = vrot.slane %v11116_v14, 2 }
  0x4c   : > { %8759 = vmatmul.mubr.msk.bf16.gmra.mrb[20].mxu1 %vm545_vm2, %v11410_v31  ;;  %v490_v31 = vrot.slane %v11441_v47, 3  ;;  %v291_v43 = vrot.slane %v11119_v15, 2  ;;  %v1025_v3 = vrot.slane %v11306_v60, 4  ;;  %v298_v0 = vrot.slane %v11137_v25, 2 }
  0x4d   : > { %8913 = vmatmul.mubr.msk.bf16.gmra.mrb[4].mxu0 %vm545_vm2, %v11412_v33  ;;  %8762 = vmatprep.mubr.msk.bf16.mxu1 %vm545_vm2, %v11429_v49  ;;  %v1009_v49 = vsel %vm971_vm3, %v1007_v19, %v1008_v21  ;;  %v286_v33 = vrot.slane %v11105_v7, 2  ;;  %v1017_v21 = vrot.slane %v11283_v50, 4  ;;  %v1021_v45 = vsel %vm971_vm3, %v1018_v2, %v1020_v4 }
  0x4e   : > { %8916 = vmatprep.mubr.msk.bf16.mxu0 %vm545_vm2, %v11438_v9  ;;  %v285_v9 = vrot.slane %v11102_v6, 2  ;;  %v11483_v26 = vpack.c.bf16 %v1011_v61, %v1009_v49  ;;  %v492_v19 = vsel %vm414_vm1, %v490_v31, %v491_v52  ;;  %v1027_v14 = vrot.slane %v11324_v39, 4 }
  0x4f   : > { %v289_v49 = vsel %vm284_vm4, %v286_v33, %v288_v24  ;;  %v11502_v1 = vpack.c.bf16 %v494_v13, %v492_v19  ;;  %v1019_v52 = vsel %vm971_vm3, %v1017_v21, %v1018_v2  ;;  %v1022_v24 = vrot.slane %v11300_v58, 4 }
  0x50   : > { %v287_v31 = vsel %vm284_vm4, %v285_v9, %v286_v33  ;;  %v293_v9 = vrot.slane %v11125_v17, 2  ;;  %v1023_v33 = vrot.slane %v11303_v59, 4  ;;  %v295_v19 = vrot.slane %v11122_v16, 2 }
  0x51   : > { %14630 = vst [vmem:[#allocation37_spill] sm:$0xff] %v11502_v1  ;;  %v397_v61 = vpack.c.bf16 %v289_v49, %v287_v31  ;;  %v296_v13 = vrot.slane %v11130_v20, 2  ;;  %v11517_v5 = vpack.c.bf16 %v1021_v45, %v1019_v52  ;;  %v1028_v15 = vrot.slane %v11330_v53, 4 }
  0x52   : > { %v1030_v17 = vrot.slane %v11333_v54, 4  ;;  %v292_v21 = vsel %vm284_vm4, %v290_v29, %v291_v43  ;;  %v294_v2 = vsel %vm284_vm4, %v291_v43, %v293_v9  ;;  %v1024_v16 = vsel %vm971_vm3, %v1022_v24, %v1023_v33 }
  0x53   : > { %v1026_v20 = vsel %vm971_vm3, %v1023_v33, %v1025_v3  ;;  %v297_v25 = vsel %vm284_vm4, %v295_v19, %v296_v13  ;;  %v299_v4 = vsel %vm284_vm4, %v296_v13, %v298_v0  ;;  %v300_v31 = vrot.slane %v11141_v27, 2 }
  0x54   : > { %8763 = vmatmul.mubr.msk.bf16.gmra.mrb[24].mxu1 %vm545_vm2, %v11474_v46  ;;  %v301_v49 = vrot.slane %v11144_v28, 2  ;;  %v303_v52 = vrot.slane %v11151_v32, 2  ;;  %v1032_v45 = vrot.slane %v11349_v12, 4  ;;  %v1033_v29 = vrot.slane %v11352_v10, 4 }
  0x55   : > { %8917 = vmatmul.mubr.msk.bf16.gmra.mrb[8].mxu0 %vm545_vm2, %v11476_v55  ;;  %8766 = vmatprep.mubr.msk.bf16.mxu1 %vm545_vm2, %v11478_v36  ;;  %v1029_v43 = vsel %vm971_vm3, %v1027_v14, %v1028_v15  ;;  %v1035_v9 = vrot.slane %v11361_v23, 4  ;;  %v11543_v24 = vpack.c.bf16 %v294_v2, %v292_v21  ;;  %v1151_v27 = vsel %vm594_vm0, %v11207_v57, 0 }
  0x56   : > { %8920 = vmatprep.mubr.msk.bf16.mxu0 %vm545_vm2, %v11483_v26  ;;  %v11547_v33 = vpack.c.bf16 %v1026_v20, %v1024_v16  ;;  %v11549_v28 = vpack.c.bf16 %v299_v4, %v297_v25  ;;  %v305_v32 = vrot.slane %v11155_v34, 2  ;;  %v306_v3 = vrot.slane %v11158_v35, 2  ;;  %v11568_v35 = vld [vmem:[%s14416_s1 + $0x6] sm:$0x3] }
  0x57   : > { %v308_v19 = vrot.slane %v11165_v40, 2  ;;  %v302_v0 = vsel %vm284_vm4, %v300_v31, %v301_v49  ;;  %v304_v14 = vsel %vm284_vm4, %v301_v49, %v303_v52  ;;  %v1036_v57 = vsel %vm971_vm3, %v1033_v29, %v1035_v9 }
  0x58   : > { %v1038_v21 = vrot.slane %v11392_v44, 4  ;;  %v1040_v34 = vrot.slane %v11406_v22, 4  ;;  %v307_v40 = vsel %vm284_vm4, %v305_v32, %v306_v3  ;;  %v11578_v16 = vpack.c.bf16 %v304_v14, %v302_v0 }
  0x59   : > { %v309_v2 = vsel %vm284_vm4, %v306_v3, %v308_v19  ;;  %v310_v31 = vrot.slane %v11168_v41, 2  ;;  %v311_v49 = vrot.slane %v11171_v42, 2  ;;  %v1045_v9 = vrot.slane %v11421_v48, 4  ;;  %v14633_v3 = vld [vmem:[#allocation13_spill] sm:$0xff]  ;;  %v14634_v41 = vld [vmem:[#allocation14_spill] sm:$0xff] }
  0x5a   : > { %v1041_v4 = vsel %vm971_vm3, %v1038_v21, %v1040_v34  ;;  %v11588_v52 = vpack.c.bf16 %v309_v2, %v307_v40  ;;  %v316_v19 = vrot.slane %v14633_v3, 2  ;;  %v318_v42 = vrot.slane %v14634_v41, 2  ;;  %v14636_v3 = vld [vmem:[#allocation16_spill] sm:$0xff]  ;;  %v14637_v41 = vld [vmem:[#allocation17_spill] sm:$0xff] }
  0x5b   : > { %v1047_v14 = vrot.slane %v11441_v47, 4 }
  0x5c   : > { %8767 = vmatmul.mubr.msk.bf16.gmra.mrb[28].mxu1 %vm545_vm2, %v11502_v1 }
  0x5d   : > { %8921 = vmatmul.mubr.msk.bf16.gmra.mrb[12].mxu0 %vm545_vm2, %v11504_v38  ;;  %8772 = vmatprep.mubr.msk.bf16.mxu1 %vm545_vm2, %v397_v61  ;;  %v1031_v61 = vsel %vm971_vm3, %v1028_v15, %v1030_v17  ;;  %v1034_v15 = vsel %vm971_vm3, %v1032_v45, %v1033_v29  ;;  %v1037_v17 = vrot.slane %v11389_v11, 4  ;;  %v14631_v45 = vld [vmem:[#allocation9_spill] sm:$0xff] }
  0x5e   : > { %8924 = vmatprep.mubr.msk.bf16.mxu0 %vm545_vm2, %v11517_v5  ;;  %v11554_v13 = vpack.c.bf16 %v1031_v61, %v1029_v43  ;;  %v11580_v20 = vpack.c.bf16 %v1036_v57, %v1034_v15  ;;  %v313_v29 = vrot.slane %v14631_v45, 2  ;;  %v1042_v43 = vrot.slane %v11415_v37, 4 }
  0x5f   : > { %v1039_v25 = vsel %vm971_vm3, %v1037_v17, %v1038_v21  ;;  %v1043_v61 = vrot.slane %v11418_v18, 4  ;;  %v1048_v15 = vrot.slane %v11447_v62, 4  ;;  %v1050_v57 = vrot.slane %v11450_v63, 4 }
  0x60   : > { %v11597_v0 = vpack.c.bf16 %v1041_v4, %v1039_v25  ;;  %v312_v17 = vsel %vm284_vm4, %v310_v31, %v311_v49  ;;  %v314_v21 = vsel %vm284_vm4, %v311_v49, %v313_v29  ;;  %v319_v25 = vsel %vm284_vm4, %v316_v19, %v318_v42  ;;  %v11617_v4 = vld [vmem:[%s11099_s9 + $0x1b0] sm:$0xff]  ;;  %v11620_v31 = vld [vmem:[%s11099_s9 + $0x1b8] sm:$0xff]  ;;  %v11623_v49 = vld [vmem:[%s11099_s9 + $0x1c0] sm:$0x3f] }
  0x61   : > { %v1044_v34 = vsel %vm971_vm3, %v1042_v43, %v1043_v61  ;;  %v1046_v40 = vsel %vm971_vm3, %v1043_v61, %v1045_v9  ;;  %v11625_v45 = vpack.c.bf16 %v314_v21, %v312_v17  ;;  %v1049_v29 = vsel %vm971_vm3, %v1047_v14, %v1048_v15  ;;  %v14638_v14 = vld [vmem:[#allocation20_spill] sm:$0xff] }
  0x62   : > { %v1051_v43 = vsel %vm971_vm3, %v1048_v15, %v1050_v57  ;;  %v11629_v61 = vpack.c.bf16 %v1046_v40, %v1044_v34  ;;  %v323_v42 = vrot.slane %v14637_v41, 2  ;;  %v1767_v1 = vrot.slane %v11617_v4, 4  ;;  %v14639_v57 = vld [vmem:[#allocation21_spill] sm:$0xff] }
  0x63   : > { %v1768_v36 = vrot.slane %v11620_v31, 4  ;;  %v1770_v17 = vrot.slane %v11623_v49, 4  ;;  %v11639_v21 = vpack.c.bf16 %v1051_v43, %v1049_v29  ;;  %v325_v15 = vrot.slane %v14638_v14, 2 }
  0x64   : > { %8773 = vmatmul.mubr.msk.bf16.vlgmr.msra.gmra.mrb[0].mxu1 %vm545_vm2, %v11543_v24  ;;  %v326_v34 = vrot.slane %v14639_v57, 2  ;;  %v328_v40 = vrot.slane %v11266_v30, 2  ;;  %v330_v14 = vrot.slane %v11283_v50, 2  ;;  %v341_v57 = vrot.slane %v11330_v53, 2 }
  0x65   : > { %8805 = vmatpush3.bf16.msra.mxu1 %v1151_v27  ;;  %8925 = vmatmul.mubr.msk.bf16.gmra.mrb[16].mxu0 %vm545_vm2, %v11547_v33  ;;  %v14632_v27 = vld [vmem:[#allocation12_spill] sm:$0xff]  ;;  %v1769_v29 = vsel %vm971_vm3, %v1767_v1, %v1768_v36  ;;  %v1771_v43 = vsel %vm971_vm3, %v1768_v36, %v1770_v17  ;;  %v333_v1 = vrot.slane %v11295_v56, 2  ;;  %v335_v36 = vrot.slane %v11300_v58, 2 }
  0x66   : > { %8776 = vmatprep.mubr.msk.bf16.mxu1 %vm545_vm2, %v11549_v28  ;;  %8928 = vmatprep.mubr.msk.bf16.mxu0 %vm545_vm2, %v11554_v13  ;;  %v315_v32 = vrot.slane %v14632_v27, 2  ;;  %v14635_v27 = vld [vmem:[#allocation15_spill] sm:$0xff]  ;;  %v327_v30 = vsel %vm284_vm4, %v325_v15, %v326_v34  ;;  %v338_v17 = vrot.slane %v11306_v60, 2  ;;  %v340_v15 = vrot.slane %v11324_v39, 2 }
  0x67   : > { %10427 = vmatprep.subr.msk.bf16.mxu1 %vm594_vm0, %v11568_v35  ;;  %v11699_v39 = vld [vmem:[%s14416_s1 + $0x10] sm:$0x3] }
  0x68   : > { %v317_v2 = vsel %vm284_vm4, %v315_v32, %v316_v19  ;;  %v320_v32 = vrot.slane %v14635_v27, 2  ;;  %v321_v19 = vrot.slane %v14636_v3, 2  ;;  %v329_v27 = vsel %vm284_vm4, %v326_v34, %v328_v40 }
  0x69   : > { %v11631_v9 = vpack.c.bf16 %v319_v25, %v317_v2  ;;  %v11660_v3 = vpack.c.bf16 %v1771_v43, %v1769_v29  ;;  %v11662_v41 = vpack.c.bf16 %v329_v27, %v327_v30  ;;  %v343_v34 = vrot.slane %v11333_v54, 2  ;;  %v14640_v29 = vld [vmem:[#allocation30_spill] sm:$0xff] }
  0x6a   : > { %v322_v2 = vsel %vm284_vm4, %v320_v32, %v321_v19  ;;  %v324_v25 = vsel %vm284_vm4, %v321_v19, %v323_v42  ;;  %v331_v19 = vrot.slane %v11286_v51, 2  ;;  %v336_v42 = vrot.slane %v11303_v59, 2 }
  0x6b   : > { %v11658_v32 = vpack.c.bf16 %v324_v25, %v322_v2  ;;  %v345_v40 = vrot.slane %v11349_v12, 2  ;;  %v346_v2 = vrot.slane %v11352_v10, 2  ;;  %v348_v25 = vrot.slane %v11361_v23, 2 }
  0x6c   : > { %8777 = vmatmul.mubr.msk.bf16.gmra.mrb[4].mxu1 %vm545_vm2, %v11578_v16  ;;  %v332_v50 = vsel %vm284_vm4, %v330_v14, %v331_v19  ;;  %v334_v51 = vsel %vm284_vm4, %v331_v19, %v333_v1  ;;  %v337_v56 = vsel %vm284_vm4, %v335_v36, %v336_v42  ;;  %v339_v58 = vsel %vm284_vm4, %v336_v42, %v338_v17 }
  0x6d   : > { %8929 = vmatmul.mubr.msk.bf16.gmra.mrb[20].mxu0 %vm545_vm2, %v11580_v20  ;;  %8780 = vmatprep.mubr.msk.bf16.mxu1 %vm545_vm2, %v11588_v52  ;;  %v11682_v59 = vpack.c.bf16 %v334_v51, %v332_v50  ;;  %v11684_v60 = vpack.c.bf16 %v339_v58, %v337_v56  ;;  %v2202_v43 = vsel %vm594_vm0, %v14640_v29, 0  ;;  %v342_v10 = vsel %vm284_vm4, %v340_v15, %v341_v57 }
  0x6e   : > { %8932 = vmatprep.mubr.msk.bf16.mxu0 %vm545_vm2, %v11597_v0  ;;  %v344_v53 = vsel %vm284_vm4, %v341_v57, %v343_v34  ;;  %v347_v54 = vsel %vm284_vm4, %v345_v40, %v346_v2  ;;  %v349_v12 = vsel %vm284_vm4, %v346_v2, %v348_v25  ;;  %v350_v27 = vrot.slane %v11389_v11, 2  ;;  %v14641_v34 = vld [vmem:[#allocation25_spill] sm:$0xff]  ;;  %v14642_v40 = vld [vmem:[#allocation27_spill] sm:$0xff] }
  0x6f   : > { %v11713_v23 = vpack.c.bf16 %v344_v53, %v342_v10  ;;  %v11715_v30 = vpack.c.bf16 %v349_v12, %v347_v54  ;;  %v351_v14 = vrot.slane %v11392_v44, 2  ;;  %v353_v19 = vrot.slane %v11406_v22, 2  ;;  %v14643_v2 = vld [vmem:[#allocation5_spill] sm:$0xff]  ;;  %v14645_v10 = vld [vmem:[#allocation32_spill] sm:$0xff]  ;;  %v11792_v12 = vld [vmem:[%s11099_s9 + $0x1c8] sm:$0xff] }
  0x70   : > { %v355_v1 = vrot.slane %v11415_v37, 2  ;;  %v356_v36 = vrot.slane %v11418_v18, 2  ;;  %v358_v42 = vrot.slane %v11421_v48, 2  ;;  %v360_v17 = vrot.slane %v11441_v47, 2 }
  0x71   : > { %v352_v11 = vsel %vm284_vm4, %v350_v27, %v351_v14  ;;  %v354_v44 = vsel %vm284_vm4, %v351_v14, %v353_v19  ;;  %v361_v50 = vrot.slane %v11447_v62, 2  ;;  %v363_v51 = vrot.slane %v11450_v63, 2  ;;  %v11795_v27 = vld [vmem:[%s11099_s9 + $0x1d0] sm:$0xff]  ;;  %v11798_v14 = vld [vmem:[%s11099_s9 + $0x1d8] sm:$0x3f] }
  0x72   : > { %v357_v18 = vsel %vm284_vm4, %v355_v1, %v356_v36  ;;  %v359_v48 = vsel %vm284_vm4, %v356_v36, %v358_v42  ;;  %v11735_v22 = vpack.c.bf16 %v354_v44, %v352_v11  ;;  %v972_v56 = vrot.slane %v11102_v6, 4  ;;  %v14646_v11 = vld [vmem:[#allocation34_spill] sm:$0xff] }
  0x73   : > { %v11737_v37 = vpack.c.bf16 %v359_v48, %v357_v18  ;;  %v973_v58 = vrot.slane %v11105_v7, 4  ;;  %v975_v15 = vrot.slane %v11108_v8, 4  ;;  %v362_v47 = vsel %vm284_vm4, %v360_v17, %v361_v50  ;;  %v14647_v17 = vld [vmem:[#allocation10_spill] sm:$0xff] }
  0x74   : > { %8781 = vmatmul.mubr.msk.bf16.gmra.mrb[8].mxu1 %vm545_vm2, %v11625_v45  ;;  %v364_v62 = vsel %vm284_vm4, %v361_v50, %v363_v51  ;;  %v1363_v57 = vsel %vm594_vm0, %v11568_v35, 0  ;;  %v1349_v35 = vrot.slane %v11617_v4, 2  ;;  %v1350_v25 = vrot.slane %v11620_v31, 2  ;;  %v8117_v51 = vld [vmem:[%s14416_s1 + $0x26] sm:$0x3] }
  0x75   : > { %8933 = vmatmul.mubr.msk.bf16.gmra.mrb[24].mxu0 %vm545_vm2, %v11629_v61  ;;  %8784 = vmatprep.mubr.msk.bf16.mxu1 %vm545_vm2, %v11631_v9  ;;  %v974_v6 = vsel %vm971_vm3, %v972_v56, %v973_v58  ;;  %v976_v7 = vsel %vm971_vm3, %v973_v58, %v975_v15  ;;  %v11757_v8 = vpack.c.bf16 %v364_v62, %v362_v47  ;;  %v1352_v29 = vrot.slane %v11623_v49, 2  ;;  %v14648_v56 = vld [vmem:[#allocation11_spill] sm:$0xff]  ;;  %v14649_v58 = vld [vmem:[#allocation18_spill] sm:$0xff]  ;;  %v14653_v62 = vld [vmem:[#allocation24_spill] sm:$0xff] }
  0x76   : > { %8936 = vmatprep.mubr.msk.bf16.mxu0 %vm545_vm2, %v11639_v21  ;;  %v1084_v63 = vpack.c.bf16 %v976_v7, %v974_v6  ;;  %v1351_v53 = vsel %vm284_vm4, %v1349_v35, %v1350_v25  ;;  %v1979_v1 = vrot.slane %v11792_v12, 2  ;;  %v1980_v36 = vrot.slane %v11795_v27, 2  ;;  %v14651_v15 = vld [vmem:[#allocation22_spill] sm:$0xff]  ;;  %v14652_v47 = vld [vmem:[#allocation23_spill] sm:$0xff]  ;;  %v14655_v7 = vld [vmem:[#allocation28_spill] sm:$0xff] }
  0x77   : > { %v1353_v54 = vsel %vm284_vm4, %v1350_v25, %v1352_v29  ;;  %v1982_v42 = vrot.slane %v11798_v14, 2  ;;  %v2411_v50 = vsel %vm594_vm0, %v11699_v39, 0  ;;  %v14654_v6 = vld [vmem:[#allocation26_spill] sm:$0xff]  ;;  %v1561_v35 = vrot.slane %v11623_v49, 3 }
  0x78   : > { %v11800_v19 = vpack.c.bf16 %v1353_v54, %v1351_v53  ;;  %v1981_v44 = vsel %vm284_vm4, %v1979_v1, %v1980_v36  ;;  %v2189_v49 = vrot.slane %v11795_v27, 3  ;;  %v14661_v53 = vld [vmem:[#allocation37_spill] sm:$0xff] }
  0x79   : > { %v1983_v18 = vsel %vm284_vm4, %v1980_v36, %v1982_v42 }
  0x7a   : > { %v1986_v48 = vpack.c.bf16 %v1983_v18, %v1981_v44  ;;  %v12026_v44 = vld [vmem:[%s14416_s1 + $0x16] sm:$0x3]  ;;  %v12032_v18 = vld [vmem:[%s14416_s1 + $0x28] sm:$0x3] }
  0x7c   : > { %8785 = vmatmul.mubr.msk.bf16.gmra.mrb[12].mxu1 %vm545_vm2, %v11658_v32 }
  0x7d   : > { %8937 = vmatmul.mubr.msk.bf16.gmra.mrb[28].mxu0 %vm545_vm2, %v11660_v3  ;;  %8788 = vmatprep.mubr.msk.bf16.mxu1 %vm545_vm2, %v11662_v41 }
  0x7e   : > { %8942 = vmatprep.mubr.msk.bf16.mxu0 %vm545_vm2, %v11549_v28 }
  0x84   : > { %8789 = vmatmul.mubr.msk.bf16.gmra.mrb[16].mxu1 %vm545_vm2, %v11682_v59 }
  0x85   : > { %8943 = vmatmul.mubr.msk.bf16.vlgmr.msra.gmra.mrb[0].mxu0 %vm545_vm2, %v11578_v16  ;;  %8792 = vmatprep.mubr.msk.bf16.mxu1 %vm545_vm2, %v11684_v60 }
  0x86   : > { %8975 = vmatpush3.bf16.msra.mxu0 %v2202_v43  ;;  %8946 = vmatprep.mubr.msk.bf16.mxu0 %vm545_vm2, %v11588_v52  ;;  %v14644_v43 = vld [vmem:[#allocation29_spill] sm:$0xff] }
  0x87   : > { %10433 = vmatprep.subr.msk.bf16.mxu0 %vm594_vm0, %v11699_v39  ;;  %v14650_v39 = vld [vmem:[#allocation19_spill] sm:$0xff] }
  0x8c   : > { %8793 = vmatmul.mubr.msk.bf16.gmra.mrb[20].mxu1 %vm545_vm2, %v11713_v23 }
  0x8d   : > { %8947 = vmatmul.mubr.msk.bf16.gmra.mrb[4].mxu0 %vm545_vm2, %v11625_v45  ;;  %8796 = vmatprep.mubr.msk.bf16.mxu1 %vm545_vm2, %v11715_v30 }
  0x8e   : > { %8950 = vmatprep.mubr.msk.bf16.mxu0 %vm545_vm2, %v11631_v9 }
  0x94   : > { %8797 = vmatmul.mubr.msk.bf16.gmra.mrb[24].mxu1 %vm545_vm2, %v11735_v22 }
  0x95   : > { %8951 = vmatmul.mubr.msk.bf16.gmra.mrb[8].mxu0 %vm545_vm2, %v11658_v32  ;;  %8800 = vmatprep.mubr.msk.bf16.mxu1 %vm545_vm2, %v11737_v37 }
  0x96   : > { %8954 = vmatprep.mubr.msk.bf16.mxu0 %vm545_vm2, %v11662_v41 }
  0x9c   : > { %8801 = vmatmul.mubr.msk.bf16.gmra.mrb[28].mxu1 %vm545_vm2, %v11757_v8 }
  0x9d   : > { %8955 = vmatmul.mubr.msk.bf16.gmra.mrb[12].mxu0 %vm545_vm2, %v11682_v59  ;;  %8806 = vmatprep.mubr.msk.bf16.mxu1 %vm545_vm2, %v1084_v63  ;;  %v7962_v63 = vld [vmem:[%s14416_s1 + $0x14] sm:$0x3] }
  0x9e   : > { %8958 = vmatprep.mubr.msk.bf16.mxu0 %vm545_vm2, %v11684_v60 }
  0xa4   : > { %8807 = vmatmul.mubr.msk.bf16.vlgmr.msra.gmra.mrb[0].mxu1 %vm545_vm2, %v14641_v34  ;;  %v14657_v34 = vld [vmem:[#allocation31_spill] sm:$0xff] }
  0xa5   : > { %8839 = vmatpush3.bf16.msra.mxu1 %v1363_v57  ;;  %8959 = vmatmul.mubr.msk.bf16.gmra.mrb[16].mxu0 %vm545_vm2, %v11713_v23  ;;  %v14656_v57 = vld [vmem:[#allocation6_spill] sm:$0xff] }
  0xa6   : > { %8810 = vmatprep.mubr.msk.bf16.mxu1 %vm545_vm2, %v14642_v40  ;;  %8962 = vmatprep.mubr.msk.bf16.mxu0 %vm545_vm2, %v11715_v30 }
  0xa7   : > { %10429 = vmatprep.subr.msk.bf16.mxu1 %vm594_vm0, %v14643_v2  ;;  %v14658_v2 = vld [vmem:[#allocation33_spill] sm:$0xff] }
  0xac   : > { %8811 = vmatmul.mubr.msk.bf16.gmra.mrb[4].mxu1 %vm545_vm2, %v14644_v43 }
  0xad   : > { %8963 = vmatmul.mubr.msk.bf16.gmra.mrb[20].mxu0 %vm545_vm2, %v11735_v22  ;;  %8814 = vmatprep.mubr.msk.bf16.mxu1 %vm545_vm2, %v14645_v10 }
  0xae   : > { %8966 = vmatprep.mubr.msk.bf16.mxu0 %vm545_vm2, %v11737_v37 }
  0xb4   : > { %8815 = vmatmul.mubr.msk.bf16.gmra.mrb[8].mxu1 %vm545_vm2, %v14646_v11 }
  0xb5   : > { %8967 = vmatmul.mubr.msk.bf16.gmra.mrb[24].mxu0 %vm545_vm2, %v11757_v8  ;;  %8818 = vmatprep.mubr.msk.bf16.mxu1 %vm545_vm2, %v11476_v55 }
  0xb6   : > { %8970 = vmatprep.mubr.msk.bf16.mxu0 %vm545_vm2, %v11800_v19 }
  0xbc   : > { %8819 = vmatmul.mubr.msk.bf16.gmra.mrb[12].mxu1 %vm545_vm2, %v11483_v26 }
  0xbd   : > { %8971 = vmatmul.mubr.msk.bf16.gmra.mrb[28].mxu0 %vm545_vm2, %v1986_v48  ;;  %8822 = vmatprep.mubr.msk.bf16.mxu1 %vm545_vm2, %v11504_v38  ;;  %v14664_v48 = vld [vmem:[#allocation8_spill] sm:$0xff] }
  0xbe   : > { %8976 = vmatprep.mubr.msk.bf16.mxu0 %vm545_vm2, %v14647_v17 }
  0xc4   : > { %8823 = vmatmul.mubr.msk.bf16.gmra.mrb[16].mxu1 %vm545_vm2, %v11517_v5 }
  0xc5   : > { %8977 = vmatmul.mubr.msk.bf16.vlgmr.msra.gmra.mrb[0].mxu0 %vm545_vm2, %v14648_v56  ;;  %8826 = vmatprep.mubr.msk.bf16.mxu1 %vm545_vm2, %v11547_v33 }
  0xc6   : > { %9009 = vmatpush3.bf16.msra.mxu0 %v2411_v50  ;;  %8980 = vmatprep.mubr.msk.bf16.mxu0 %vm545_vm2, %v14649_v58 }
  0xc7   : > { %10443 = vmatprep.subr.msk.bf16.mxu0 %vm594_vm0, %v8117_v51 }
  0xcc   : > { %8827 = vmatmul.mubr.msk.bf16.gmra.mrb[20].mxu1 %vm545_vm2, %v11554_v13 }
  0xcd   : > { %8981 = vmatmul.mubr.msk.bf16.gmra.mrb[4].mxu0 %vm545_vm2, %v14650_v39  ;;  %8830 = vmatprep.mubr.msk.bf16.mxu1 %vm545_vm2, %v11580_v20 }
  0xce   : > { %8984 = vmatprep.mubr.msk.bf16.mxu0 %vm545_vm2, %v14651_v15 }
  0xd4   : > { %8831 = vmatmul.mubr.msk.bf16.gmra.mrb[24].mxu1 %vm545_vm2, %v11597_v0 }
  0xd5   : > { %8985 = vmatmul.mubr.msk.bf16.gmra.mrb[8].mxu0 %vm545_vm2, %v14652_v47  ;;  %8834 = vmatprep.mubr.msk.bf16.mxu1 %vm545_vm2, %v11629_v61 }
  0xd6   : > { %8988 = vmatprep.mubr.msk.bf16.mxu0 %vm545_vm2, %v14653_v62 }
  0xdc   : > { %8835 = vmatmul.mubr.msk.bf16.gmra.mrb[28].mxu1 %vm545_vm2, %v11639_v21 }
  0xdd   : > { %8989 = vmatmul.mubr.msk.bf16.gmra.mrb[12].mxu0 %vm545_vm2, %v14654_v6  ;;  %8840 = vmatprep.mubr.msk.bf16.mxu1 %vm545_vm2, %v11543_v24  ;;  %v1558_v24 = vrot.slane %v11617_v4, 3 }
  0xde   : > { %8992 = vmatprep.mubr.msk.bf16.mxu0 %vm545_vm2, %v14655_v7 }
  0xe4   : > { %8841 = vmatmul.mubr.msk.bf16.vlgmr.msra.gmra.mrb[0].mxu1 %vm545_vm2, %v11549_v28  ;;  %v1559_v28 = vrot.slane %v11620_v31, 3  ;;  %v2188_v31 = vrot.slane %v11792_v12, 3 }
  0xe5   : > { %9655 = vmatpush3.bf16.msra.mxu1 %v14656_v57  ;;  %8993 = vmatmul.mubr.msk.bf16.gmra.mrb[16].mxu0 %vm545_vm2, %v14657_v34 }
  0xe6   : > { %8844 = vmatprep.mubr.msk.bf16.mxu1 %vm545_vm2, %v11578_v16  ;;  %8996 = vmatprep.mubr.msk.bf16.mxu0 %vm545_vm2, %v14658_v2  ;;  %v14659_v16 = vld [vmem:[#allocation36_spill] sm:$0xff]  ;;  %v1560_v25 = vsel %vm414_vm1, %v1558_v24, %v1559_v28  ;;  %v1562_v4 = vsel %vm414_vm1, %v1559_v28, %v1561_v35  ;;  %v12096_v35 = vld [vmem:[%s11099_s9 + $0x30] sm:$0xff] }
  0xe7   : > { %10434 = vmatprep.subr.msk.bf16.mxu1 %vm594_vm0, %v7962_v63  ;;  %v11886_v29 = vpack.c.bf16 %v1562_v4, %v1560_v25  ;;  %v2878_v25 = vrot.slane %v12096_v35, 1  ;;  %v12100_v4 = vld [vmem:[%s11099_s9 + $0x38] sm:$0xff] }
  0xe9   : > { %14660 = vst [vmem:[#allocation9_spill] sm:$0xff] %v11886_v29 }
  0xec   : > { %8845 = vmatmul.mubr.msk.bf16.gmra.mrb[4].mxu1 %vm545_vm2, %v11588_v52  ;;  %v2191_v52 = vrot.slane %v11798_v14, 3 }
  0xed   : > { %8997 = vmatmul.mubr.msk.bf16.gmra.mrb[20].mxu0 %vm545_vm2, %v11474_v46  ;;  %8848 = vmatprep.mubr.msk.bf16.mxu1 %vm545_vm2, %v11625_v45  ;;  %v2190_v45 = vsel %vm414_vm1, %v2188_v31, %v2189_v49  ;;  %v2879_v31 = vrot.slane %v12100_v4, 1 }
  0xee   : > { %9000 = vmatprep.mubr.msk.bf16.mxu0 %vm545_vm2, %v14659_v16  ;;  %v2192_v54 = vsel %vm414_vm1, %v2189_v49, %v2191_v52  ;;  %v12104_v49 = vld [vmem:[%s11099_s9 + $0x40] sm:$0x3f] }
  0xef   : > { %v11901_v1 = vpack.c.bf16 %v2192_v54, %v2190_v45  ;;  %v2881_v52 = vrot.slane %v12104_v49, 1  ;;  %v12110_v54 = vld [vmem:[%s11099_s9 + $0x48] sm:$0xff] }
  0xf1   : > { %14662 = vst [vmem:[#allocation12_spill] sm:$0xff] %v11901_v1 }
  0xf4   : > { %8849 = vmatmul.mubr.msk.bf16.gmra.mrb[8].mxu1 %vm545_vm2, %v11631_v9  ;;  %v5356_v9 = vsel %vm594_vm0, %v8117_v51, 0 }
  0xf5   : > { %9001 = vmatmul.mubr.msk.bf16.gmra.mrb[24].mxu0 %vm545_vm2, %v14661_v53  ;;  %8852 = vmatprep.mubr.msk.bf16.mxu1 %vm545_vm2, %v11658_v32  ;;  %v11917_v32 = vld [vmem:[%s14416_s1 + $0x24] sm:$0x3] }
  0xf6   : > { %9004 = vmatprep.mubr.msk.bf16.mxu0 %vm545_vm2, %v11886_v29  ;;  %v5568_v42 = vsel %vm594_vm0, %v11917_v32, 0 }
  0xfc   : > { %8853 = vmatmul.mubr.msk.bf16.gmra.mrb[12].mxu1 %vm545_vm2, %v11662_v41  ;;  %v11988_v41 = vld [vmem:[%s11099_s9 + $0x10] sm:$0x3f] }
  0xfd   : > { %9005 = vmatmul.mubr.msk.bf16.gmra.mrb[28].mxu0 %vm545_vm2, %v11901_v1  ;;  %8856 = vmatprep.mubr.msk.bf16.mxu1 %vm545_vm2, %v11682_v59  ;;  %v2398_v59 = vrot.slane %v11795_v27, 4 }
  0xfe   : > { %9010 = vmatprep.mubr.msk.bf16.mxu0 %vm545_vm2, %v14642_v40 }
 0x104   : > { %8857 = vmatmul.mubr.msk.bf16.gmra.mrb[16].mxu1 %vm545_vm2, %v11684_v60  ;;  %v2400_v60 = vrot.slane %v11798_v14, 4 }
 0x105   : > { %9011 = vmatmul.mubr.msk.bf16.vlgmr.msra.gmra.mrb[0].mxu0 %vm545_vm2, %v14644_v43  ;;  %8860 = vmatprep.mubr.msk.bf16.mxu1 %vm545_vm2, %v11713_v23 }
 0x106   : > { %9349 = vmatpush3.bf16.msra.mxu0 %v5356_v9  ;;  %9014 = vmatprep.mubr.msk.bf16.mxu0 %vm545_vm2, %v14645_v10  ;;  %v2401_v43 = vsel %vm971_vm3, %v2398_v59, %v2400_v60  ;;  %v2883_v9 = vrot.slane %v12110_v54, 1  ;;  %v2882_v60 = vsel %vm2872_vm5, %v2879_v31, %v2881_v52 }
 0x107   : > { %10444 = vmatprep.subr.msk.bf16.mxu0 %vm594_vm0, %v11917_v32  ;;  %v12114_v32 = vld [vmem:[%s11099_s9 + $0x50] sm:$0xff] }
 0x10c   : > { %8861 = vmatmul.mubr.msk.bf16.gmra.mrb[20].mxu1 %vm545_vm2, %v11715_v30 }
 0x10d   : > { %9015 = vmatmul.mubr.msk.bf16.gmra.mrb[4].mxu0 %vm545_vm2, %v14646_v11  ;;  %8864 = vmatprep.mubr.msk.bf16.mxu1 %vm545_vm2, %v11735_v22  ;;  %v14663_v11 = vld [vmem:[#allocation7_spill] sm:$0xff] }
 0x10e   : > { %9018 = vmatprep.mubr.msk.bf16.mxu0 %vm545_vm2, %v11476_v55  ;;  %v7961_v55 = vld [vmem:[%s14416_s1 + $0x12] sm:$0x3] }
 0x114   : > { %8865 = vmatmul.mubr.msk.bf16.gmra.mrb[24].mxu1 %vm545_vm2, %v11737_v37 }
 0x115   : > { %9019 = vmatmul.mubr.msk.bf16.gmra.mrb[8].mxu0 %vm545_vm2, %v11483_v26  ;;  %8868 = vmatprep.mubr.msk.bf16.mxu1 %vm545_vm2, %v11757_v8  ;;  %v3017_v26 = vsel %vm594_vm0, %v7962_v63, 0  ;;  %v5345_v8 = vrot.slane %v11988_v41, 3 }
 0x116   : > { %9022 = vmatprep.mubr.msk.bf16.mxu0 %vm545_vm2, %v11504_v38  ;;  %v11973_v38 = vld [vmem:[%s11099_s9 + $0x18] sm:$0xff] }
 0x117   : > { %v2873_v50 = vrot.slane %v11973_v38, 1 }
 0x11c   : > { %8869 = vmatmul.mubr.msk.bf16.gmra.mrb[28].mxu1 %vm545_vm2, %v11800_v19 }
 0x11d   : > { %9023 = vmatmul.mubr.msk.bf16.gmra.mrb[12].mxu0 %vm545_vm2, %v11517_v5  ;;  %8890 = vmatprep.mubr.msk.bf16.mxu1 %vm545_vm2, %v14654_v6  ;;  %v11976_v5 = vld [vmem:[%s11099_s9 + $0x20] sm:$0xff] }
 0x11e   : > { %9026 = vmatprep.mubr.msk.bf16.mxu0 %vm545_vm2, %v11547_v33  ;;  %v11979_v33 = vld [vmem:[%s11099_s9 + $0x28] sm:$0x3f]  ;;  %v3004_v23 = vrot.slane %v11976_v5, 3  ;;  %v2874_v51 = vrot.slane %v11976_v5, 1 }
 0x11f   : > { %v3006_v30 = vrot.slane %v11979_v33, 3  ;;  %v2876_v63 = vrot.slane %v11979_v33, 1 }
 0x120   : > { %v2875_v57 = vsel %vm2872_vm5, %v2873_v50, %v2874_v51  ;;  %v5323_v50 = vpack.c.bf16 %v12100_v4, %v12096_v35 }
 0x121   : > { %v2877_v24 = vsel %vm2872_vm5, %v2874_v51, %v2876_v63  ;;  %v12169_v51 = vld [vmem:[%s14416_s1 + $0x18] sm:$0x3] }
 0x122   : > { %v2985_v28 = vpack.c.bf16 %v2877_v24, %v2875_v57 }
 0x124   : > { %8891 = vmatmul.mubr.msk.bf16.vlgmr.msra.gmra.mrb[16].mxu1 %vm545_vm2, %v14655_v7 }
 0x125   : > { %9027 = vmatmul.mubr.msk.bf16.gmra.mrb[16].mxu0 %vm545_vm2, %v11554_v13  ;;  %9043 = vmatpush3.bf16.msra.mxu1 %v3017_v26  ;;  %v11982_v13 = vld [vmem:[%s11099_s9] sm:$0xff]  ;;  %v2884_v26 = vrot.slane %v12114_v32, 1 }
 0x126   : > { %8894 = vmatprep.mubr.msk.bf16.mxu1 %vm545_vm2, %v14657_v34  ;;  %9030 = vmatprep.mubr.msk.bf16.mxu0 %vm545_vm2, %v11580_v20  ;;  %v11985_v20 = vld [vmem:[%s11099_s9 + $0x8] sm:$0xff]  ;;  %v5342_v22 = vrot.slane %v11982_v13, 3 }
 0x127   : > { %10435 = vmatprep.subr.msk.bf16.mxu1 %vm594_vm0, %v7961_v55  ;;  %v5343_v37 = vrot.slane %v11985_v20, 3  ;;  %v5321_v45 = vpack.c.bf16 %v11985_v20, %v11982_v13 }
 0x129   : > { %v5344_v27 = vsel %vm414_vm1, %v5342_v22, %v5343_v37  ;;  %v5346_v14 = vsel %vm414_vm1, %v5343_v37, %v5345_v8  ;;  %v5322_v22 = vpack.c.bf16 %v11976_v5, %v11973_v38  ;;  %v3572_v37 = vsel %vm594_vm0, %v12026_v44, 0  ;;  %v12136_v8 = vld [vmem:[%s11099_s9 + $0x60] sm:$0xff] }
 0x12a   : > { %v5349_v36 = vpack.c.bf16 %v5346_v14, %v5344_v27 }
 0x12c   : > { %8895 = vmatmul.mubr.msk.bf16.gmra.mrb[20].mxu1 %vm545_vm2, %v14658_v2 }
 0x12d   : > { %9031 = vmatmul.mubr.msk.bf16.gmra.mrb[20].mxu0 %vm545_vm2, %v11597_v0  ;;  %8898 = vmatprep.mubr.msk.bf16.mxu1 %vm545_vm2, %v11474_v46  ;;  %v2397_v0 = vrot.slane %v11792_v12, 4  ;;  %v3007_v12 = vsel %vm414_vm1, %v3004_v23, %v3006_v30 }
 0x12e   : > { %9034 = vmatprep.mubr.msk.bf16.mxu0 %vm545_vm2, %v11629_v61  ;;  %v3003_v61 = vrot.slane %v11973_v38, 3 }
 0x12f   : > { %v2399_v40 = vsel %vm971_vm3, %v2397_v0, %v2398_v59  ;;  %v2880_v59 = vsel %vm2872_vm5, %v2878_v25, %v2879_v31  ;;  %v12190_v31 = vpack.c.bf16 %v12114_v32, %v12110_v54 }
 0x130   : > { %v3005_v10 = vsel %vm414_vm1, %v3003_v61, %v3004_v23  ;;  %v2404_v19 = vpack.c.bf16 %v2401_v43, %v2399_v40  ;;  %v2885_v61 = vsel %vm2872_vm5, %v2883_v9, %v2884_v26  ;;  %v2986_v30 = vpack.c.bf16 %v2882_v60, %v2880_v59  ;;  %v12140_v43 = vld [vmem:[%s11099_s9 + $0x68] sm:$0xff]  ;;  %v12205_v59 = vld [vmem:[%s11099_s9 + $0xa0] sm:$0x3f] }
 0x131   : > { %v2888_v40 = vrot.slane %v12136_v8, 1  ;;  %14667 = vst [vmem:[#allocation15_spill] sm:$0xff] %v12190_v31  ;;  %v2901_v60 = vrot.slane %v12205_v59, 1 }
 0x134   : > { %8899 = vmatmul.mubr.msk.bf16.gmra.mrb[24].mxu1 %vm545_vm2, %v14659_v16 }
 0x135   : > { %9035 = vmatmul.mubr.msk.bf16.gmra.mrb[24].mxu0 %vm545_vm2, %v11639_v21  ;;  %8902 = vmatprep.mubr.msk.bf16.mxu1 %vm545_vm2, %v14661_v53  ;;  %v3010_v21 = vpack.c.bf16 %v3007_v12, %v3005_v10  ;;  %v2889_v10 = vrot.slane %v12140_v43, 1  ;;  %v12144_v12 = vld [vmem:[%s11099_s9 + $0x70] sm:$0x3f] }
 0x136   : > { %9038 = vmatprep.mubr.msk.bf16.mxu0 %vm545_vm2, %v11660_v3  ;;  %v3229_v3 = vsel %vm594_vm0, %v7961_v55, 0  ;;  %v12118_v55 = vld [vmem:[%s11099_s9 + $0x58] sm:$0x3f]  ;;  %v2891_v27 = vrot.slane %v12144_v12, 1 }
 0x137   : > { %v2886_v0 = vrot.slane %v12118_v55, 1  ;;  %v2890_v63 = vsel %vm2872_vm5, %v2888_v40, %v2889_v10  ;;  %v12221_v40 = vld [vmem:[%s11099_s9 + $0xb8] sm:$0x3f] }
 0x138   : > { %v2892_v57 = vsel %vm2872_vm5, %v2889_v10, %v2891_v27  ;;  %v2906_v10 = vrot.slane %v12221_v40, 1 }
 0x139   : > { %v2887_v23 = vsel %vm2872_vm5, %v2884_v26, %v2886_v0  ;;  %v12186_v25 = vpack.c.bf16 %v2892_v57, %v2890_v63  ;;  %v12201_v26 = vld [vmem:[%s11099_s9 + $0x98] sm:$0xff]  ;;  %v12245_v57 = vld [vmem:[%s11099_s9 + $0xc0] sm:$0xff] }
 0x13a   : > { %v12147_v14 = vpack.c.bf16 %v2887_v23, %v2885_v61  ;;  %v2899_v0 = vrot.slane %v12201_v26, 1  ;;  %v12210_v61 = vpack.c.bf16 %v12140_v43, %v12136_v8  ;;  %v12213_v23 = vld [vmem:[%s11099_s9 + $0xa8] sm:$0xff] }
 0x13b   : > { %14666 = vst [vmem:[#allocation14_spill] sm:$0xff] %v12186_v25 }
 0x13c   : > { %8903 = vmatmul.mubr.msk.bf16.gmra.mrb[28].mxu1 %vm545_vm2, %v11886_v29  ;;  %14665 = vst [vmem:[#allocation13_spill] sm:$0xff] %v12147_v14  ;;  %14669 = vst [vmem:[#allocation17_spill] sm:$0xff] %v12210_v61 }
 0x13d   : > { %9039 = vmatmul.mubr.msk.bf16.gmra.mrb[28].mxu0 %vm545_vm2, %v2404_v19  ;;  %9044 = vmatprep.mubr.msk.bf16.mxu1 %vm545_vm2, %v3010_v21  ;;  %v12150_v19 = vld [vmem:[%s11099_s9 + $0x78] sm:$0xff] }
 0x13e   : > { %9350 = vmatprep.mubr.msk.bf16.mxu0 %vm545_vm2, %v5349_v36  ;;  %v12154_v36 = vld [vmem:[%s11099_s9 + $0x80] sm:$0xff] }
 0x144   : > { %9045 = vmatmul.mubr.msk.bf16.vlgmr.msra.gmra.mrb[32].mxu1 %vm545_vm2, %v14663_v11 }
 0x145   : > { %9077 = vmatpush3.bf16.msra.mxu1 %v3229_v3  ;;  %9351 = vmatmul.mubr.msk.bf16.vlgmr.msra.gmra.mrb[32].mxu0 %vm545_vm2, %v3010_v21  ;;  %v2893_v21 = vrot.slane %v12150_v19, 1  ;;  %v2894_v3 = vrot.slane %v12154_v36, 1 }
 0x146   : > { %9383 = vmatpush3.bf16.msra.mxu0 %v5568_v42  ;;  %9048 = vmatprep.mubr.msk.bf16.mxu1 %vm545_vm2, %v14664_v48  ;;  %v12158_v42 = vld [vmem:[%s11099_s9 + $0x88] sm:$0x3f] }
 0x147   : > { %9354 = vmatprep.mubr.msk.bf16.mxu0 %vm545_vm2, %v14663_v11  ;;  %10436 = vmatprep.subr.msk.bf16.mxu1 %vm594_vm0, %v12026_v44  ;;  %v2896_v11 = vrot.slane %v12158_v42, 1  ;;  %v5910_v44 = vsel %vm594_vm0, %v12032_v18, 0  ;;  %v2895_v24 = vsel %vm2872_vm5, %v2893_v21, %v2894_v3  ;;  %v2902_v21 = vsel %vm2872_vm5, %v2899_v0, %v2901_v60 }
 0x148   : > { %10445 = vmatprep.subr.msk.bf16.mxu0 %vm594_vm0, %v12032_v18  ;;  %v12177_v18 = vld [vmem:[%s14416_s1 + $0x2a] sm:$0x3] }
 0x14c   : > { %9049 = vmatmul.mubr.msk.bf16.gmra.mrb[36].mxu1 %vm545_vm2, %v14647_v17 }
 0x14d   : > { %9355 = vmatmul.mubr.msk.bf16.gmra.mrb[36].mxu0 %vm545_vm2, %v14664_v48  ;;  %9052 = vmatprep.mubr.msk.bf16.mxu1 %vm545_vm2, %v14648_v56 }
 0x14e   : > { %9358 = vmatprep.mubr.msk.bf16.mxu0 %vm545_vm2, %v14647_v17 }
 0x154   : > { %9053 = vmatmul.mubr.msk.bf16.gmra.mrb[40].mxu1 %vm545_vm2, %v14649_v58 }
 0x155   : > { %9359 = vmatmul.mubr.msk.bf16.gmra.mrb[40].mxu0 %vm545_vm2, %v14648_v56  ;;  %9056 = vmatprep.mubr.msk.bf16.mxu1 %vm545_vm2, %v14650_v39 }
 0x156   : > { %9362 = vmatprep.mubr.msk.bf16.mxu0 %vm545_vm2, %v14649_v58 }
 0x15c   : > { %9057 = vmatmul.mubr.msk.bf16.gmra.mrb[44].mxu1 %vm545_vm2, %v14651_v15 }
 0x15d   : > { %9363 = vmatmul.mubr.msk.bf16.gmra.mrb[44].mxu0 %vm545_vm2, %v14650_v39  ;;  %9060 = vmatprep.mubr.msk.bf16.mxu1 %vm545_vm2, %v14652_v47 }
 0x15e   : > { %9366 = vmatprep.mubr.msk.bf16.mxu0 %vm545_vm2, %v14651_v15 }
 0x164   : > { %9061 = vmatmul.mubr.msk.bf16.gmra.mrb[48].mxu1 %vm545_vm2, %v14653_v62 }
 0x165   : > { %9367 = vmatmul.mubr.msk.bf16.gmra.mrb[48].mxu0 %vm545_vm2, %v14652_v47  ;;  %9064 = vmatprep.mubr.msk.bf16.mxu1 %vm545_vm2, %v14654_v6 }
 0x166   : > { %9370 = vmatprep.mubr.msk.bf16.mxu0 %vm545_vm2, %v14653_v62 }
 0x16c   : > { %9065 = vmatmul.mubr.msk.bf16.gmra.mrb[52].mxu1 %vm545_vm2, %v14655_v7 }
 0x16d   : > { %9371 = vmatmul.mubr.msk.bf16.gmra.mrb[52].mxu0 %vm545_vm2, %v14654_v6  ;;  %9068 = vmatprep.mubr.msk.bf16.mxu1 %vm545_vm2, %v14657_v34  ;;  %v12317_v6 = vld [vmem:[%s11099_s9 + $0x118] sm:$0x3f] }
 0x16e   : > { %9374 = vmatprep.mubr.msk.bf16.mxu0 %vm545_vm2, %v14655_v7  ;;  %v2926_v62 = vrot.slane %v12317_v6, 1 }
 0x174   : > { %9069 = vmatmul.mubr.msk.bf16.gmra.mrb[56].mxu1 %vm545_vm2, %v14658_v2 }
 0x175   : > { %9375 = vmatmul.mubr.msk.bf16.gmra.mrb[56].mxu0 %vm545_vm2, %v14657_v34  ;;  %9072 = vmatprep.mubr.msk.bf16.mxu1 %vm545_vm2, %v11474_v46 }
 0x176   : > { %9378 = vmatprep.mubr.msk.bf16.mxu0 %vm545_vm2, %v14658_v2 }
 0x17c   : > { %9073 = vmatmul.mubr.msk.bf16.gmra.mrb[60].mxu1 %vm545_vm2, %v14659_v16 }
 0x17d   : > { %9379 = vmatmul.mubr.msk.bf16.gmra.mrb[60].mxu0 %vm545_vm2, %v11474_v46  ;;  %9078 = vmatprep.mubr.msk.bf16.mxu1 %vm545_vm2, %v2985_v28  ;;  %v2897_v28 = vsel %vm2872_vm5, %v2894_v3, %v2896_v11 }
 0x17e   : > { %9384 = vmatprep.mubr.msk.bf16.mxu0 %vm545_vm2, %v5321_v45  ;;  %v12194_v52 = vpack.c.bf16 %v2897_v28, %v2895_v24  ;;  %v12197_v45 = vld [vmem:[%s11099_s9 + $0x90] sm:$0xff]  ;;  %v2908_v24 = vrot.slane %v12245_v57, 1  ;;  %v12249_v28 = vld [vmem:[%s11099_s9 + $0xc8] sm:$0xff] }
 0x17f   : > { %v2898_v9 = vrot.slane %v12197_v45, 1 }
 0x180   : > { %14668 = vst [vmem:[#allocation16_spill] sm:$0xff] %v12194_v52 }
 0x181   : > { %v2900_v27 = vsel %vm2872_vm5, %v2898_v9, %v2899_v0  ;;  %v2909_v9 = vrot.slane %v12249_v28, 1  ;;  %v12253_v0 = vld [vmem:[%s11099_s9 + $0xd0] sm:$0x3f] }
 0x182   : > { %v2911_v60 = vrot.slane %v12253_v0, 1 }
 0x183   : > { %v2910_v1 = vsel %vm2872_vm5, %v2908_v24, %v2909_v9  ;;  %v12293_v24 = vld [vmem:[%s11099_s9 + $0xf0] sm:$0xff] }
 0x184   : > { %9079 = vmatmul.mubr.msk.bf16.vlgmr.msra.gmra.mrb[32].mxu1 %vm545_vm2, %v2986_v30  ;;  %v2903_v30 = vrot.slane %v12213_v23, 1  ;;  %v2912_v29 = vsel %vm2872_vm5, %v2909_v9, %v2911_v60  ;;  %v2918_v9 = vrot.slane %v12293_v24, 1  ;;  %v12297_v60 = vld [vmem:[%s11099_s9 + $0xf8] sm:$0xff] }
 0x185   : > { %9111 = vmatpush3.bf16.msra.mxu1 %v3572_v37  ;;  %9385 = vmatmul.mubr.msk.bf16.vlgmr.msra.gmra.mrb[32].mxu0 %vm545_vm2, %v5322_v22  ;;  %v12217_v22 = vld [vmem:[%s11099_s9 + $0xb0] sm:$0xff]  ;;  %v12284_v46 = vpack.c.bf16 %v2912_v29, %v2910_v1  ;;  %v2919_v7 = vrot.slane %v12297_v60, 1  ;;  %v12306_v29 = vpack.c.bf16 %v12249_v28, %v12245_v57  ;;  %v12309_v1 = vld [vmem:[%s11099_s9 + $0x108] sm:$0xff] }
 0x186   : > { %9417 = vmatpush3.bf16.msra.mxu0 %v5910_v44  ;;  %9082 = vmatprep.mubr.msk.bf16.mxu1 %vm545_vm2, %v12147_v14  ;;  %v2904_v37 = vrot.slane %v12217_v22, 1  ;;  %v12236_v44 = vpack.c.bf16 %v2902_v21, %v2900_v27  ;;  %v12265_v27 = vld [vmem:[%s11099_s9 + $0xe0] sm:$0xff]  ;;  %v12288_v2 = vpack.c.bf16 %v12217_v22, %v12213_v23 }
 0x187   : > { %9388 = vmatprep.mubr.msk.bf16.mxu0 %vm545_vm2, %v5323_v50  ;;  %10437 = vmatprep.subr.msk.bf16.mxu1 %vm594_vm0, %v12169_v51  ;;  %v12240_v50 = vpack.c.bf16 %v12154_v36, %v12150_v19  ;;  %v2914_v21 = vrot.slane %v12265_v27, 1  ;;  %14674 = vst [vmem:[#allocation27_spill] sm:$0xff] %v12284_v46  ;;  %14677 = vst [vmem:[#allocation32_spill] sm:$0xff] %v12306_v29  ;;  %v2920_v47 = vsel %vm2872_vm5, %v2918_v9, %v2919_v7  ;;  %v12341_v9 = vld [vmem:[%s11099_s9 + $0x120] sm:$0xff] }
 0x188   : > { %10446 = vmatprep.subr.msk.bf16.mxu0 %vm594_vm0, %v12177_v18  ;;  %v2905_v3 = vsel %vm2872_vm5, %v2903_v30, %v2904_v37  ;;  %v2907_v11 = vsel %vm2872_vm5, %v2904_v37, %v2906_v10  ;;  %14670 = vst [vmem:[#allocation20_spill] sm:$0xff] %v12236_v44  ;;  %v12258_v30 = vpack.c.bf16 %v12201_v26, %v12197_v45  ;;  %v12261_v37 = vld [vmem:[%s11099_s9 + $0xd8] sm:$0xff]  ;;  %14675 = vst [vmem:[#allocation5_spill] sm:$0xff] %v12288_v2 }
 0x189   : > { %14671 = vst [vmem:[#allocation21_spill] sm:$0xff] %v12240_v50  ;;  %v12242_v63 = vpack.c.bf16 %v2907_v11, %v2905_v3  ;;  %v2913_v10 = vrot.slane %v12261_v37, 1  ;;  %v12269_v3 = vld [vmem:[%s11099_s9 + $0xe8] sm:$0x3f]  ;;  %v12336_v17 = vpack.c.bf16 %v12265_v27, %v12261_v37 }
 0x18a   : > { %14673 = vst [vmem:[#allocation25_spill] sm:$0xff] %v12258_v30  ;;  %v2916_v11 = vrot.slane %v12269_v3, 1 }
 0x18b   : > { %14672 = vst [vmem:[#allocation30_spill] sm:$0xff] %v12242_v63  ;;  %v2915_v53 = vsel %vm2872_vm5, %v2913_v10, %v2914_v21  ;;  %v12301_v10 = vld [vmem:[%s11099_s9 + $0x100] sm:$0x3f]  ;;  %14679 = vst [vmem:[#allocation6_spill] sm:$0xff] %v12336_v17 }
 0x18c   : > { %9083 = vmatmul.mubr.msk.bf16.gmra.mrb[36].mxu1 %vm545_vm2, %v12186_v25  ;;  %v2917_v16 = vsel %vm2872_vm5, %v2914_v21, %v2916_v11  ;;  %v2921_v21 = vrot.slane %v12301_v10, 1 }
 0x18d   : > { %9389 = vmatmul.mubr.msk.bf16.gmra.mrb[36].mxu0 %vm545_vm2, %v12190_v31  ;;  %9086 = vmatprep.mubr.msk.bf16.mxu1 %vm545_vm2, %v12194_v52  ;;  %v12290_v34 = vpack.c.bf16 %v2917_v16, %v2915_v53  ;;  %v2923_v16 = vrot.slane %v12309_v1, 1  ;;  %v12313_v53 = vld [vmem:[%s11099_s9 + $0x110] sm:$0xff] }
 0x18e   : > { %9392 = vmatprep.mubr.msk.bf16.mxu0 %vm545_vm2, %v12210_v61  ;;  %v2924_v11 = vrot.slane %v12313_v53, 1  ;;  %v2922_v15 = vsel %vm2872_vm5, %v2919_v7, %v2921_v21  ;;  %v2928_v7 = vrot.slane %v12341_v9, 1  ;;  %v12345_v21 = vld [vmem:[%s11099_s9 + $0x128] sm:$0xff] }
 0x18f   : > { %14676 = vst [vmem:[#allocation29_spill] sm:$0xff] %v12290_v34  ;;  %v12332_v56 = vpack.c.bf16 %v2922_v15, %v2920_v47  ;;  %v12354_v15 = vpack.c.bf16 %v12297_v60, %v12293_v24  ;;  %v12357_v47 = vld [vmem:[%s11099_s9 + $0x138] sm:$0xff] }
 0x190   : > { %v2925_v39 = vsel %vm2872_vm5, %v2923_v16, %v2924_v11  ;;  %v2927_v58 = vsel %vm2872_vm5, %v2924_v11, %v2926_v62  ;;  %v12349_v16 = vld [vmem:[%s11099_s9 + $0x130] sm:$0x3f] }
 0x191   : > { %14678 = vst [vmem:[#allocation34_spill] sm:$0xff] %v12332_v56  ;;  %v12338_v48 = vpack.c.bf16 %v2927_v58, %v2925_v39  ;;  %v2931_v62 = vrot.slane %v12349_v16, 1  ;;  %14681 = vst [vmem:[#allocation38_spill] sm:$0xff] %v12354_v15  ;;  %v2933_v58 = vrot.slane %v12357_v47, 1  ;;  %v12361_v39 = vld [vmem:[%s11099_s9 + $0x140] sm:$0xff] }
 0x192   : > { %v2934_v11 = vrot.slane %v12361_v39, 1 }
 0x193   : > { %14680 = vst [vmem:[#allocation7_spill] sm:$0xff] %v12338_v48 }
 0x194   : > { %9087 = vmatmul.mubr.msk.bf16.gmra.mrb[40].mxu1 %vm545_vm2, %v12236_v44 }
 0x195   : > { %9393 = vmatmul.mubr.msk.bf16.gmra.mrb[40].mxu0 %vm545_vm2, %v12240_v50  ;;  %9090 = vmatprep.mubr.msk.bf16.mxu1 %vm545_vm2, %v12242_v63  ;;  %v12413_v50 = vld [vmem:[%s11099_s9 + $0x178] sm:$0x3f] }
 0x196   : > { %9396 = vmatprep.mubr.msk.bf16.mxu0 %vm545_vm2, %v12258_v30  ;;  %v2935_v30 = vsel %vm2872_vm5, %v2933_v58, %v2934_v11  ;;  %v12397_v58 = vld [vmem:[%s11099_s9 + $0x160] sm:$0x3f]  ;;  %14690 = vst [vmem:[#allocation47_spill] sm:$0xff] %v12413_v50  ;;  %v2946_v52 = vrot.slane %v12413_v50, 1 }
 0x197   : > { %14687 = vst [vmem:[#allocation44_spill] sm:$0xff] %v12397_v58 }
 0x19c   : > { %9091 = vmatmul.mubr.msk.bf16.gmra.mrb[44].mxu1 %vm545_vm2, %v12284_v46 }
 0x19d   : > { %9397 = vmatmul.mubr.msk.bf16.gmra.mrb[44].mxu0 %vm545_vm2, %v12288_v2  ;;  %9094 = vmatprep.mubr.msk.bf16.mxu1 %vm545_vm2, %v12290_v34  ;;  %v2929_v34 = vrot.slane %v12345_v21, 1 }
 0x19e   : > { %9400 = vmatprep.mubr.msk.bf16.mxu0 %vm545_vm2, %v12306_v29  ;;  %v12365_v29 = vld [vmem:[%s11099_s9 + $0x148] sm:$0x3f] }
 0x19f   : > { %v2936_v46 = vrot.slane %v12365_v29, 1  ;;  %v2930_v2 = vsel %vm2872_vm5, %v2928_v7, %v2929_v34  ;;  %v2932_v63 = vsel %vm2872_vm5, %v2929_v34, %v2931_v62  ;;  %v12389_v7 = vld [vmem:[%s11099_s9 + $0x150] sm:$0xff]  ;;  %v12393_v62 = vld [vmem:[%s11099_s9 + $0x158] sm:$0xff] }
 0x1a0   : > { %v12380_v44 = vpack.c.bf16 %v2932_v63, %v2930_v2  ;;  %14685 = vst [vmem:[#allocation42_spill] sm:$0xff] %v12389_v7  ;;  %v2938_v34 = vrot.slane %v12389_v7, 1  ;;  %14686 = vst [vmem:[#allocation43_spill] sm:$0xff] %v12393_v62  ;;  %v12402_v2 = vpack.c.bf16 %v12345_v21, %v12341_v9  ;;  %v12405_v63 = vld [vmem:[%s11099_s9 + $0x168] sm:$0xff] }
 0x1a2   : > { %14682 = vst [vmem:[#allocation39_spill] sm:$0xff] %v12380_v44  ;;  %14688 = vst [vmem:[#allocation45_spill] sm:$0xff] %v12402_v2 }
 0x1a4   : > { %9095 = vmatmul.mubr.msk.bf16.gmra.mrb[48].mxu1 %vm545_vm2, %v12332_v56  ;;  %v2937_v56 = vsel %vm2872_vm5, %v2934_v11, %v2936_v46  ;;  %v2941_v46 = vrot.slane %v12397_v58, 1  ;;  %v12435_v58 = vld [vmem:[%s11099_s9 + $0x188] sm:$0xff] }
 0x1a5   : > { %9401 = vmatmul.mubr.msk.bf16.gmra.mrb[48].mxu0 %vm545_vm2, %v12336_v17  ;;  %9098 = vmatprep.mubr.msk.bf16.mxu1 %vm545_vm2, %v12338_v48  ;;  %v12384_v17 = vpack.c.bf16 %v12313_v53, %v12309_v1  ;;  %v12386_v48 = vpack.c.bf16 %v2937_v56, %v2935_v30  ;;  %v2943_v56 = vrot.slane %v12405_v63, 1  ;;  %v12409_v30 = vld [vmem:[%s11099_s9 + $0x170] sm:$0xff]  ;;  %14693 = vst [vmem:[#allocation50_spill] sm:$0xff] %v12435_v58 }
 0x1a6   : > { %9404 = vmatprep.mubr.msk.bf16.mxu0 %vm545_vm2, %v12354_v15  ;;  %v2939_v15 = vrot.slane %v12393_v62, 1  ;;  %14689 = vst [vmem:[#allocation46_spill] sm:$0xff] %v12409_v30  ;;  %v2944_v11 = vrot.slane %v12409_v30, 1 }
 0x1a7   : > { %14683 = vst [vmem:[#allocation40_spill] sm:$0xff] %v12384_v17  ;;  %14684 = vst [vmem:[#allocation41_spill] sm:$0xff] %v12386_v48 }
 0x1a8   : > { %v2940_v61 = vsel %vm2872_vm5, %v2938_v34, %v2939_v15  ;;  %v2942_v25 = vsel %vm2872_vm5, %v2939_v15, %v2941_v46  ;;  %v2945_v31 = vsel %vm2872_vm5, %v2943_v56, %v2944_v11  ;;  %v2947_v14 = vsel %vm2872_vm5, %v2944_v11, %v2946_v52  ;;  %v12439_v34 = vld [vmem:[%s11099_s9 + $0x190] sm:$0x3f] }
 0x1a9   : > { %v12428_v50 = vpack.c.bf16 %v2942_v25, %v2940_v61  ;;  %14694 = vst [vmem:[#allocation51_spill] sm:$0xff] %v12439_v34  ;;  %v2951_v15 = vrot.slane %v12439_v34, 1  ;;  %v12444_v46 = vpack.c.bf16 %v12361_v39, %v12357_v47  ;;  %v12446_v56 = vpack.c.bf16 %v2947_v14, %v2945_v31 }
 0x1aa   : > { %v12450_v25 = vpack.c.bf16 %v12393_v62, %v12389_v7  ;;  %v3393_v52 = vrot.slane %v11973_v38, 5  ;;  %v3394_v61 = vrot.slane %v11976_v5, 5  ;;  %v3396_v11 = vrot.slane %v11979_v33, 5 }
 0x1ab   : > { %14691 = vst [vmem:[#allocation48_spill] sm:$0xff] %v12428_v50  ;;  %14695 = vst [vmem:[#allocation52_spill] sm:$0xff] %v12444_v46  ;;  %v5732_v34 = vrot.slane %v11985_v20, 6  ;;  %v3406_v62 = vrot.slane %v12118_v55, 5  ;;  %v5744_v7 = vrot.slane %v12104_v49, 6 }
 0x1ac   : > { %9099 = vmatmul.mubr.msk.bf16.gmra.mrb[52].mxu1 %vm545_vm2, %v12380_v44  ;;  %v12431_v44 = vld [vmem:[%s11099_s9 + $0x180] sm:$0xff]  ;;  %14696 = vst [vmem:[#allocation53_spill] sm:$0xff] %v12446_v56  ;;  %14697 = vst [vmem:[#allocation54_spill] sm:$0xff] %v12450_v25  ;;  %v3397_v20 = vsel %vm3392_vm6, %v3394_v61, %v3396_v11 }
 0x1ad   : > { %9405 = vmatmul.mubr.msk.bf16.gmra.mrb[52].mxu0 %vm545_vm2, %v12384_v17  ;;  %9102 = vmatprep.mubr.msk.bf16.mxu1 %vm545_vm2, %v12386_v48  ;;  %14692 = vst [vmem:[#allocation49_spill] sm:$0xff] %v12431_v44  ;;  %v2948_v17 = vrot.slane %v12431_v44, 1  ;;  %v2949_v48 = vrot.slane %v12435_v58, 1  ;;  %v5734_v58 = vrot.slane %v11988_v41, 6  ;;  %v5739_v44 = vrot.slane %v11979_v33, 6 }
 0x1ae   : > { %9408 = vmatprep.mubr.msk.bf16.mxu0 %vm545_vm2, %v12402_v2  ;;  %v5731_v2 = vrot.slane %v11982_v13, 6  ;;  %v3395_v13 = vsel %vm3392_vm6, %v3393_v52, %v3394_v61  ;;  %v3399_v33 = vrot.slane %v12100_v4, 5  ;;  %v5736_v52 = vrot.slane %v11973_v38, 6 }
 0x1af   : > { %v2950_v14 = vsel %vm2872_vm5, %v2948_v17, %v2949_v48  ;;  %v2952_v31 = vsel %vm2872_vm5, %v2949_v48, %v2951_v15  ;;  %v5735_v15 = vsel %vm594_vm0, %v5732_v34, %v5734_v58  ;;  %v5737_v61 = vrot.slane %v11976_v5, 6 }
 0x1b0   : > { %v12473_v17 = vpack.c.bf16 %v2952_v31, %v2950_v14  ;;  %v5733_v48 = vsel %vm594_vm0, %v5731_v2, %v5732_v34  ;;  %v12488_v14 = vpack.c.bf16 %v12409_v30, %v12405_v63  ;;  %v3505_v2 = vpack.c.bf16 %v3397_v20, %v3395_v13 }
 0x1b1   : > { %v3403_v58 = vrot.slane %v12110_v54, 5  ;;  %v3404_v34 = vrot.slane %v12114_v32, 5  ;;  %v5741_v38 = vrot.slane %v12096_v35, 6  ;;  %v5742_v5 = vrot.slane %v12100_v4, 6 }
 0x1b2   : > { %14698 = vst [vmem:[#allocation55_spill] sm:$0xff] %v12473_v17  ;;  %14699 = vst [vmem:[#allocation56_spill] sm:$0xff] %v12488_v14  ;;  %v5738_v30 = vsel %vm594_vm0, %v5736_v52, %v5737_v61 }
 0x1b3   : > { %v3405_v4 = vsel %vm3392_vm6, %v3403_v58, %v3404_v34 }
 0x1b4   : > { %9103 = vmatmul.mubr.msk.bf16.gmra.mrb[56].mxu1 %vm545_vm2, %v12428_v50  ;;  %v3398_v50 = vrot.slane %v12096_v35, 5  ;;  %v5740_v35 = vsel %vm594_vm0, %v5737_v61, %v5739_v44  ;;  %v5743_v44 = vsel %vm594_vm0, %v5741_v38, %v5742_v5  ;;  %v5745_v61 = vsel %vm594_vm0, %v5742_v5, %v5744_v7 }
 0x1b5   : > { %9409 = vmatmul.mubr.msk.bf16.gmra.mrb[56].mxu0 %vm545_vm2, %v12444_v46  ;;  %9106 = vmatprep.mubr.msk.bf16.mxu1 %vm545_vm2, %v12446_v56  ;;  %v5843_v46 = vpack.c.bf16 %v5735_v15, %v5733_v48  ;;  %v3409_v48 = vrot.slane %v12140_v43, 5  ;;  %v5746_v15 = vrot.slane %v12110_v54, 6  ;;  %v6120_v54 = vsel %vm594_vm0, %v12177_v18, 0 }
 0x1b6   : > { %9412 = vmatprep.mubr.msk.bf16.mxu0 %vm545_vm2, %v12450_v25  ;;  %v3401_v25 = vrot.slane %v12104_v49, 5  ;;  %v3400_v13 = vsel %vm3392_vm6, %v3398_v50, %v3399_v33  ;;  %v3408_v49 = vrot.slane %v12136_v8, 5  ;;  %v3407_v50 = vsel %vm3392_vm6, %v3404_v34, %v3406_v62 }
 0x1b7   : > { %v12471_v41 = vpop.f32.mrb[0].mxu1  ;;  %v3792_v62 = vsel %vm594_vm0, %v12169_v51, 0  ;;  %v3413_v38 = vrot.slane %v12150_v19, 5  ;;  %v3414_v7 = vrot.slane %v12154_v36, 5 }
 0x1b8   : > { %v12478_v56 = vpop.f32.mrb[1].mxu1  ;;  %v3402_v20 = vsel %vm3392_vm6, %v3399_v33, %v3401_v25  ;;  %v3411_v25 = vrot.slane %v12144_v12, 5  ;;  %v5747_v33 = vrot.slane %v12114_v32, 6  ;;  %v12528_v32 = vpack.c.bf16 %v3407_v50, %v3405_v4 }
 0x1b9   : > { %v12484_v11 = vpop.f32.mrb[2].mxu1  ;;  %v5752_v4 = vrot.slane %v12140_v43, 6  ;;  %v5754_v50 = vrot.slane %v12144_v12, 6 }
 0x1ba   : > { %v12492_v31 = vpop.f32.mrb[3].mxu1  ;;  %v3412_v51 = vsel %vm3392_vm6, %v3409_v48, %v3411_v25 }
 0x1bc   : > { %9107 = vmatmul.mubr.msk.bf16.gmra.mrb[60].mxu1 %vm545_vm2, %v12473_v17  ;;  %v3506_v17 = vpack.c.bf16 %v3402_v20, %v3400_v13  ;;  %v5845_v13 = vpack.c.bf16 %v5745_v61, %v5743_v44  ;;  %v3410_v20 = vsel %vm3392_vm6, %v3408_v49, %v3409_v48  ;;  %v12546_v44 = vld [vmem:[%s14416_s1 + $0x1a] sm:$0x3]  ;;  %v3415_v49 = vsel %vm3392_vm6, %v3413_v38, %v3414_v7 }
 0x1bd   : > { %9413 = vmatmul.mubr.msk.bf16.gmra.mrb[60].mxu0 %vm545_vm2, %v12488_v14  ;;  %9112 = vmatprep.mubr.msk.bf16.mxu1 %vm545_vm2, %v3505_v2  ;;  %v5749_v2 = vrot.slane %v12118_v55, 6  ;;  %v3416_v55 = vrot.slane %v12158_v42, 5  ;;  %v12558_v43 = vpack.c.bf16 %v3412_v51, %v3410_v20  ;;  %v3419_v61 = vrot.slane %v12201_v26, 5 }
 0x1be   : > { %9418 = vmatprep.mubr.msk.bf16.mxu0 %vm545_vm2, %v5843_v46  ;;  %v5844_v46 = vpack.c.bf16 %v5740_v35, %v5738_v30  ;;  %v5748_v30 = vsel %vm594_vm0, %v5746_v15, %v5747_v33  ;;  %v5751_v35 = vrot.slane %v12136_v8, 6  ;;  %v12554_v8 = vld [vmem:[%s14416_s1 + $0x2c] sm:$0x3]  ;;  %v5755_v15 = vsel %vm594_vm0, %v5752_v4, %v5754_v50 }
 0x1bf   : > { %v12515_v52 = vpop.f32.mrb[4].mxu1  ;;  %v5750_v18 = vsel %vm594_vm0, %v5747_v33, %v5749_v2  ;;  %v3417_v48 = vsel %vm3392_vm6, %v3414_v7, %v3416_v55  ;;  %v3418_v33 = vrot.slane %v12197_v45, 5  ;;  %v5757_v38 = vrot.slane %v12154_v36, 6 }
 0x1c0   : > { %v12520_v58 = vpop.f32.mrb[5].mxu1  ;;  %v12560_v12 = vpack.c.bf16 %v5750_v18, %v5748_v30  ;;  %v5753_v25 = vsel %vm594_vm0, %v5751_v35, %v5752_v4  ;;  %v5759_v55 = vrot.slane %v12158_v42, 6  ;;  %v3424_v20 = vrot.slane %v12217_v22, 5 }
 0x1c1   : > { %v12526_v34 = vpop.f32.mrb[6].mxu1  ;;  %v3426_v51 = vrot.slane %v12221_v40, 5  ;;  %v12588_v18 = vpack.c.bf16 %v5755_v15, %v5753_v25  ;;  %v5761_v36 = vrot.slane %v12197_v45, 6  ;;  %v5762_v35 = vrot.slane %v12201_v26, 6 }
 0x1c2   : > { %v12533_v5 = vpop.f32.mrb[7].mxu1  ;;  %v5764_v4 = vrot.slane %v12205_v59, 6  ;;  %v5760_v45 = vsel %vm594_vm0, %v5757_v38, %v5759_v55  ;;  %v3431_v25 = vrot.slane %v12253_v0, 5  ;;  %v5766_v15 = vrot.slane %v12213_v23, 6 }
 0x1c4   : > { %9113 = vmatmul.mubr.msk.bf16.vlgmr.msra.gmra.mrb[32].mxu1 %vm545_vm2, %v3506_v17 }
 0x1c5   : > { %9145 = vmatpush3.bf16.msra.mxu1 %v3792_v62  ;;  %9419 = vmatmul.mubr.msk.bf16.vlgmr.msra.gmra.mrb[32].mxu0 %vm545_vm2, %v5844_v46  ;;  %v12573_v62 = vpack.c.bf16 %v3417_v48, %v3415_v49  ;;  %v3421_v46 = vrot.slane %v12205_v59, 5  ;;  %v3428_v49 = vrot.slane %v12245_v57, 5  ;;  %v3429_v48 = vrot.slane %v12249_v28, 5 }
 0x1c6   : > { %9451 = vmatpush3.bf16.msra.mxu0 %v6120_v54  ;;  %9116 = vmatprep.mubr.msk.bf16.mxu1 %vm545_vm2, %v12528_v32  ;;  %v5756_v54 = vrot.slane %v12150_v19, 6  ;;  %v3420_v19 = vsel %vm3392_vm6, %v3418_v33, %v3419_v61  ;;  %v3427_v59 = vsel %vm3392_vm6, %v3424_v20, %v3426_v51  ;;  %v5767_v33 = vrot.slane %v12217_v22, 6 }
 0x1c7   : > { %v12562_v17 = vpop.f32.mrb[8].mxu1  ;;  %9422 = vmatprep.mubr.msk.bf16.mxu0 %vm545_vm2, %v5845_v13  ;;  %10438 = vmatprep.subr.msk.bf16.mxu1 %vm594_vm0, %v12546_v44  ;;  %14700 = vst [vmem:[#allocation57_spill] sm:$0xff] %v12573_v62  ;;  %v3423_v13 = vrot.slane %v12213_v23, 5  ;;  %v3422_v42 = vsel %vm3392_vm6, %v3419_v61, %v3421_v46  ;;  %v5769_v61 = vrot.slane %v12221_v40, 6  ;;  %v3430_v23 = vsel %vm3392_vm6, %v3428_v49, %v3429_v48 }
 0x1c8   : > { %v12571_v2 = vpop.f32.mrb[9].mxu1  ;;  %10447 = vmatprep.subr.msk.bf16.mxu0 %vm594_vm0, %v12554_v8  ;;  %v5758_v50 = vsel %vm594_vm0, %v5756_v54, %v5757_v38  ;;  %v5763_v54 = vsel %vm594_vm0, %v5761_v36, %v5762_v35  ;;  %v5765_v38 = vsel %vm594_vm0, %v5762_v35, %v5764_v4  ;;  %v3432_v22 = vsel %vm3392_vm6, %v3429_v48, %v3431_v25 }
 0x1c9   : > { %v12580_v7 = vpop.f32.mrb[10].mxu1  ;;  %v3425_v26 = vsel %vm3392_vm6, %v3423_v13, %v3424_v20  ;;  %v12619_v13 = vpack.c.bf16 %v3422_v42, %v3420_v19  ;;  %v12621_v20 = vpack.c.bf16 %v5760_v45, %v5758_v50  ;;  %v3433_v40 = vrot.slane %v12261_v37, 5 }
 0x1ca   : > { %v12586_v30 = vpop.f32.mrb[11].mxu1  ;;  %v12623_v51 = vpack.c.bf16 %v3427_v59, %v3425_v26  ;;  %v3434_v36 = vrot.slane %v12265_v27, 5  ;;  %v3436_v35 = vrot.slane %v12269_v3, 5  ;;  %v12634_v19 = vpack.c.bf16 %v5765_v38, %v5763_v54 }
 0x1cb   : > { %v5768_v42 = vsel %vm594_vm0, %v5766_v15, %v5767_v33  ;;  %v5770_v50 = vsel %vm594_vm0, %v5767_v33, %v5769_v61  ;;  %v5771_v49 = vrot.slane %v12245_v57, 6  ;;  %v5772_v45 = vrot.slane %v12249_v28, 6 }
 0x1cc   : > { %9117 = vmatmul.mubr.msk.bf16.gmra.mrb[36].mxu1 %vm545_vm2, %v12558_v43  ;;  %14701 = vst [vmem:[#allocation58_spill] sm:$0xff] %v12623_v51  ;;  %v5774_v48 = vrot.slane %v12253_v0, 6  ;;  %v12643_v26 = vpack.c.bf16 %v3432_v22, %v3430_v23  ;;  %v12649_v59 = vpack.c.bf16 %v5770_v50, %v5768_v42  ;;  %v3435_v25 = vsel %vm3392_vm6, %v3433_v40, %v3434_v36 }
 0x1cd   : > { %9423 = vmatmul.mubr.msk.bf16.gmra.mrb[36].mxu0 %vm545_vm2, %v12560_v12  ;;  %9120 = vmatprep.mubr.msk.bf16.mxu1 %vm545_vm2, %v12573_v62  ;;  %v3437_v57 = vsel %vm3392_vm6, %v3434_v36, %v3436_v35  ;;  %v3438_v28 = vrot.slane %v12293_v24, 5  ;;  %v3439_v0 = vrot.slane %v12297_v60, 5  ;;  %v3441_v15 = vrot.slane %v12301_v10, 5 }
 0x1ce   : > { %9426 = vmatprep.mubr.msk.bf16.mxu0 %vm545_vm2, %v12588_v18  ;;  %v5776_v33 = vrot.slane %v12261_v37, 6  ;;  %v5773_v61 = vsel %vm594_vm0, %v5771_v49, %v5772_v45  ;;  %v5775_v54 = vsel %vm594_vm0, %v5772_v45, %v5774_v48  ;;  %v5777_v38 = vrot.slane %v12265_v27, 6 }
 0x1cf   : > { %v12613_v46 = vpop.f32.mrb[12].mxu1  ;;  %v5779_v23 = vrot.slane %v12269_v3, 6  ;;  %v12663_v40 = vpack.c.bf16 %v3437_v57, %v3435_v25  ;;  %v3443_v36 = vrot.slane %v12309_v1, 5  ;;  %v3444_v35 = vrot.slane %v12313_v53, 5 }
 0x1d0   : > { %v12617_v55 = vpop.f32.mrb[13].mxu1  ;;  %v3446_v42 = vrot.slane %v12317_v6, 5  ;;  %v5781_v49 = vrot.slane %v12293_v24, 6  ;;  %v5782_v45 = vrot.slane %v12297_v60, 6  ;;  %v5784_v27 = vrot.slane %v12301_v10, 6 }
 0x1d1   : > { %v12626_v62 = vpop.f32.mrb[14].mxu1  ;;  %v12677_v25 = vpack.c.bf16 %v5775_v54, %v5773_v61  ;;  %v3440_v57 = vsel %vm3392_vm6, %v3438_v28, %v3439_v0  ;;  %v5778_v24 = vsel %vm594_vm0, %v5776_v33, %v5777_v38  ;;  %v5780_v60 = vsel %vm594_vm0, %v5777_v38, %v5779_v23 }
 0x1d2   : > { %v12632_v4 = vpop.f32.mrb[15].mxu1  ;;  %v5783_v28 = vsel %vm594_vm0, %v5781_v49, %v5782_v45  ;;  %v3448_v33 = vrot.slane %v12341_v9, 5  ;;  %v3449_v61 = vrot.slane %v12345_v21, 5  ;;  %v3451_v54 = vrot.slane %v12349_v16, 5 }
 0x1d3   : > { %v5786_v38 = vrot.slane %v12309_v1, 6 }
 0x1d4   : > { %9121 = vmatmul.mubr.msk.bf16.gmra.mrb[40].mxu1 %vm545_vm2, %v12619_v13 }
 0x1d5   : > { %9427 = vmatmul.mubr.msk.bf16.gmra.mrb[40].mxu0 %vm545_vm2, %v12621_v20  ;;  %9124 = vmatprep.mubr.msk.bf16.mxu1 %vm545_vm2, %v12623_v51 }
 0x1d6   : > { %9430 = vmatprep.mubr.msk.bf16.mxu0 %vm545_vm2, %v12634_v19 }
 0x1d8   : > { %v9012_v22 = vpop.f32.mrb[0].mxu0 }
 0x1d9   : > { %v12669_v50 = vadd.f32 %v9012_v22, %v12471_v41  ;;  %v2447_v37 = vpop.f32.mrb[1].mxu0  ;;  %v3442_v22 = vsel %vm3392_vm6, %v3439_v0, %v3441_v15  ;;  %v5785_v0 = vsel %vm594_vm0, %v5782_v45, %v5784_v27  ;;  %v12703_v15 = vpack.c.bf16 %v5780_v60, %v5778_v24 }
 0x1da   : > { %v12675_v3 = vadd.f32 %v2447_v37, %v12478_v56  ;;  %v9013_v48 = vpop.f32.mrb[2].mxu0  ;;  %v3445_v56 = vsel %vm3392_vm6, %v3443_v36, %v3444_v35  ;;  %v5789_v37 = vrot.slane %v12317_v6, 6  ;;  %v3453_v27 = vrot.slane %v12357_v47, 5 }
 0x1db   : > { %14702 = vst [vmem:[#allocation59_spill] sm:$0xff] %v12669_v50  ;;  %v12681_v51 = vadd.f32 %v9013_v48, %v12484_v11  ;;  %v2450_v41 = vpop.f32.mrb[3].mxu0  ;;  %v3447_v11 = vsel %vm3392_vm6, %v3444_v35, %v3446_v42  ;;  %v12711_v35 = vpack.c.bf16 %v5785_v0, %v5783_v28  ;;  %v5787_v42 = vrot.slane %v12313_v53, 6 }
 0x1dc   : > { %14703 = vst [vmem:[#allocation60_spill] sm:$0xff] %v12675_v3  ;;  %v12687_v10 = vadd.f32 %v2450_v41, %v12492_v31  ;;  %9125 = vmatmul.mubr.msk.bf16.gmra.mrb[44].mxu1 %vm545_vm2, %v12643_v26  ;;  %v12701_v31 = vpack.c.bf16 %v3442_v22, %v3440_v57  ;;  %v12709_v36 = vpack.c.bf16 %v3447_v11, %v3445_v56  ;;  %v3454_v48 = vrot.slane %v12361_v39, 5  ;;  %v12986_v3 = vld [vmem:[%s11099_s9 + $0x1b0] sm:$0xff] }
 0x1dd   : > { %14704 = vst [vmem:[#allocation61_spill] sm:$0xff] %v12681_v51  ;;  %9431 = vmatmul.mubr.msk.bf16.gmra.mrb[44].mxu0 %vm545_vm2, %v12649_v59  ;;  %9128 = vmatprep.mubr.msk.bf16.mxu1 %vm545_vm2, %v12663_v40  ;;  %v3456_v57 = vrot.slane %v12365_v29, 5  ;;  %v5791_v22 = vrot.slane %v12341_v9, 6  ;;  %v5792_v53 = vrot.slane %v12345_v21, 6  ;;  %v5794_v6 = vrot.slane %v12349_v16, 6 }
 0x1de   : > { %14705 = vst [vmem:[#allocation62_spill] sm:$0xff] %v12687_v10  ;;  %9434 = vmatprep.mubr.msk.bf16.mxu0 %vm545_vm2, %v12677_v25  ;;  %v3450_v60 = vsel %vm3392_vm6, %v3448_v33, %v3449_v61  ;;  %v5788_v9 = vsel %vm594_vm0, %v5786_v38, %v5787_v42  ;;  %v5790_v21 = vsel %vm594_vm0, %v5787_v42, %v5789_v37  ;;  %v14711_v33 = vld [vmem:[#allocation42_spill] sm:$0xff]  ;;  %v14714_v37 = vld [vmem:[#allocation44_spill] sm:$0xff]  ;;  %v3772_v50 = vrot.slane %v12986_v3, 1 }
 0x1df   : > { %v3455_v16 = vsel %vm3392_vm6, %v3453_v27, %v3454_v48  ;;  %v5795_v11 = vsel %vm594_vm0, %v5792_v53, %v5794_v6  ;;  %v12751_v0 = vpack.c.bf16 %v5790_v21, %v5788_v9  ;;  %v5796_v27 = vrot.slane %v12357_v47, 6  ;;  %v14719_v21 = vld [vmem:[#allocation47_spill] sm:$0xff] }
 0x1e0   : > { %v9016_v23 = vpop.f32.mrb[4].mxu0  ;;  %v3466_v47 = vrot.slane %v14719_v21, 5 }
 0x1e1   : > { %v12716_v49 = vadd.f32 %v9016_v23, %v12515_v52  ;;  %v2463_v45 = vpop.f32.mrb[5].mxu0  ;;  %v14713_v23 = vld [vmem:[#allocation43_spill] sm:$0xff] }
 0x1e2   : > { %v12722_v1 = vadd.f32 %v2463_v45, %v12520_v58  ;;  %v9017_v41 = vpop.f32.mrb[6].mxu0  ;;  %v3452_v58 = vsel %vm3392_vm6, %v3449_v61, %v3451_v54  ;;  %v3458_v61 = vrot.slane %v14711_v33, 5  ;;  %v3459_v42 = vrot.slane %v14713_v23, 5 }
 0x1e3   : > { %14706 = vst [vmem:[#allocation63_spill] sm:$0xff] %v12716_v49  ;;  %v12728_v52 = vadd.f32 %v9017_v41, %v12526_v34  ;;  %v2466_v24 = vpop.f32.mrb[7].mxu0  ;;  %v3457_v34 = vsel %vm3392_vm6, %v3454_v48, %v3456_v57  ;;  %v12749_v28 = vpack.c.bf16 %v3452_v58, %v3450_v60  ;;  %v3461_v45 = vrot.slane %v14714_v37, 5  ;;  %v14718_v58 = vld [vmem:[#allocation46_spill] sm:$0xff] }
 0x1e4   : > { %14707 = vst [vmem:[#allocation64_spill] sm:$0xff] %v12722_v1  ;;  %v12732_v56 = vadd.f32 %v2466_v24, %v12533_v5  ;;  %9129 = vmatmul.mubr.msk.bf16.gmra.mrb[48].mxu1 %vm545_vm2, %v12701_v31  ;;  %v5793_v5 = vsel %vm594_vm0, %v5791_v22, %v5792_v53  ;;  %v12754_v38 = vpack.c.bf16 %v3457_v34, %v3455_v16  ;;  %v5797_v22 = vrot.slane %v12361_v39, 6 }
 0x1e5   : > { %14708 = vst [vmem:[#allocation65_spill] sm:$0xff] %v12728_v52  ;;  %9435 = vmatmul.mubr.msk.bf16.gmra.mrb[48].mxu0 %vm545_vm2, %v12703_v15  ;;  %9132 = vmatprep.mubr.msk.bf16.mxu1 %vm545_vm2, %v12709_v36  ;;  %14710 = vst [vmem:[#allocation67_spill] sm:$0xff] %v12749_v28  ;;  %v12762_v41 = vpack.c.bf16 %v5795_v11, %v5793_v5  ;;  %v5799_v53 = vrot.slane %v12365_v29, 6  ;;  %v3463_v60 = vrot.slane %v12405_v63, 5  ;;  %v3464_v9 = vrot.slane %v14718_v58, 5  ;;  %v14773_v52 = vld [vmem:[#allocation53_spill] sm:$0xff] }
 0x1e6   : > { %14709 = vst [vmem:[#allocation66_spill] sm:$0xff] %v12732_v56  ;;  %9438 = vmatprep.mubr.msk.bf16.mxu0 %vm545_vm2, %v12711_v35  ;;  %14712 = vst [vmem:[#allocation42_spill] sm:$0xff] %v12754_v38  ;;  %v5801_v34 = vrot.slane %v14711_v33, 6  ;;  %v5802_v39 = vrot.slane %v14713_v23, 6  ;;  %v5804_v29 = vrot.slane %v14714_v37, 6  ;;  %v3460_v5 = vsel %vm3392_vm6, %v3458_v61, %v3459_v42  ;;  %v14772_v56 = vld [vmem:[#allocation54_spill] sm:$0xff] }
 0x1e7   : > { %14716 = vst [vmem:[#allocation44_spill] sm:$0xff] %v12762_v41  ;;  %v5798_v11 = vsel %vm594_vm0, %v5796_v27, %v5797_v22  ;;  %v5800_v33 = vsel %vm594_vm0, %v5797_v22, %v5799_v53  ;;  %v14724_v27 = vld [vmem:[#allocation50_spill] sm:$0xff] }
 0x1e8   : > { %v9020_v54 = vpop.f32.mrb[8].mxu0  ;;  %v5803_v61 = vsel %vm594_vm0, %v5801_v34, %v5802_v39  ;;  %v5805_v23 = vsel %vm594_vm0, %v5802_v39, %v5804_v29  ;;  %v3469_v22 = vrot.slane %v14724_v27, 5  ;;  %v5806_v34 = vrot.slane %v12405_v63, 6 }
 0x1e9   : > { %v12760_v48 = vadd.f32 %v9020_v54, %v12562_v17  ;;  %v2479_v57 = vpop.f32.mrb[9].mxu0  ;;  %v3467_v54 = vsel %vm3392_vm6, %v3464_v9, %v3466_v47 }
 0x1ea   : > { %v12767_v6 = vadd.f32 %v2479_v57, %v12571_v2  ;;  %v9021_v24 = vpop.f32.mrb[10].mxu0 }
 0x1eb   : > { %14715 = vst [vmem:[#allocation43_spill] sm:$0xff] %v12760_v48  ;;  %v12773_v17 = vadd.f32 %v9021_v24, %v12580_v7  ;;  %v2482_v16 = vpop.f32.mrb[11].mxu0  ;;  %v3462_v7 = vsel %vm3392_vm6, %v3459_v42, %v3461_v45  ;;  %v12799_v24 = vpack.c.bf16 %v5800_v33, %v5798_v11  ;;  %v14723_v42 = vld [vmem:[#allocation49_spill] sm:$0xff]  ;;  %v5809_v11 = vrot.slane %v14719_v21, 6  ;;  %v14771_v48 = vld [vmem:[#allocation48_spill] sm:$0xff] }
 0x1ec   : > { %14717 = vst [vmem:[#allocation68_spill] sm:$0xff] %v12767_v6  ;;  %v12779_v2 = vadd.f32 %v2482_v16, %v12586_v30  ;;  %9133 = vmatmul.mubr.msk.bf16.gmra.mrb[52].mxu1 %vm545_vm2, %v12749_v28  ;;  %v3465_v30 = vsel %vm3392_vm6, %v3463_v60, %v3464_v9  ;;  %v12797_v57 = vpack.c.bf16 %v3462_v7, %v3460_v5  ;;  %v3468_v45 = vrot.slane %v14723_v42, 5  ;;  %v14727_v9 = vld [vmem:[#allocation51_spill] sm:$0xff] }
 0x1ed   : > { %14720 = vst [vmem:[#allocation46_spill] sm:$0xff] %v12773_v17  ;;  %9439 = vmatmul.mubr.msk.bf16.gmra.mrb[52].mxu0 %vm545_vm2, %v12751_v0  ;;  %9136 = vmatprep.mubr.msk.bf16.mxu1 %vm545_vm2, %v12754_v38  ;;  %v12806_v60 = vpack.c.bf16 %v3467_v54, %v3465_v30  ;;  %v3471_v47 = vrot.slane %v14727_v9, 5  ;;  %v12813_v5 = vpack.c.bf16 %v5805_v23, %v5803_v61  ;;  %v5807_v7 = vrot.slane %v14718_v58, 6  ;;  %v12966_v17 = vld [vmem:[%s11099_s9 + $0x1a8] sm:$0x3f] }
 0x1ee   : > { %14721 = vst [vmem:[#allocation47_spill] sm:$0xff] %v12779_v2  ;;  %9442 = vmatprep.mubr.msk.bf16.mxu0 %vm545_vm2, %v12762_v41  ;;  %14722 = vst [vmem:[#allocation69_spill] sm:$0xff] %v12797_v57  ;;  %v3470_v63 = vsel %vm3392_vm6, %v3468_v45, %v3469_v22  ;;  %v3770_v6 = vrot.slane %v12966_v17, 1  ;;  %v12981_v10 = vpack.c.bf16 %v14724_v27, %v14723_v42 }
 0x1ef   : > { %14726 = vst [vmem:[#allocation50_spill] sm:$0xff] %v12806_v60  ;;  %14729 = vst [vmem:[#allocation70_spill] sm:$0xff] %v12813_v5 }
 0x1f0   : > { %v9024_v37 = vpop.f32.mrb[12].mxu0 }
 0x1f1   : > { %v12804_v53 = vadd.f32 %v9024_v37, %v12613_v46  ;;  %v2495_v16 = vpop.f32.mrb[13].mxu0 }
 0x1f2   : > { %v12811_v39 = vadd.f32 %v2495_v16, %v12617_v55  ;;  %v9025_v29 = vpop.f32.mrb[14].mxu0  ;;  %v3472_v55 = vsel %vm3392_vm6, %v3469_v22, %v3471_v47 }
 0x1f3   : > { %14725 = vst [vmem:[#allocation49_spill] sm:$0xff] %v12804_v53  ;;  %v12818_v46 = vadd.f32 %v9025_v29, %v12626_v62  ;;  %v2498_v33 = vpop.f32.mrb[15].mxu0  ;;  %v5808_v62 = vsel %vm594_vm0, %v5806_v34, %v5807_v7  ;;  %v12835_v61 = vpack.c.bf16 %v3472_v55, %v3470_v63  ;;  %v12844_v34 = vld [vmem:[%s14417_s2] ss:$0 sm:$0xff]  ;;  %v14757_v53 = vld [vmem:[#allocation27_spill] sm:$0xff] }
 0x1f4   : > { %14728 = vst [vmem:[#allocation51_spill] sm:$0xff] %v12811_v39  ;;  %v12821_v30 = vadd.f32 %v2498_v33, %v12632_v4  ;;  %9137 = vmatmul.mubr.msk.bf16.gmra.mrb[56].mxu1 %vm545_vm2, %v12797_v57  ;;  %v5810_v4 = vsel %vm594_vm0, %v5807_v7, %v5809_v11  ;;  %14733 = vst [vmem:[#allocation74_spill] sm:$0xff] %v12844_v34 }
 0x1f5   : > { %14730 = vst [vmem:[#allocation71_spill] sm:$0xff] %v12818_v46  ;;  %9443 = vmatmul.mubr.msk.bf16.gmra.mrb[56].mxu0 %vm545_vm2, %v12799_v24  ;;  %9140 = vmatprep.mubr.msk.bf16.mxu1 %vm545_vm2, %v12806_v60  ;;  %v12839_v29 = vpack.c.bf16 %v5810_v4, %v5808_v62  ;;  %v14736_v62 = vld [vmem:[#allocation13_spill] sm:$0xff] }
 0x1f6   : > { %14731 = vst [vmem:[#allocation72_spill] sm:$0xff] %v12821_v30  ;;  %9446 = vmatprep.mubr.msk.bf16.mxu0 %vm545_vm2, %v12813_v5 }
 0x1f7   : > { %v8892_v58 = vpop.f32.mrb[16].mxu1 }
 0x1f8   : > { %v9028_v21 = vpop.f32.mrb[16].mxu0  ;;  %v1672_v54 = vpop.f32.mrb[17].mxu1 }
 0x1f9   : > { %v12837_v23 = vadd.f32 %v9028_v21, %v8892_v58  ;;  %v2511_v37 = vpop.f32.mrb[17].mxu0  ;;  %v8893_v16 = vpop.f32.mrb[18].mxu1  ;;  %v14738_v58 = vld [vmem:[#allocation15_spill] sm:$0xff] }
 0x1fa   : > { %v9673_v45 = vadd.f32 %v2511_v37, %v1672_v54  ;;  %v9029_v22 = vpop.f32.mrb[18].mxu0  ;;  %v1675_v47 = vpop.f32.mrb[19].mxu1 }
 0x1fb   : > { %14732 = vst [vmem:[#allocation73_spill] sm:$0xff] %v12837_v23  ;;  %v9674_v7 = vadd.f32 %v9029_v22, %v8893_v16  ;;  %v2514_v11 = vpop.f32.mrb[19].mxu0  ;;  %v14749_v23 = vld [vmem:[#allocation20_spill] sm:$0xff] }
 0x1fc   : > { %v12847_v33 = vadd.f32 %v9673_v45, %v12844_v34  ;;  %v9675_v63 = vadd.f32 %v2514_v11, %v1675_v47  ;;  %9141 = vmatmul.mubr.msk.bf16.gmra.mrb[60].mxu1 %vm545_vm2, %v12835_v61 }
 0x1fd   : > { %v12852_v55 = vadd.f32 %v9674_v7, %v12844_v34  ;;  %9447 = vmatmul.mubr.msk.bf16.gmra.mrb[60].mxu0 %vm545_vm2, %v12839_v29  ;;  %9146 = vmatprep.mubr.msk.bf16.mxu1 %vm545_vm2, %v14736_v62 }
 0x1fe   : > { %14734 = vst [vmem:[#allocation75_spill] sm:$0xff] %v12847_v33  ;;  %v12859_v4 = vadd.f32 %v9675_v63, %v12844_v34  ;;  %9452 = vmatprep.mubr.msk.bf16.mxu0 %vm545_vm2, %v14738_v58  ;;  %v6318_v58 = vsel %vm594_vm0, %v12554_v8, 0  ;;  %v12888_v8 = vld [vmem:[%s14416_s1 + $0x2e] sm:$0x3] }
 0x1ff   : > { %14735 = vst [vmem:[#allocation76_spill] sm:$0xff] %v12852_v55  ;;  %v8896_v21 = vpop.f32.mrb[20].mxu1  ;;  %v3990_v55 = vsel %vm594_vm0, %v12546_v44, 0 }
 0x200   : > { %14737 = vst [vmem:[#allocation13_spill] sm:$0xff] %v12859_v4  ;;  %v9032_v54 = vpop.f32.mrb[20].mxu0  ;;  %v1688_v37 = vpop.f32.mrb[21].mxu1 }
 0x201   : > { %v9676_v16 = vadd.f32 %v9032_v54, %v8896_v21  ;;  %v2527_v45 = vpop.f32.mrb[21].mxu0  ;;  %v8897_v22 = vpop.f32.mrb[22].mxu1  ;;  %v14741_v54 = vld [vmem:[#allocation14_spill] sm:$0xff] }
 0x202   : > { %v9677_v47 = vadd.f32 %v2527_v45, %v1688_v37  ;;  %v9033_v7 = vpop.f32.mrb[22].mxu0  ;;  %v1691_v11 = vpop.f32.mrb[23].mxu1  ;;  %v12878_v37 = vld [vmem:[%s14416_s1 + $0x1c] sm:$0x3] }
 0x203   : > { %v12866_v62 = vadd.f32 %v9676_v16, %v12844_v34  ;;  %v9678_v63 = vadd.f32 %v9033_v7, %v8897_v22  ;;  %v2530_v4 = vpop.f32.mrb[23].mxu0  ;;  %v14743_v16 = vld [vmem:[#allocation17_spill] sm:$0xff]  ;;  %v14745_v45 = vld [vmem:[#allocation16_spill] sm:$0xff] }
 0x204   : > { %v12871_v33 = vadd.f32 %v9677_v47, %v12844_v34  ;;  %v9679_v21 = vadd.f32 %v2530_v4, %v1691_v11  ;;  %9147 = vmatmul.mubr.msk.bf16.vlgmr.msra.gmra.mrb[32].mxu1 %vm545_vm2, %v14741_v54  ;;  %v14746_v47 = vld [vmem:[#allocation21_spill] sm:$0xff] }
 0x205   : > { %14739 = vst [vmem:[#allocation15_spill] sm:$0xff] %v12866_v62  ;;  %v12881_v44 = vadd.f32 %v9678_v63, %v12844_v34  ;;  %9179 = vmatpush3.bf16.msra.mxu1 %v3990_v55  ;;  %9453 = vmatmul.mubr.msk.bf16.vlgmr.msra.gmra.mrb[32].mxu0 %vm545_vm2, %v14743_v16 }
 0x206   : > { %14740 = vst [vmem:[#allocation77_spill] sm:$0xff] %v12871_v33  ;;  %v12891_v4 = vadd.f32 %v9679_v21, %v12844_v34  ;;  %9485 = vmatpush3.bf16.msra.mxu0 %v6318_v58  ;;  %9150 = vmatprep.mubr.msk.bf16.mxu1 %vm545_vm2, %v14745_v45 }
 0x207   : > { %14742 = vst [vmem:[#allocation14_spill] sm:$0xff] %v12881_v44  ;;  %v8900_v22 = vpop.f32.mrb[24].mxu1  ;;  %9456 = vmatprep.mubr.msk.bf16.mxu0 %vm545_vm2, %v14746_v47  ;;  %10439 = vmatprep.subr.msk.bf16.mxu1 %vm594_vm0, %v12878_v37 }
 0x208   : > { %14744 = vst [vmem:[#allocation17_spill] sm:$0xff] %v12891_v4  ;;  %v9036_v55 = vpop.f32.mrb[24].mxu0  ;;  %v1704_v7 = vpop.f32.mrb[25].mxu1  ;;  %10448 = vmatprep.subr.msk.bf16.mxu0 %vm594_vm0, %v12888_v8 }
 0x209   : > { %v9680_v11 = vadd.f32 %v9036_v55, %v8900_v22  ;;  %v2543_v63 = vpop.f32.mrb[25].mxu0  ;;  %v8901_v21 = vpop.f32.mrb[26].mxu1  ;;  %v14751_v22 = vld [vmem:[#allocation25_spill] sm:$0xff]  ;;  %v14752_v55 = vld [vmem:[#allocation30_spill] sm:$0xff] }
 0x20a   : > { %v9681_v54 = vadd.f32 %v2543_v63, %v1704_v7  ;;  %v9037_v58 = vpop.f32.mrb[26].mxu0  ;;  %v1707_v16 = vpop.f32.mrb[27].mxu1 }
 0x20b   : > { %v12902_v4 = vadd.f32 %v9680_v11, %v12844_v34  ;;  %v9682_v44 = vadd.f32 %v9037_v58, %v8901_v21  ;;  %v2546_v33 = vpop.f32.mrb[27].mxu0  ;;  %v14754_v11 = vld [vmem:[#allocation5_spill] sm:$0xff] }
 0x20c   : > { %v12905_v47 = vadd.f32 %v9681_v54, %v12844_v34  ;;  %v9683_v62 = vadd.f32 %v2546_v33, %v1707_v16  ;;  %9151 = vmatmul.mubr.msk.bf16.gmra.mrb[36].mxu1 %vm545_vm2, %v14749_v23 }
 0x20d   : > { %14747 = vst [vmem:[#allocation16_spill] sm:$0xff] %v12902_v4  ;;  %v12910_v30 = vadd.f32 %v9682_v44, %v12844_v34  ;;  %9457 = vmatmul.mubr.msk.bf16.gmra.mrb[36].mxu0 %vm545_vm2, %v14751_v22  ;;  %9154 = vmatprep.mubr.msk.bf16.mxu1 %vm545_vm2, %v14752_v55 }
 0x20e   : > { %14748 = vst [vmem:[#allocation21_spill] sm:$0xff] %v12905_v47  ;;  %v12917_v7 = vadd.f32 %v9683_v62, %v12844_v34  ;;  %9460 = vmatprep.mubr.msk.bf16.mxu0 %vm545_vm2, %v14754_v11 }
 0x20f   : > { %14750 = vst [vmem:[#allocation20_spill] sm:$0xff] %v12910_v30  ;;  %v8904_v63 = vpop.f32.mrb[28].mxu1 }
 0x210   : > { %14753 = vst [vmem:[#allocation25_spill] sm:$0xff] %v12917_v7  ;;  %v9040_v33 = vpop.f32.mrb[28].mxu0  ;;  %v1720_v21 = vpop.f32.mrb[29].mxu1 }
 0x211   : > { %v9684_v54 = vadd.f32 %v9040_v33, %v8904_v63  ;;  %v2559_v58 = vpop.f32.mrb[29].mxu0  ;;  %v8905_v16 = vpop.f32.mrb[30].mxu1  ;;  %v14759_v33 = vld [vmem:[#allocation32_spill] sm:$0xff] }
 0x212   : > { %v9685_v44 = vadd.f32 %v2559_v58, %v1720_v21  ;;  %v9041_v30 = vpop.f32.mrb[30].mxu0  ;;  %v1723_v47 = vpop.f32.mrb[31].mxu1  ;;  %v14760_v21 = vld [vmem:[#allocation29_spill] sm:$0xff]  ;;  %v14766_v58 = vld [vmem:[#allocation40_spill] sm:$0xff] }
 0x213   : > { %v12922_v4 = vadd.f32 %v9684_v54, %v12844_v34  ;;  %v9686_v46 = vadd.f32 %v9041_v30, %v8905_v16  ;;  %v2562_v39 = vpop.f32.mrb[31].mxu0  ;;  %v14762_v54 = vld [vmem:[#allocation6_spill] sm:$0xff]  ;;  %v14767_v16 = vld [vmem:[#allocation39_spill] sm:$0xff] }
 0x214   : > { %v12925_v62 = vadd.f32 %v9685_v44, %v12844_v34  ;;  %v9687_v7 = vadd.f32 %v2562_v39, %v1723_v47  ;;  %9155 = vmatmul.mubr.msk.bf16.gmra.mrb[40].mxu1 %vm545_vm2, %v14757_v53  ;;  %v14763_v39 = vld [vmem:[#allocation34_spill] sm:$0xff]  ;;  %v14769_v44 = vld [vmem:[#allocation41_spill] sm:$0xff] }
 0x215   : > { %14755 = vst [vmem:[#allocation30_spill] sm:$0xff] %v12922_v4  ;;  %v12930_v63 = vadd.f32 %v9686_v46, %v12844_v34  ;;  %9461 = vmatmul.mubr.msk.bf16.gmra.mrb[40].mxu0 %vm545_vm2, %v14759_v33  ;;  %9158 = vmatprep.mubr.msk.bf16.mxu1 %vm545_vm2, %v14760_v21  ;;  %v14764_v47 = vld [vmem:[#allocation38_spill] sm:$0xff]  ;;  %v14765_v46 = vld [vmem:[#allocation7_spill] sm:$0xff]  ;;  %v12962_v4 = vld [vmem:[%s11099_s9 + $0x1a0] sm:$0xff] }
 0x216   : > { %14756 = vst [vmem:[#allocation5_spill] sm:$0xff] %v12925_v62  ;;  %v12937_v30 = vadd.f32 %v9687_v7, %v12844_v34  ;;  %9464 = vmatprep.mubr.msk.bf16.mxu0 %vm545_vm2, %v14762_v54  ;;  %v14768_v7 = vld [vmem:[#allocation45_spill] sm:$0xff]  ;;  %v3768_v2 = vrot.slane %v12962_v4, 1  ;;  %v12990_v34 = vld [vmem:[%s11099_s9 + $0x1b8] sm:$0xff] }
 0x217   : > { %14758 = vst [vmem:[#allocation27_spill] sm:$0xff] %v12930_v63  ;;  %v12958_v63 = vld [vmem:[%s11099_s9 + $0x198] sm:$0xff] }
 0x218   : > { %14761 = vst [vmem:[#allocation32_spill] sm:$0xff] %v12937_v30  ;;  %v14770_v30 = vld [vmem:[#allocation52_spill] sm:$0xff]  ;;  %v3767_v62 = vrot.slane %v12958_v63, 1  ;;  %v3771_v49 = vsel %vm2872_vm5, %v3768_v2, %v3770_v6  ;;  %v12999_v6 = vpack.c.bf16 %v12962_v4, %v12958_v63 }
 0x21a   : > { %v3769_v1 = vsel %vm2872_vm5, %v3767_v62, %v3768_v2  ;;  %v14775_v2 = vld [vmem:[#allocation55_spill] sm:$0xff] }
 0x21b   : > { %v12983_v51 = vpack.c.bf16 %v3771_v49, %v3769_v1 }
 0x21c   : > { %9159 = vmatmul.mubr.msk.bf16.gmra.mrb[44].mxu1 %vm545_vm2, %v14763_v39 }
 0x21d   : > { %9465 = vmatmul.mubr.msk.bf16.gmra.mrb[44].mxu0 %vm545_vm2, %v14764_v47  ;;  %9162 = vmatprep.mubr.msk.bf16.mxu1 %vm545_vm2, %v14765_v46  ;;  %14774 = vst [vmem:[#allocation29_spill] sm:$0xff] %v12983_v51 }
 0x21e   : > { %9468 = vmatprep.mubr.msk.bf16.mxu0 %vm545_vm2, %v14766_v58 }
 0x224   : > { %9163 = vmatmul.mubr.msk.bf16.gmra.mrb[48].mxu1 %vm545_vm2, %v14767_v16 }
 0x225   : > { %9469 = vmatmul.mubr.msk.bf16.gmra.mrb[48].mxu0 %vm545_vm2, %v14768_v7  ;;  %9166 = vmatprep.mubr.msk.bf16.mxu1 %vm545_vm2, %v14769_v44 }
 0x226   : > { %9472 = vmatprep.mubr.msk.bf16.mxu0 %vm545_vm2, %v14770_v30 }
 0x22c   : > { %9167 = vmatmul.mubr.msk.bf16.gmra.mrb[52].mxu1 %vm545_vm2, %v14771_v48  ;;  %v12994_v48 = vld [vmem:[%s11099_s9 + $0x1c0] sm:$0x3f] }
 0x22d   : > { %9473 = vmatmul.mubr.msk.bf16.gmra.mrb[52].mxu0 %vm545_vm2, %v14772_v56  ;;  %9170 = vmatprep.mubr.msk.bf16.mxu1 %vm545_vm2, %v14773_v52  ;;  %v3773_v52 = vrot.slane %v12990_v34, 1  ;;  %v3775_v62 = vrot.slane %v12994_v48, 1  ;;  %v13015_v56 = vpack.c.bf16 %v12990_v34, %v12986_v3 }
 0x22e   : > { %9476 = vmatprep.mubr.msk.bf16.mxu0 %vm545_vm2, %v12488_v14 }
 0x22f   : > { %v3774_v49 = vsel %vm2872_vm5, %v3772_v50, %v3773_v52  ;;  %v3776_v1 = vsel %vm2872_vm5, %v3773_v52, %v3775_v62  ;;  %v4210_v50 = vsel %vm594_vm0, %v12878_v37, 0  ;;  %v6549_v52 = vsel %vm594_vm0, %v12888_v8, 0  ;;  %v14777_v62 = vld [vmem:[#allocation10_spill] sm:$0xff]  ;;  %v14778_v37 = vld [vmem:[#allocation11_spill] sm:$0xff] }
 0x230   : > { %v13011_v14 = vpack.c.bf16 %v3776_v1, %v3774_v49  ;;  %v8063_v49 = vld [vmem:[%s14416_s1 + $0x1e] sm:$0x3]  ;;  %v14779_v8 = vld [vmem:[#allocation18_spill] sm:$0xff]  ;;  %v14780_v1 = vld [vmem:[#allocation19_spill] sm:$0xff] }
 0x234   : > { %9171 = vmatmul.mubr.msk.bf16.gmra.mrb[56].mxu1 %vm545_vm2, %v14775_v2 }
 0x235   : > { %9477 = vmatmul.mubr.msk.bf16.gmra.mrb[56].mxu0 %vm545_vm2, %v12981_v10  ;;  %9174 = vmatprep.mubr.msk.bf16.mxu1 %vm545_vm2, %v12983_v51  ;;  %v14776_v51 = vld [vmem:[#allocation8_spill] sm:$0xff] }
 0x236   : > { %9480 = vmatprep.mubr.msk.bf16.mxu0 %vm545_vm2, %v12999_v6 }
 0x23c   : > { %9175 = vmatmul.mubr.msk.bf16.gmra.mrb[60].mxu1 %vm545_vm2, %v13011_v14 }
 0x23d   : > { %9481 = vmatmul.mubr.msk.bf16.gmra.mrb[60].mxu0 %vm545_vm2, %v13015_v56  ;;  %9180 = vmatprep.mubr.msk.bf16.mxu1 %vm545_vm2, %v14776_v51 }
 0x23e   : > { %9486 = vmatprep.mubr.msk.bf16.mxu0 %vm545_vm2, %v14776_v51  ;;  %v8218_v51 = vld [vmem:[%s14416_s1 + $0x30] sm:$0x3] }
 0x244   : > { %9181 = vmatmul.mubr.msk.bf16.vlgmr.msra.gmra.mrb[32].mxu1 %vm545_vm2, %v14777_v62 }
 0x245   : > { %9213 = vmatpush3.bf16.msra.mxu1 %v4210_v50  ;;  %9487 = vmatmul.mubr.msk.bf16.vlgmr.msra.gmra.mrb[32].mxu0 %vm545_vm2, %v14777_v62  ;;  %v14781_v50 = vld [vmem:[#allocation22_spill] sm:$0xff]  ;;  %v14783_v62 = vld [vmem:[#allocation24_spill] sm:$0xff] }
 0x246   : > { %9519 = vmatpush3.bf16.msra.mxu0 %v6549_v52  ;;  %9184 = vmatprep.mubr.msk.bf16.mxu1 %vm545_vm2, %v14778_v37  ;;  %v14782_v52 = vld [vmem:[#allocation23_spill] sm:$0xff] }
 0x247   : > { %9490 = vmatprep.mubr.msk.bf16.mxu0 %vm545_vm2, %v14778_v37  ;;  %10440 = vmatprep.subr.msk.bf16.mxu1 %vm594_vm0, %v8063_v49 }
 0x248   : > { %10449 = vmatprep.subr.msk.bf16.mxu0 %vm594_vm0, %v8218_v51 }
 0x24c   : > { %9185 = vmatmul.mubr.msk.bf16.gmra.mrb[36].mxu1 %vm545_vm2, %v14779_v8 }
 0x24d   : > { %9491 = vmatmul.mubr.msk.bf16.gmra.mrb[36].mxu0 %vm545_vm2, %v14779_v8  ;;  %9188 = vmatprep.mubr.msk.bf16.mxu1 %vm545_vm2, %v14780_v1  ;;  %v14784_v8 = vld [vmem:[#allocation26_spill] sm:$0xff] }
 0x24e   : > { %9494 = vmatprep.mubr.msk.bf16.mxu0 %vm545_vm2, %v14780_v1  ;;  %v14785_v1 = vld [vmem:[#allocation28_spill] sm:$0xff] }
 0x254   : > { %9189 = vmatmul.mubr.msk.bf16.gmra.mrb[40].mxu1 %vm545_vm2, %v14781_v50 }
 0x255   : > { %9495 = vmatmul.mubr.msk.bf16.gmra.mrb[40].mxu0 %vm545_vm2, %v14781_v50  ;;  %9192 = vmatprep.mubr.msk.bf16.mxu1 %vm545_vm2, %v14782_v52  ;;  %v14786_v50 = vld [vmem:[#allocation31_spill] sm:$0xff] }
 0x256   : > { %9498 = vmatprep.mubr.msk.bf16.mxu0 %vm545_vm2, %v14782_v52  ;;  %v14787_v52 = vld [vmem:[#allocation33_spill] sm:$0xff] }
 0x25c   : > { %9193 = vmatmul.mubr.msk.bf16.gmra.mrb[44].mxu1 %vm545_vm2, %v14783_v62 }
 0x25d   : > { %9499 = vmatmul.mubr.msk.bf16.gmra.mrb[44].mxu0 %vm545_vm2, %v14783_v62  ;;  %9196 = vmatprep.mubr.msk.bf16.mxu1 %vm545_vm2, %v14784_v8  ;;  %v14788_v62 = vld [vmem:[#allocation35_spill] sm:$0xff] }
 0x25e   : > { %9502 = vmatprep.mubr.msk.bf16.mxu0 %vm545_vm2, %v14784_v8  ;;  %v14789_v8 = vld [vmem:[#allocation36_spill] sm:$0xff] }
 0x264   : > { %9197 = vmatmul.mubr.msk.bf16.gmra.mrb[48].mxu1 %vm545_vm2, %v14785_v1 }
 0x265   : > { %9503 = vmatmul.mubr.msk.bf16.gmra.mrb[48].mxu0 %vm545_vm2, %v14785_v1  ;;  %9200 = vmatprep.mubr.msk.bf16.mxu1 %vm545_vm2, %v14786_v50  ;;  %v14790_v1 = vld [vmem:[#allocation37_spill] sm:$0xff] }
 0x266   : > { %9506 = vmatprep.mubr.msk.bf16.mxu0 %vm545_vm2, %v14786_v50  ;;  %v14791_v50 = vld [vmem:[#allocation9_spill] sm:$0xff] }
 0x26c   : > { %9201 = vmatmul.mubr.msk.bf16.gmra.mrb[52].mxu1 %vm545_vm2, %v14787_v52 }
 0x26d   : > { %9507 = vmatmul.mubr.msk.bf16.gmra.mrb[52].mxu0 %vm545_vm2, %v14787_v52  ;;  %9204 = vmatprep.mubr.msk.bf16.mxu1 %vm545_vm2, %v14788_v62 }
 0x26e   : > { %9510 = vmatprep.mubr.msk.bf16.mxu0 %vm545_vm2, %v14788_v62  ;;  %v6759_v62 = vsel %vm594_vm0, %v8218_v51, 0  ;;  %v4185_v51 = vrot.slane %v12958_v63, 5 }
 0x274   : > { %9205 = vmatmul.mubr.msk.bf16.gmra.mrb[56].mxu1 %vm545_vm2, %v14789_v8 }
 0x275   : > { %9511 = vmatmul.mubr.msk.bf16.gmra.mrb[56].mxu0 %vm545_vm2, %v14789_v8  ;;  %9208 = vmatprep.mubr.msk.bf16.mxu1 %vm545_vm2, %v14790_v1  ;;  %v4433_v8 = vsel %vm594_vm0, %v8063_v49, 0  ;;  %v6516_v49 = vrot.slane %v14727_v9, 6 }
 0x276   : > { %9514 = vmatprep.mubr.msk.bf16.mxu0 %vm545_vm2, %v14790_v1  ;;  %v13108_v1 = vld [vmem:[%s14416_s1 + $0x20] sm:$0x3] }
 0x27c   : > { %9209 = vmatmul.mubr.msk.bf16.gmra.mrb[60].mxu1 %vm545_vm2, %v14791_v50 }
 0x27d   : > { %9515 = vmatmul.mubr.msk.bf16.gmra.mrb[60].mxu0 %vm545_vm2, %v14791_v50  ;;  %9214 = vmatprep.mubr.msk.bf16.mxu1 %vm545_vm2, %v12528_v32  ;;  %v13115_v32 = vld [vmem:[%s14416_s1 + $0x32] sm:$0x3] }
 0x27e   : > { %9520 = vmatprep.mubr.msk.bf16.mxu0 %vm545_vm2, %v12560_v12  ;;  %v14792_v12 = vld [vmem:[#allocation57_spill] sm:$0xff] }
 0x284   : > { %9215 = vmatmul.mubr.msk.bf16.vlgmr.msra.gmra.mrb[32].mxu1 %vm545_vm2, %v12558_v43  ;;  %v14793_v43 = vld [vmem:[#allocation58_spill] sm:$0xff] }
 0x285   : > { %9247 = vmatpush3.bf16.msra.mxu1 %v4433_v8  ;;  %9521 = vmatmul.mubr.msk.bf16.vlgmr.msra.gmra.mrb[32].mxu0 %vm545_vm2, %v12588_v18  ;;  %v6513_v18 = vrot.slane %v14723_v42, 6  ;;  %v4186_v8 = vrot.slane %v12962_v4, 5 }
 0x286   : > { %9553 = vmatpush3.bf16.msra.mxu0 %v6759_v62  ;;  %9218 = vmatprep.mubr.msk.bf16.mxu1 %vm545_vm2, %v14792_v12  ;;  %v4188_v62 = vrot.slane %v12966_v17, 5 }
 0x287   : > { %9524 = vmatprep.mubr.msk.bf16.mxu0 %vm545_vm2, %v12621_v20  ;;  %10441 = vmatprep.subr.msk.bf16.mxu1 %vm594_vm0, %v13108_v1  ;;  %v6514_v20 = vrot.slane %v14724_v27, 6  ;;  %v4187_v9 = vsel %vm3392_vm6, %v4185_v51, %v4186_v8  ;;  %v6523_v51 = vrot.slane %v12986_v3, 6 }
 0x288   : > { %10450 = vmatprep.subr.msk.bf16.mxu0 %vm594_vm0, %v13115_v32 }
 0x289   : > { %v6515_v42 = vsel %vm594_vm0, %v6513_v18, %v6514_v20  ;;  %v6517_v27 = vsel %vm594_vm0, %v6514_v20, %v6516_v49  ;;  %v4191_v18 = vrot.slane %v12990_v34, 5  ;;  %v4193_v20 = vrot.slane %v12994_v48, 5 }
 0x28c   : > { %9219 = vmatmul.mubr.msk.bf16.gmra.mrb[36].mxu1 %vm545_vm2, %v12619_v13 }
 0x28d   : > { %9525 = vmatmul.mubr.msk.bf16.gmra.mrb[36].mxu0 %vm545_vm2, %v12634_v19  ;;  %9222 = vmatprep.mubr.msk.bf16.mxu1 %vm545_vm2, %v14793_v43 }
 0x28e   : > { %9528 = vmatprep.mubr.msk.bf16.mxu0 %vm545_vm2, %v12649_v59 }
 0x294   : > { %9223 = vmatmul.mubr.msk.bf16.gmra.mrb[40].mxu1 %vm545_vm2, %v12643_v26 }
 0x295   : > { %9529 = vmatmul.mubr.msk.bf16.gmra.mrb[40].mxu0 %vm545_vm2, %v12677_v25  ;;  %9226 = vmatprep.mubr.msk.bf16.mxu1 %vm545_vm2, %v12663_v40 }
 0x296   : > { %9532 = vmatprep.mubr.msk.bf16.mxu0 %vm545_vm2, %v12703_v15 }
 0x29c   : > { %9227 = vmatmul.mubr.msk.bf16.gmra.mrb[44].mxu1 %vm545_vm2, %v12701_v31 }
 0x29d   : > { %9533 = vmatmul.mubr.msk.bf16.gmra.mrb[44].mxu0 %vm545_vm2, %v12711_v35  ;;  %9230 = vmatprep.mubr.msk.bf16.mxu1 %vm545_vm2, %v12709_v36 }
 0x29e   : > { %9536 = vmatprep.mubr.msk.bf16.mxu0 %vm545_vm2, %v12751_v0 }
 0x2a4   : > { %9231 = vmatmul.mubr.msk.bf16.gmra.mrb[48].mxu1 %vm545_vm2, %v12749_v28  ;;  %v6518_v28 = vrot.slane %v12958_v63, 6 }
 0x2a5   : > { %9537 = vmatmul.mubr.msk.bf16.gmra.mrb[48].mxu0 %vm545_vm2, %v12762_v41  ;;  %9234 = vmatprep.mubr.msk.bf16.mxu1 %vm545_vm2, %v12754_v38  ;;  %v6519_v41 = vrot.slane %v12962_v4, 6  ;;  %v6521_v38 = vrot.slane %v12966_v17, 6  ;;  %v4189_v17 = vsel %vm3392_vm6, %v4186_v8, %v4188_v62  ;;  %v6524_v8 = vrot.slane %v12990_v34, 6 }
 0x2a6   : > { %9540 = vmatprep.mubr.msk.bf16.mxu0 %vm545_vm2, %v12799_v24 }
 0x2a7   : > { %v6520_v4 = vsel %vm594_vm0, %v6518_v28, %v6519_v41  ;;  %v6522_v63 = vsel %vm594_vm0, %v6519_v41, %v6521_v38  ;;  %v6526_v28 = vrot.slane %v12994_v48, 6  ;;  %v4194_v41 = vsel %vm3392_vm6, %v4191_v18, %v4193_v20 }
 0x2a8   : > { %v13187_v49 = vpack.c.bf16 %v6522_v63, %v6520_v4  ;;  %v233_v4 = vld [vmem:[%s11099_s9 + $0x1f8] sm:$0xff]  ;;  %v234_v63 = vld [vmem:[%s11099_s9 + $0x200] sm:$0xff] }
 0x2a9   : > { %v6527_v48 = vsel %vm594_vm0, %v6524_v8, %v6526_v28  ;;  %v7176_v20 = vrot.slane %v233_v4, 6  ;;  %v235_v28 = vld [vmem:[%s11099_s9 + $0x208] sm:$0x3f] }
 0x2ac   : > { %9235 = vmatmul.mubr.msk.bf16.gmra.mrb[52].mxu1 %vm545_vm2, %v12797_v57  ;;  %v13180_v57 = vpack.c.bf16 %v6517_v27, %v6515_v42  ;;  %v6971_v42 = vsel %vm594_vm0, %v13115_v32, 0  ;;  %v13225_v27 = vld [vmem:[%s14416_s1 + $0x22] sm:$0x3] }
 0x2ad   : > { %9541 = vmatmul.mubr.msk.bf16.gmra.mrb[52].mxu0 %vm545_vm2, %v12813_v5  ;;  %9238 = vmatprep.mubr.msk.bf16.mxu1 %vm545_vm2, %v12806_v60  ;;  %v13182_v5 = vpack.c.bf16 %v4189_v17, %v4187_v9  ;;  %v4190_v60 = vrot.slane %v12986_v3, 5  ;;  %v6525_v3 = vsel %vm594_vm0, %v6523_v51, %v6524_v8  ;;  %v7177_v51 = vrot.slane %v234_v63, 6 }
 0x2ae   : > { %9544 = vmatprep.mubr.msk.bf16.mxu0 %vm545_vm2, %v12839_v29  ;;  %v13206_v62 = vpack.c.bf16 %v6527_v48, %v6525_v3  ;;  %v6746_v8 = vpack.c.bf16 %v234_v63, %v233_v4  ;;  %v14799_v3 = vld [vmem:[#allocation18_spill] sm:$0xff] }
 0x2af   : > { %v4192_v38 = vsel %vm3392_vm6, %v4190_v60, %v4191_v18  ;;  %v4642_v60 = vsel %vm594_vm0, %v13108_v1, 0 }
 0x2b0   : > { %v13204_v34 = vpack.c.bf16 %v4194_v41, %v4192_v38  ;;  %v7179_v38 = vrot.slane %v235_v28, 6 }
 0x2b2   : > { %v13330_v41 = vsel %vm594_vm0, %v7177_v51, %v7179_v38 }
 0x2b4   : > { %9239 = vmatmul.mubr.msk.bf16.gmra.mrb[56].mxu1 %vm545_vm2, %v12835_v61 }
 0x2b5   : > { %9545 = vmatmul.mubr.msk.bf16.gmra.mrb[56].mxu0 %vm545_vm2, %v13180_v57  ;;  %9242 = vmatprep.mubr.msk.bf16.mxu1 %vm545_vm2, %v13182_v5 }
 0x2b6   : > { %9548 = vmatprep.mubr.msk.bf16.mxu0 %vm545_vm2, %v13187_v49 }
 0x2bc   : > { %9243 = vmatmul.mubr.msk.bf16.gmra.mrb[60].mxu1 %vm545_vm2, %v13204_v34 }
 0x2bd   : > { %9549 = vmatmul.mubr.msk.bf16.gmra.mrb[60].mxu0 %vm545_vm2, %v13206_v62  ;;  %9248 = vmatprep.mubr.msk.bf16.mxu1 %vm545_vm2, %v14745_v45  ;;  %v13232_v45 = vld [vmem:[%s14416_s1 + $0x34] sm:$0x3] }
 0x2be   : > { %9554 = vmatprep.mubr.msk.bf16.mxu0 %vm545_vm2, %v14751_v22  ;;  %v14796_v22 = vld [vmem:[#allocation56_spill] sm:$0xff] }
 0x2c4   : > { %9249 = vmatmul.mubr.msk.bf16.vlgmr.msra.gmra.mrb[32].mxu1 %vm545_vm2, %v14749_v23  ;;  %v14795_v23 = vld [vmem:[#allocation48_spill] sm:$0xff] }
 0x2c5   : > { %9281 = vmatpush3.bf16.msra.mxu1 %v4642_v60  ;;  %9555 = vmatmul.mubr.msk.bf16.vlgmr.msra.gmra.mrb[32].mxu0 %vm545_vm2, %v14754_v11  ;;  %v13275_v11 = vld [vmem:[%s11099_s9 + $0x1c8] sm:$0xff]  ;;  %v4862_v60 = vsel %vm594_vm0, %v13225_v27, 0 }
 0x2c6   : > { %9587 = vmatpush3.bf16.msra.mxu0 %v6971_v42  ;;  %9252 = vmatprep.mubr.msk.bf16.mxu1 %vm545_vm2, %v14752_v55  ;;  %v14797_v55 = vld [vmem:[#allocation53_spill] sm:$0xff]  ;;  %v7202_v42 = vsel %vm594_vm0, %v13232_v45, 0 }
 0x2c7   : > { %9558 = vmatprep.mubr.msk.bf16.mxu0 %vm545_vm2, %v14759_v33  ;;  %10442 = vmatprep.subr.msk.bf16.mxu1 %vm594_vm0, %v13225_v27  ;;  %v4408_v33 = vrot.slane %v13275_v11, 1  ;;  %v14802_v27 = vld [vmem:[#allocation23_spill] sm:$0xff] }
 0x2c8   : > { %10451 = vmatprep.subr.msk.bf16.mxu0 %vm594_vm0, %v13232_v45  ;;  %v14803_v45 = vld [vmem:[#allocation24_spill] sm:$0xff] }
 0x2cc   : > { %9253 = vmatmul.mubr.msk.bf16.gmra.mrb[36].mxu1 %vm545_vm2, %v14757_v53  ;;  %v14794_v53 = vld [vmem:[#allocation54_spill] sm:$0xff] }
 0x2cd   : > { %9559 = vmatmul.mubr.msk.bf16.gmra.mrb[36].mxu0 %vm545_vm2, %v14762_v54  ;;  %9256 = vmatprep.mubr.msk.bf16.mxu1 %vm545_vm2, %v14760_v21  ;;  %v13279_v21 = vld [vmem:[%s11099_s9 + $0x1d0] sm:$0xff]  ;;  %v13283_v54 = vld [vmem:[%s11099_s9 + $0x1d8] sm:$0x3f] }
 0x2ce   : > { %9562 = vmatprep.mubr.msk.bf16.mxu0 %vm545_vm2, %v14764_v47  ;;  %v14798_v47 = vld [vmem:[#allocation29_spill] sm:$0xff] }
 0x2d4   : > { %9257 = vmatmul.mubr.msk.bf16.gmra.mrb[40].mxu1 %vm545_vm2, %v14763_v39  ;;  %v4411_v39 = vrot.slane %v13283_v54, 1 }
 0x2d5   : > { %9563 = vmatmul.mubr.msk.bf16.gmra.mrb[40].mxu0 %vm545_vm2, %v14766_v58  ;;  %9260 = vmatprep.mubr.msk.bf16.mxu1 %vm545_vm2, %v14765_v46  ;;  %v13297_v58 = vld [vmem:[%s11099_s9 + $0x1e0] sm:$0xff] }
 0x2d6   : > { %9566 = vmatprep.mubr.msk.bf16.mxu0 %vm545_vm2, %v14768_v7  ;;  %v13303_v7 = vld [vmem:[%s11099_s9 + $0x1f0] sm:$0x3f] }
 0x2d7   : > { %v4416_v1 = vrot.slane %v13303_v7, 1 }
 0x2dc   : > { %9261 = vmatmul.mubr.msk.bf16.gmra.mrb[44].mxu1 %vm545_vm2, %v14767_v16  ;;  %v13300_v16 = vld [vmem:[%s11099_s9 + $0x1e8] sm:$0xff]  ;;  %s10938_s9 = sshll.u32 %s10998_s5, 4  ;;  %s10939_s9 = int_to_ptr.vmem [resolvable:$false] %s10938_s9 }
 0x2dd   : > { %9567 = vmatmul.mubr.msk.bf16.gmra.mrb[44].mxu0 %vm545_vm2, %v14770_v30  ;;  %9264 = vmatprep.mubr.msk.bf16.mxu1 %vm545_vm2, %v14769_v44  ;;  %v4409_v30 = vrot.slane %v13279_v21, 1  ;;  %v6744_v44 = vpack.c.bf16 %v13279_v21, %v13275_v11  ;;  %v6745_v32 = vpack.c.bf16 %v13300_v16, %v13297_v58  ;;  %s10940_s6 = scalar_lea.vmem %s10939_s9, 8192  ;;  %p10941_p0 = scmp.lt.s32.totalorder %s14368_s27, %s10939_s9 }
 0x2de   : > { %9570 = vmatprep.mubr.msk.bf16.mxu0 %vm545_vm2, %v14794_v53  ;;  %v14801_v53 = vld [vmem:[#allocation22_spill] sm:$0xff]  ;;  %p10942_p1 = scmp.lt.s32.totalorder %s10940_s6, %s10934_s16 }
 0x2df   : > { %v4412_v46 = vsel %vm2872_vm5, %v4409_v30, %v4411_v39  ;;  %v4628_v39 = vrot.slane %v13297_v58, 3 }
 0x2e0   : > { %p10943_p2 = por %p10942_p1, %p10941_p0 }
 0x2e2   : > { %p10944_p3 = pnand %p10943_p2, %p10937_p13 }
 0x2e4   : > { %9265 = vmatmul.mubr.msk.bf16.gmra.mrb[48].mxu1 %vm545_vm2, %v14795_v23  ;;  %v14804_v23 = vld [vmem:[#allocation26_spill] sm:$0xff] }
 0x2e5   : > { %9571 = vmatmul.mubr.msk.bf16.gmra.mrb[48].mxu0 %vm545_vm2, %v14796_v22  ;;  %9268 = vmatprep.mubr.msk.bf16.mxu1 %vm545_vm2, %v14797_v55  ;;  %v14805_v22 = vld [vmem:[#allocation28_spill] sm:$0xff]  ;;  %v14806_v55 = vld [vmem:[#allocation31_spill] sm:$0xff] }
 0x2e6   : > { %9574 = vmatprep.mubr.msk.bf16.mxu0 %vm545_vm2, %v12981_v10  ;;  %v4410_v10 = vsel %vm2872_vm5, %v4408_v33, %v4409_v30  ;;  %v14807_v33 = vld [vmem:[#allocation35_spill] sm:$0xff]  ;;  %v14808_v30 = vld [vmem:[#allocation36_spill] sm:$0xff] }
 0x2ec   : > { %9269 = vmatmul.mubr.msk.bf16.gmra.mrb[52].mxu1 %vm545_vm2, %v14775_v2  ;;  %v4413_v2 = vrot.slane %v13297_v58, 1 }
 0x2ed   : > { %9575 = vmatmul.mubr.msk.bf16.gmra.mrb[52].mxu0 %vm545_vm2, %v12999_v6  ;;  %9272 = vmatprep.mubr.msk.bf16.mxu1 %vm545_vm2, %v14798_v47  ;;  %v4422_v6 = vpack.c.bf16 %v4412_v46, %v4410_v10  ;;  %v4629_v47 = vrot.slane %v13300_v16, 3  ;;  %v4631_v10 = vrot.slane %v13303_v7, 3  ;;  %v14809_v46 = vld [vmem:[#allocation37_spill] sm:$0xff] }
 0x2ee   : > { %9578 = vmatprep.mubr.msk.bf16.mxu0 %vm545_vm2, %v13015_v56  ;;  %v4414_v56 = vrot.slane %v13300_v16, 1 }
 0x2f0   : > { %v4415_v9 = vsel %vm2872_vm5, %v4413_v2, %v4414_v56  ;;  %v4417_v17 = vsel %vm2872_vm5, %v4414_v56, %v4416_v1  ;;  %v6958_v2 = vrot.slane %v234_v63, 3  ;;  %v6960_v1 = vrot.slane %v235_v28, 3 }
 0x2f1   : > { %v4423_v18 = vpack.c.bf16 %v4417_v17, %v4415_v9  ;;  %v4842_v63 = vrot.slane %v13297_v58, 5 }
 0x2f2   : > { %v6961_v17 = vsel %vm414_vm1, %v6958_v2, %v6960_v1 }
 0x2f4   : > { %9273 = vmatmul.mubr.msk.bf16.gmra.mrb[56].mxu1 %vm545_vm2, %v13011_v14  ;;  %v13324_v14 = vsel %vm594_vm0, %v7176_v20, %v7177_v51  ;;  %v4845_v20 = vrot.slane %v13303_v7, 5 }
 0x2f5   : > { %9579 = vmatmul.mubr.msk.bf16.gmra.mrb[56].mxu0 %vm545_vm2, %v6744_v44  ;;  %9276 = vmatprep.mubr.msk.bf16.mxu1 %vm545_vm2, %v4422_v6  ;;  %v7189_v48 = vpack.c.bf16 %v13330_v41, %v13324_v14  ;;  %v4632_v44 = vsel %vm414_vm1, %v4629_v47, %v4631_v10  ;;  %v6957_v6 = vrot.slane %v233_v4, 3  ;;  %v14822_v41 = vld [vmem:[#allocation63_spill] sm:$0xff] }
 0x2f6   : > { %9582 = vmatprep.mubr.msk.bf16.mxu0 %vm545_vm2, %v6745_v32  ;;  %v14810_v32 = vld [vmem:[#allocation12_spill] sm:$0xff] }
 0x2f7   : > { %v6959_v9 = vsel %vm414_vm1, %v6957_v6, %v6958_v2 }
 0x2fc   : > { %9277 = vmatmul.mubr.msk.bf16.gmra.mrb[60].mxu1 %vm545_vm2, %v4423_v18  ;;  %v6964_v18 = vpack.c.bf16 %v6961_v17, %v6959_v9  ;;  %v14827_v9 = vld [vmem:[#allocation68_spill] sm:$0xff] }
 0x2fd   : > { %9583 = vmatmul.mubr.msk.bf16.gmra.mrb[60].mxu0 %vm545_vm2, %v6746_v8  ;;  %9282 = vmatprep.mubr.msk.bf16.mxu1 %vm545_vm2, %v14778_v37  ;;  %v14800_v37 = vld [vmem:[#allocation19_spill] sm:$0xff] }
 0x2fe   : > { %9588 = vmatprep.mubr.msk.bf16.mxu0 %vm545_vm2, %v14799_v3 }
 0x304   : > { %9283 = vmatmul.mubr.msk.bf16.vlgmr.msra.gmra.mrb[32].mxu1 %vm545_vm2, %v14799_v3  ;;  %v14820_v3 = vld [vmem:[#allocation61_spill] sm:$0xff] }
 0x305   : > { %9315 = vmatpush3.bf16.msra.mxu1 %v4862_v60  ;;  %9589 = vmatmul.mubr.msk.bf16.vlgmr.msra.gmra.mrb[32].mxu0 %vm545_vm2, %v14800_v37 }
 0x306   : > { %9621 = vmatpush3.bf16.msra.mxu0 %v7202_v42  ;;  %9286 = vmatprep.mubr.msk.bf16.mxu1 %vm545_vm2, %v14800_v37  ;;  %v14821_v37 = vld [vmem:[#allocation62_spill] sm:$0xff] }
 0x307   : > { %9592 = vmatprep.mubr.msk.bf16.mxu0 %vm545_vm2, %v14801_v53 }
 0x30c   : > { %9287 = vmatmul.mubr.msk.bf16.gmra.mrb[36].mxu1 %vm545_vm2, %v14801_v53 }
 0x30d   : > { %9593 = vmatmul.mubr.msk.bf16.gmra.mrb[36].mxu0 %vm545_vm2, %v14802_v27  ;;  %9290 = vmatprep.mubr.msk.bf16.mxu1 %vm545_vm2, %v14802_v27 }
 0x30e   : > { %9596 = vmatprep.mubr.msk.bf16.mxu0 %vm545_vm2, %v14803_v45 }
 0x314   : > { %9291 = vmatmul.mubr.msk.bf16.gmra.mrb[40].mxu1 %vm545_vm2, %v14803_v45  ;;  %v14823_v45 = vld [vmem:[#allocation64_spill] sm:$0xff] }
 0x315   : > { %9597 = vmatmul.mubr.msk.bf16.gmra.mrb[40].mxu0 %vm545_vm2, %v14804_v23  ;;  %9294 = vmatprep.mubr.msk.bf16.mxu1 %vm545_vm2, %v14804_v23 }
 0x316   : > { %9600 = vmatprep.mubr.msk.bf16.mxu0 %vm545_vm2, %v14805_v22 }
 0x31c   : > { %9295 = vmatmul.mubr.msk.bf16.gmra.mrb[44].mxu1 %vm545_vm2, %v14805_v22  ;;  %v14824_v22 = vld [vmem:[#allocation65_spill] sm:$0xff] }
 0x31d   : > { %9601 = vmatmul.mubr.msk.bf16.gmra.mrb[44].mxu0 %vm545_vm2, %v14806_v55  ;;  %9298 = vmatprep.mubr.msk.bf16.mxu1 %vm545_vm2, %v14806_v55 }
 0x31e   : > { %9604 = vmatprep.mubr.msk.bf16.mxu0 %vm545_vm2, %v14787_v52 }
 0x324   : > { %9299 = vmatmul.mubr.msk.bf16.gmra.mrb[48].mxu1 %vm545_vm2, %v14787_v52  ;;  %v4630_v52 = vsel %vm414_vm1, %v4628_v39, %v4629_v47 }
 0x325   : > { %9605 = vmatmul.mubr.msk.bf16.gmra.mrb[48].mxu0 %vm545_vm2, %v14807_v33  ;;  %9302 = vmatprep.mubr.msk.bf16.mxu1 %vm545_vm2, %v14807_v33  ;;  %v4635_v56 = vpack.c.bf16 %v4632_v44, %v4630_v52  ;;  %v14825_v52 = vld [vmem:[#allocation66_spill] sm:$0xff] }
 0x326   : > { %9608 = vmatprep.mubr.msk.bf16.mxu0 %vm545_vm2, %v14808_v30 }
 0x32c   : > { %9303 = vmatmul.mubr.msk.bf16.gmra.mrb[52].mxu1 %vm545_vm2, %v14808_v30 }
 0x32d   : > { %9609 = vmatmul.mubr.msk.bf16.gmra.mrb[52].mxu0 %vm545_vm2, %v14809_v46  ;;  %9306 = vmatprep.mubr.msk.bf16.mxu1 %vm545_vm2, %v14809_v46 }
 0x32e   : > { %9612 = vmatprep.mubr.msk.bf16.mxu0 %vm545_vm2, %v14791_v50 }
 0x334   : > { %9307 = vmatmul.mubr.msk.bf16.gmra.mrb[56].mxu1 %vm545_vm2, %v14791_v50  ;;  %v7172_v50 = vrot.slane %v13300_v16, 6 }
 0x335   : > { %9613 = vmatmul.mubr.msk.bf16.gmra.mrb[56].mxu0 %vm545_vm2, %v14810_v32  ;;  %9310 = vmatprep.mubr.msk.bf16.mxu1 %vm545_vm2, %v14810_v32 }
 0x336   : > { %9616 = vmatprep.mubr.msk.bf16.mxu0 %vm545_vm2, %v4635_v56 }
 0x33c   : > { %9311 = vmatmul.mubr.msk.bf16.gmra.mrb[60].mxu1 %vm545_vm2, %v4635_v56  ;;  %v14826_v56 = vld [vmem:[#allocation43_spill] sm:$0xff] }
 0x33d   : > { %9617 = vmatmul.mubr.msk.bf16.gmra.mrb[60].mxu0 %vm545_vm2, %v6964_v18  ;;  %9316 = vmatprep.mubr.msk.bf16.mxu1 %vm545_vm2, %v14792_v12  ;;  %v7174_v12 = vrot.slane %v13303_v7, 6  ;;  %v14819_v7 = vld [vmem:[#allocation60_spill] sm:$0xff] }
 0x33e   : > { %9622 = vmatprep.mubr.msk.bf16.mxu0 %vm545_vm2, %v12634_v19  ;;  %v14812_v19 = vld [vmem:[#allocation67_spill] sm:$0xff] }
 0x344   : > { %9317 = vmatmul.mubr.msk.bf16.vlgmr.msra.gmra.mrb[32].mxu1 %vm545_vm2, %v12619_v13  ;;  %v14811_v13 = vld [vmem:[#allocation44_spill] sm:$0xff] }
 0x345   : > { %9623 = vmatmul.mubr.msk.bf16.vlgmr.msra.gmra.mrb[32].mxu0 %vm545_vm2, %v12649_v59  ;;  %9320 = vmatprep.mubr.msk.bf16.mxu1 %vm545_vm2, %v14793_v43  ;;  %v14814_v59 = vld [vmem:[#allocation70_spill] sm:$0xff] }
 0x346   : > { %9626 = vmatprep.mubr.msk.bf16.mxu0 %vm545_vm2, %v12677_v25  ;;  %v14816_v25 = vld [vmem:[#allocation50_spill] sm:$0xff] }
 0x34c   : > { %9321 = vmatmul.mubr.msk.bf16.gmra.mrb[36].mxu1 %vm545_vm2, %v12643_v26  ;;  %v14813_v26 = vld [vmem:[#allocation42_spill] sm:$0xff] }
 0x34d   : > { %9627 = vmatmul.mubr.msk.bf16.gmra.mrb[36].mxu0 %vm545_vm2, %v12703_v15  ;;  %9324 = vmatprep.mubr.msk.bf16.mxu1 %vm545_vm2, %v12663_v40  ;;  %v14815_v40 = vld [vmem:[#allocation69_spill] sm:$0xff]  ;;  %v7167_v15 = vrot.slane %v13279_v21, 6 }
 0x34e   : > { %9630 = vmatprep.mubr.msk.bf16.mxu0 %vm545_vm2, %v12711_v35  ;;  %v4837_v35 = vrot.slane %v13275_v11, 5 }
 0x354   : > { %9325 = vmatmul.mubr.msk.bf16.gmra.mrb[40].mxu1 %vm545_vm2, %v12701_v31  ;;  %v7166_v31 = vrot.slane %v13275_v11, 6 }
 0x355   : > { %9631 = vmatmul.mubr.msk.bf16.gmra.mrb[40].mxu0 %vm545_vm2, %v12751_v0  ;;  %9328 = vmatprep.mubr.msk.bf16.mxu1 %vm545_vm2, %v12709_v36  ;;  %v7169_v36 = vrot.slane %v13283_v54, 6  ;;  %v4838_v0 = vrot.slane %v13279_v21, 5 }
 0x356   : > { %9634 = vmatprep.mubr.msk.bf16.mxu0 %vm545_vm2, %v14811_v13 }
 0x357   : > { %v7170_v43 = vsel %vm594_vm0, %v7167_v15, %v7169_v36  ;;  %v4839_v11 = vsel %vm3392_vm6, %v4837_v35, %v4838_v0 }
 0x35c   : > { %9329 = vmatmul.mubr.msk.bf16.gmra.mrb[44].mxu1 %vm545_vm2, %v14812_v19  ;;  %v14828_v19 = vld [vmem:[#allocation46_spill] sm:$0xff] }
 0x35d   : > { %9635 = vmatmul.mubr.msk.bf16.gmra.mrb[44].mxu0 %vm545_vm2, %v12799_v24  ;;  %9332 = vmatprep.mubr.msk.bf16.mxu1 %vm545_vm2, %v14813_v26  ;;  %v4840_v24 = vrot.slane %v13283_v54, 5 }
 0x35e   : > { %9638 = vmatprep.mubr.msk.bf16.mxu0 %vm545_vm2, %v14814_v59 }
 0x35f   : > { %v4841_v21 = vsel %vm3392_vm6, %v4838_v0, %v4840_v24 }
 0x364   : > { %9333 = vmatmul.mubr.msk.bf16.gmra.mrb[48].mxu1 %vm545_vm2, %v14815_v40  ;;  %v14829_v40 = vld [vmem:[#allocation47_spill] sm:$0xff] }
 0x365   : > { %9639 = vmatmul.mubr.msk.bf16.gmra.mrb[48].mxu0 %vm545_vm2, %v12839_v29  ;;  %9336 = vmatprep.mubr.msk.bf16.mxu1 %vm545_vm2, %v14816_v25  ;;  %v7171_v29 = vrot.slane %v13297_v58, 6  ;;  %v14817_v58 = vld [vmem:[#allocation74_spill] sm:$0xff] }
 0x366   : > { %9642 = vmatprep.mubr.msk.bf16.mxu0 %vm545_vm2, %v13180_v57  ;;  %v7168_v57 = vsel %vm594_vm0, %v7166_v31, %v7167_v15  ;;  %v13492_v38 = vadd.f32 %v14819_v7, %v14817_v58  ;;  %v13496_v60 = vadd.f32 %v14820_v3, %v14817_v58  ;;  %v13501_v53 = vadd.f32 %v14821_v37, %v14817_v58  ;;  %v14833_v3 = vld [vmem:[#allocation72_spill] sm:$0xff] }
 0x367   : > { %v7173_v54 = vsel %vm594_vm0, %v7171_v29, %v7172_v50  ;;  %v7187_v4 = vpack.c.bf16 %v7170_v43, %v7168_v57  ;;  %v13511_v23 = vadd.f32 %v14823_v45, %v14817_v58  ;;  %v13515_v55 = vadd.f32 %v14824_v22, %v14817_v58  ;;  %v14830_v29 = vld [vmem:[#allocation49_spill] sm:$0xff] }
 0x368   : > { %v2645_v14 = vsub.f32 0.0, %v13492_v38  ;;  %v2648_v27 = vsub.f32 0.0, %v13496_v60  ;;  %v2646_v30 = vsub.f32 0.0, %v13501_v53  ;;  %v13522_v44 = vadd.f32 %v14825_v52, %v14817_v58 }
 0x369   : > { %v2649_v46 = vsub.f32 0.0, %v13511_v23  ;;  %v2652_v6 = vsub.f32 0.0, %v13515_v55  ;;  %v13527_v1 = vadd.f32 %v14826_v56, %v14817_v58  ;;  %v13531_v17 = vadd.f32 %v14827_v9, %v14817_v58 }
 0x36a   : > { %v2677_v39 = vmul.f32 1.442695, %v2645_v14  ;;  %v2683_v10 = vmul.f32 1.442695, %v2648_v27  ;;  %v2679_v2 = vmul.f32 1.442695, %v2646_v30  ;;  %v13536_v26 = vadd.f32 %v14828_v19, %v14817_v58 }
 0x36b   : > { %v2685_v18 = vmul.f32 1.442695, %v2649_v46  ;;  %v2650_v13 = vsub.f32 0.0, %v13522_v44  ;;  %v2691_v59 = vmul.f32 1.442695, %v2652_v6  ;;  %v13540_v25 = vadd.f32 %v14829_v40, %v14817_v58  ;;  %v14835_v40 = vld [vmem:[#allocation75_spill] sm:$0xff] }
 0x36c   : > { %9337 = vmatmul.mubr.msk.bf16.gmra.mrb[52].mxu1 %vm545_vm2, %v12835_v61  ;;  %v7175_v61 = vsel %vm594_vm0, %v7172_v50, %v7174_v12  ;;  %v2655_v31 = vsub.f32 0.0, %v13527_v1  ;;  %v2653_v15 = vsub.f32 0.0, %v13531_v17  ;;  %v2656_v35 = vsub.f32 0.0, %v13536_v26 }
 0x36d   : > { %9643 = vmatmul.mubr.msk.bf16.gmra.mrb[52].mxu0 %vm545_vm2, %v13187_v49  ;;  %9340 = vmatprep.mubr.msk.bf16.mxu1 %vm545_vm2, %v13182_v5  ;;  %v4851_v49 = vpack.c.bf16 %v4841_v21, %v4839_v11  ;;  %v4843_v5 = vrot.slane %v13300_v16, 5  ;;  %v7188_v51 = vpack.c.bf16 %v7175_v61, %v7173_v54  ;;  %v2687_v36 = vmul.f32 1.442695, %v2650_v13 }
 0x36e   : > { %9646 = vmatprep.mubr.msk.bf16.mxu0 %vm545_vm2, %v13206_v62  ;;  %v2654_v0 = vsub.f32 0.0, %v13540_v25  ;;  %v2697_v24 = vmul.f32 1.442695, %v2655_v31  ;;  %v13548_v50 = vadd.f32 %v14830_v29, %v14817_v58  ;;  %v2693_v12 = vmul.f32 1.442695, %v2653_v15  ;;  %v14837_v29 = vld [vmem:[#allocation13_spill] sm:$0xff] }
 0x36f   : > { %v4844_v62 = vsel %vm3392_vm6, %v4842_v63, %v4843_v5  ;;  %v4846_v8 = vsel %vm3392_vm6, %v4843_v5, %v4845_v20  ;;  %v2699_v43 = vmul.f32 1.442695, %v2656_v35  ;;  %v2661_v31 = vsub.f32 0.0, %v14835_v40 }
 0x370   : > { %v4852_v28 = vpack.c.bf16 %v4846_v8, %v4844_v62  ;;  %v2695_v21 = vmul.f32 1.442695, %v2654_v0  ;;  %v2659_v61 = vsub.f32 0.0, %v13548_v50 }
 0x372   : > { %v2705_v7 = vmul.f32 1.442695, %v2659_v61 }
 0x374   : > { %9341 = vmatmul.mubr.msk.bf16.gmra.mrb[56].mxu1 %vm545_vm2, %v13204_v34  ;;  %v14818_v34 = vld [vmem:[#allocation59_spill] sm:$0xff] }
 0x375   : > { %9647 = vmatmul.mubr.msk.bf16.gmra.mrb[56].mxu0 %vm545_vm2, %v7187_v4  ;;  %9344 = vmatprep.mubr.msk.bf16.mxu1 %vm545_vm2, %v4851_v49  ;;  %v13488_v16 = vadd.f32 %v14818_v34, %v14817_v58  ;;  %v14831_v49 = vld [vmem:[#allocation51_spill] sm:$0xff] }
 0x376   : > { %9650 = vmatprep.mubr.msk.bf16.mxu0 %vm545_vm2, %v7188_v51  ;;  %v13553_v63 = vadd.f32 %v14831_v49, %v14817_v58  ;;  %v14832_v51 = vld [vmem:[#allocation71_spill] sm:$0xff] }
 0x377   : > { %v2647_v42 = vsub.f32 0.0, %v13488_v16  ;;  %v13557_v62 = vadd.f32 %v14832_v51, %v14817_v58 }
 0x379   : > { %v2681_v33 = vmul.f32 1.442695, %v2647_v42  ;;  %v13561_v42 = vadd.f32 %v14833_v3, %v14817_v58  ;;  %v2660_v45 = vsub.f32 0.0, %v13557_v62 }
 0x37b   : > { %10494 = vpow2.f32 %v2681_v33  ;;  %v2707_v6 = vmul.f32 1.442695, %v2660_v45 }
 0x37c   : > { %9345 = vmatmul.mubr.msk.bf16.gmra.mrb[60].mxu1 %vm545_vm2, %v4852_v28  ;;  %10496 = vpow2.f32 %v2677_v39  ;;  %v2658_v39 = vsub.f32 0.0, %v13561_v42 }
 0x37d   : > { %9651 = vmatmul.mubr.msk.bf16.gmra.mrb[60].mxu0 %vm545_vm2, %v7189_v48  ;;  %v13506_v48 = vadd.f32 %v14822_v41, %v14817_v58  ;;  %10498 = vpow2.f32 %v2683_v10  ;;  %v2657_v41 = vsub.f32 0.0, %v13553_v63  ;;  %v14834_v10 = vld [vmem:[#allocation73_spill] sm:$0xff] }
 0x37e   : > { %10500 = vpow2.f32 %v2679_v2  ;;  %v13568_v46 = vadd.f32 %v14834_v10, %v14817_v58  ;;  %v2703_v9 = vmul.f32 1.442695, %v2658_v39  ;;  %v14842_v39 = vld [vmem:[#allocation16_spill] sm:$0xff] }
 0x37f   : > { %v2651_v47 = vsub.f32 0.0, %v13506_v48 }
 0x380   : > { %v2663_v19 = vsub.f32 0.0, %v13568_v46 }
 0x381   : > { %v2689_v32 = vmul.f32 1.442695, %v2651_v47  ;;  %v2701_v47 = vmul.f32 1.442695, %v2657_v41 }
 0x383   : > { %10502 = vpow2.f32 %v2689_v32 }
 0x384   : > { %10504 = vpow2.f32 %v2685_v18 }
 0x385   : > { %10506 = vpow2.f32 %v2691_v59  ;;  %v10495_v57 = vpop.eup %10494 }
 0x386   : > { %10508 = vpow2.f32 %v2687_v36  ;;  %v10497_v11 = vpop.eup %10496  ;;  %v2743_v4 = vadd.f32 1.0, %v10495_v57  ;;  %v14836_v36 = vld [vmem:[#allocation76_spill] sm:$0xff] }
 0x387   : > { %v10499_v54 = vpop.eup %10498  ;;  %10510 = vpow2.f32 %v2697_v24  ;;  %v2741_v20 = vadd.f32 1.0, %v10497_v11  ;;  %v2664_v35 = vsub.f32 0.0, %v14836_v36 }
 0x388   : > { %10512 = vpow2.f32 %v2693_v12  ;;  %v10501_v5 = vpop.eup %10500  ;;  %v2744_v28 = vadd.f32 1.0, %v10499_v54  ;;  %v2662_v12 = vsub.f32 0.0, %v14837_v29  ;;  %v14838_v54 = vld [vmem:[#allocation15_spill] sm:$0xff] }
 0x389   : > { %10514 = vpow2.f32 %v2699_v43  ;;  %v2742_v14 = vadd.f32 1.0, %v10501_v5  ;;  %v2713_v43 = vmul.f32 1.442695, %v2663_v19  ;;  %v2667_v61 = vsub.f32 0.0, %v14838_v54  ;;  %v14839_v5 = vld [vmem:[#allocation77_spill] sm:$0xff] }
 0x38a   : > { %10516 = vpow2.f32 %v2695_v21  ;;  %v2709_v21 = vmul.f32 1.442695, %v2661_v31  ;;  %v2715_v49 = vmul.f32 1.442695, %v2664_v35 }
 0x38b   : > { %10518 = vrcp.f32 %v2743_v4 }
 0x38c   : > { %10520 = vrcp.f32 %v2741_v20  ;;  %v2665_v20 = vsub.f32 0.0, %v14839_v5 }
 0x38d   : > { %v10503_v8 = vpop.eup %10502  ;;  %10522 = vrcp.f32 %v2744_v28  ;;  %v14840_v28 = vld [vmem:[#allocation14_spill] sm:$0xff] }
 0x38e   : > { %v10505_v34 = vpop.eup %10504  ;;  %v2747_v27 = vadd.f32 1.0, %v10503_v8  ;;  %10524 = vpow2.f32 %v2705_v7  ;;  %v2711_v8 = vmul.f32 1.442695, %v2662_v12 }
 0x38f   : > { %v10507_v37 = vpop.eup %10506  ;;  %v2745_v22 = vadd.f32 1.0, %v10505_v34  ;;  %10526 = vrcp.f32 %v2742_v14  ;;  %v2668_v34 = vsub.f32 0.0, %v14840_v28 }
 0x390   : > { %v10509_v33 = vpop.eup %10508  ;;  %v2748_v30 = vadd.f32 1.0, %v10507_v37  ;;  %10528 = vrcp.f32 %v2747_v27  ;;  %v14841_v37 = vld [vmem:[#allocation17_spill] sm:$0xff]  ;;  %v2721_v27 = vmul.f32 1.442695, %v2667_v61 }
 0x391   : > { %v10511_v52 = vpop.eup %10510  ;;  %10530 = vrcp.f32 %v2745_v22  ;;  %v2746_v56 = vadd.f32 1.0, %v10509_v33  ;;  %v2666_v14 = vsub.f32 0.0, %v14841_v37  ;;  %v2717_v22 = vmul.f32 1.442695, %v2665_v20 }
 0x392   : > { %v10513_v2 = vpop.eup %10512  ;;  %10532 = vrcp.f32 %v2748_v30  ;;  %v2751_v13 = vadd.f32 1.0, %v10511_v52  ;;  %v2723_v30 = vmul.f32 1.442695, %v2668_v34 }
 0x393   : > { %v10515_v32 = vpop.eup %10514  ;;  %10534 = vpow2.f32 %v2701_v47  ;;  %v2749_v59 = vadd.f32 1.0, %v10513_v2  ;;  %v2671_v47 = vsub.f32 0.0, %v14842_v39  ;;  %v2719_v52 = vmul.f32 1.442695, %v2666_v14 }
 0x394   : > { %v10517_v18 = vpop.eup %10516  ;;  %10536 = vpow2.f32 %v2707_v6  ;;  %v2752_v15 = vadd.f32 1.0, %v10515_v32  ;;  %v14843_v6 = vld [vmem:[#allocation21_spill] sm:$0xff] }
 0x395   : > { %v13572_v58 = vpop.eup %10518  ;;  %10538 = vrcp.f32 %v2746_v56  ;;  %v2750_v24 = vadd.f32 1.0, %v10517_v18  ;;  %v2669_v2 = vsub.f32 0.0, %v14843_v6  ;;  %v2729_v35 = vmul.f32 1.442695, %v2671_v47 }
 0x396   : > { %v13575_v0 = vpop.eup %10520  ;;  %10540 = vpow2.f32 %v2703_v9  ;;  %v14844_v9 = vld [vmem:[#allocation20_spill] sm:$0xff] }
 0x397   : > { %v13578_v57 = vpop.eup %10522  ;;  %10542 = vrcp.f32 %v2751_v13  ;;  %v2672_v18 = vsub.f32 0.0, %v14844_v9 }
 0x398   : > { %v10525_v11 = vpop.eup %10524  ;;  %10544 = vrcp.f32 %v2749_v59  ;;  %v14845_v59 = vld [vmem:[#allocation25_spill] sm:$0xff] }
 0x399   : > { %v13581_v4 = vpop.eup %10526  ;;  %10546 = vrcp.f32 %v2752_v15  ;;  %v2755_v3 = vadd.f32 1.0, %v10525_v11  ;;  %v2670_v31 = vsub.f32 0.0, %v14845_v59  ;;  %v2725_v11 = vmul.f32 1.442695, %v2669_v2 }
 0x39a   : > { %v13584_v51 = vpop.eup %10528  ;;  %10548 = vrcp.f32 %v2750_v24  ;;  %v14846_v24 = vld [vmem:[#allocation30_spill] sm:$0xff]  ;;  %v2731_v20 = vmul.f32 1.442695, %v2672_v18 }
 0x39b   : > { %v13587_v7 = vpop.eup %10530  ;;  %10550 = vpow2.f32 %v2713_v43  ;;  %v2675_v12 = vsub.f32 0.0, %v14846_v24  ;;  %v2727_v34 = vmul.f32 1.442695, %v2670_v31 }
 0x39c   : > { %v13590_v41 = vpop.eup %10532  ;;  %10552 = vpow2.f32 %v2709_v21  ;;  %v14847_v21 = vld [vmem:[#allocation5_spill] sm:$0xff] }
 0x39d   : > { %v10535_v45 = vpop.eup %10534  ;;  %10554 = vpow2.f32 %v2715_v49  ;;  %v2673_v61 = vsub.f32 0.0, %v14847_v21  ;;  %v2737_v14 = vmul.f32 1.442695, %v2675_v12 }
 0x39e   : > { %v10537_v33 = vpop.eup %10536  ;;  %10556 = vpow2.f32 %v2711_v8  ;;  %v2753_v32 = vadd.f32 1.0, %v10535_v45 }
 0x39f   : > { %v13593_v10 = vpop.eup %10538  ;;  %10558 = vrcp.f32 %v2755_v3  ;;  %v2756_v19 = vadd.f32 1.0, %v10537_v33  ;;  %v2733_v45 = vmul.f32 1.442695, %v2673_v61 }
 0x3a0   : > { %v10541_v56 = vpop.eup %10540  ;;  %10560 = vpow2.f32 %v2721_v27 }
 0x3a1   : > { %v13597_v13 = vpop.eup %10542  ;;  %10562 = vpow2.f32 %v2717_v22  ;;  %v2754_v33 = vadd.f32 1.0, %v10541_v56 }
 0x3a2   : > { %v13600_v15 = vpop.eup %10544  ;;  %10564 = vpow2.f32 %v2723_v30 }
 0x3a3   : > { %v13603_v43 = vpop.eup %10546  ;;  %10566 = vpow2.f32 %v2719_v52 }
 0x3a4   : > { %v13606_v49 = vpop.eup %10548  ;;  %10568 = vrcp.f32 %v2753_v32 }
 0x3a5   : > { %v10551_v8 = vpop.eup %10550  ;;  %10570 = vrcp.f32 %v2756_v19 }
 0x3a6   : > { %v10553_v3 = vpop.eup %10552  ;;  %10572 = vpow2.f32 %v2729_v35  ;;  %v2759_v47 = vadd.f32 1.0, %v10551_v8  ;;  %v14849_v8 = vld [vmem:[#allocation32_spill] sm:$0xff] }
 0x3a7   : > { %v10555_v27 = vpop.eup %10554  ;;  %10574 = vpow2.f32 %v2725_v11  ;;  %v2757_v2 = vadd.f32 1.0, %v10553_v3  ;;  %v14848_v11 = vld [vmem:[#allocation27_spill] sm:$0xff] }
 0x3a8   : > { %v10557_v22 = vpop.eup %10556  ;;  %10576 = vpow2.f32 %v2731_v20  ;;  %v2760_v18 = vadd.f32 1.0, %v10555_v27  ;;  %v2676_v61 = vsub.f32 0.0, %v14848_v11 }
 0x3a9   : > { %v13608_v30 = vpop.eup %10558  ;;  %10578 = vpow2.f32 %v2727_v34  ;;  %v2758_v31 = vadd.f32 1.0, %v10557_v22  ;;  %v2674_v34 = vsub.f32 0.0, %v14849_v8 }
 0x3aa   : > { %v10561_v52 = vpop.eup %10560  ;;  %10580 = vpow2.f32 %v2737_v14  ;;  %v2739_v22 = vmul.f32 1.442695, %v2676_v61 }
 0x3ab   : > { %v10563_v32 = vpop.eup %10562  ;;  %10582 = vpow2.f32 %v2733_v45  ;;  %v2763_v12 = vadd.f32 1.0, %v10561_v52 }
 0x3ac   : > { %v10565_v19 = vpop.eup %10564  ;;  %10584 = vrcp.f32 %v2754_v33  ;;  %v2761_v20 = vadd.f32 1.0, %v10563_v32 }
 0x3ad   : > { %v10567_v35 = vpop.eup %10566  ;;  %10586 = vrcp.f32 %v2759_v47  ;;  %v2764_v3 = vadd.f32 1.0, %v10565_v19  ;;  %v2735_v47 = vmul.f32 1.442695, %v2674_v34 }
 0x3ae   : > { %v13611_v56 = vpop.eup %10568  ;;  %10588 = vrcp.f32 %v2757_v2  ;;  %v2762_v27 = vadd.f32 1.0, %v10567_v35 }
 0x3af   : > { %v13614_v21 = vpop.eup %10570  ;;  %10590 = vrcp.f32 %v2760_v18 }
 0x3b0   : > { %v10573_v14 = vpop.eup %10572  ;;  %10592 = vrcp.f32 %v2758_v31 }
 0x3b1   : > { %v10575_v45 = vpop.eup %10574  ;;  %10594 = vrcp.f32 %v2763_v12  ;;  %v2767_v11 = vadd.f32 1.0, %v10573_v14  ;;  %v13623_v12 = vld [vmem:[%s14417_s2 + $0x1] ss:$0 sm:$0xff]  ;;  %v13640_v14 = vmul.f32 %v13575_v0, %v13492_v38  ;;  %v13658_v38 = vmul.f32 %v13587_v7, %v13511_v23 }
 0x3b2   : > { %v10577_v33 = vpop.eup %10576  ;;  %10596 = vrcp.f32 %v2761_v20  ;;  %v2765_v32 = vadd.f32 1.0, %v10575_v45  ;;  %v13629_v20 = vmul.f32 %v13572_v58, %v13488_v16  ;;  %v13648_v16 = vmul.f32 %v13581_v4, %v13501_v53 }
 0x3b3   : > { %v10579_v52 = vpop.eup %10578  ;;  %10598 = vrcp.f32 %v2764_v3  ;;  %v2768_v24 = vadd.f32 1.0, %v10577_v33  ;;  %v13634_v3 = vld [vmem:[%s14417_s2 + $0x2] ss:$0 sm:$0xff]  ;;  %v13654_v45 = vmul.f32 %v13584_v51, %v13506_v48  ;;  %14850 = vst [vmem:[#allocation6_spill] sm:$0xff] %v13658_v38  ;;  %v13667_v4 = vmul.f32 %v13590_v41, %v13515_v55 }
 0x3b4   : > { %v10581_v2 = vpop.eup %10580  ;;  %10600 = vrcp.f32 %v2762_v27  ;;  %v2766_v19 = vadd.f32 1.0, %v10579_v52  ;;  %v13644_v27 = vmul.f32 %v13578_v57, %v13496_v60 }
 0x3b5   : > { %v10583_v8 = vpop.eup %10582  ;;  %10602 = vpow2.f32 %v2739_v22  ;;  %v2771_v35 = vadd.f32 1.0, %v10581_v2  ;;  %14851 = vst [vmem:[#allocation34_spill] sm:$0xff] %v13667_v4 }
 0x3b6   : > { %v13616_v18 = vpop.eup %10584  ;;  %10604 = vpow2.f32 %v2735_v47  ;;  %v2769_v34 = vadd.f32 1.0, %v10583_v8 }
 0x3b7   : > { %v13618_v31 = vpop.eup %10586  ;;  %10606 = vrcp.f32 %v2767_v11 }
 0x3b8   : > { %v13625_v61 = vpop.eup %10588  ;;  %10608 = vrcp.f32 %v2765_v32 }
 0x3b9   : > { %v13636_v11 = vpop.eup %10590  ;;  %10610 = vrcp.f32 %v2768_v24 }
 0x3ba   : > { %v13650_v8 = vpop.eup %10592  ;;  %10612 = vrcp.f32 %v2766_v19 }
 0x3bb   : > { %v13663_v53 = vpop.eup %10594  ;;  %10614 = vrcp.f32 %v2771_v35 }
 0x3bc   : > { %v13675_v24 = vpop.eup %10596  ;;  %10616 = vrcp.f32 %v2769_v34 }
 0x3bd   : > { %v13684_v52 = vpop.eup %10598 }
 0x417   : > { %v9318_v58 = vpop.f32.mrb[32].mxu1 }
 0x418   : > { %v13661_v60 = vadd.f32 %v9318_v58, %v13623_v12  ;;  %v9624_v0 = vpop.f32.mrb[32].mxu0  ;;  %v4898_v57 = vpop.f32.mrb[33].mxu1 }
 0x419   : > { %v13670_v48 = vadd.f32 %v9624_v0, %v13634_v3  ;;  %v13673_v51 = vadd.f32 %v13623_v12, %v4898_v57  ;;  %v7238_v23 = vpop.f32.mrb[33].mxu0  ;;  %v9319_v7 = vpop.f32.mrb[34].mxu1 }
 0x41a   : > { %v5099_v22 = vsub.f32 0.0, %v13661_v60  ;;  %v13679_v33 = vadd.f32 %v13634_v3, %v7238_v23  ;;  %v13682_v55 = vadd.f32 %v9319_v7, %v13623_v12  ;;  %v9625_v41 = vpop.f32.mrb[34].mxu0  ;;  %v4901_v47 = vpop.f32.mrb[35].mxu1 }
 0x41b   : > { %v7439_v2 = vsub.f32 0.0, %v13670_v48  ;;  %v5097_v32 = vsub.f32 0.0, %v13673_v51  ;;  %v13689_v19 = vadd.f32 %v9625_v41, %v13634_v3  ;;  %v13692_v35 = vadd.f32 %v13623_v12, %v4901_v47  ;;  %v7241_v34 = vpop.f32.mrb[35].mxu0  ;;  %v13694_v58 = vpop.eup %10600 }
 0x41c   : > { %14852 = vst [vmem:[#allocation38_spill] sm:$0xff] %v13694_v58  ;;  %v5133_v0 = vmul.f32 1.442695, %v5099_v22  ;;  %v7437_v57 = vsub.f32 0.0, %v13679_v33  ;;  %v5100_v23 = vsub.f32 0.0, %v13682_v55  ;;  %v13699_v7 = vadd.f32 %v13634_v3, %v7241_v34  ;;  %v13701_v59 = vpop.eup %10602 }
 0x41d   : > { %14853 = vst [vmem:[#allocation7_spill] sm:$0xff] %v13701_v59  ;;  %v7473_v9 = vmul.f32 1.442695, %v7439_v2  ;;  %v5129_v6 = vmul.f32 1.442695, %v5097_v32  ;;  %v7440_v41 = vsub.f32 0.0, %v13689_v19  ;;  %v13705_v39 = vpop.eup %10604  ;;  %v13712_v34 = vmul.f32 %v13593_v10, %v13522_v44 }
 0x41e   : > { %v5098_v47 = vsub.f32 0.0, %v13692_v35  ;;  %14854 = vst [vmem:[#allocation40_spill] sm:$0xff] %v13705_v39  ;;  %10618 = vpow2.f32 %v5133_v0  ;;  %v7469_v58 = vmul.f32 1.442695, %v7437_v57  ;;  %v5135_v22 = vmul.f32 1.442695, %v5100_v23  ;;  %v13708_v4 = vpop.eup %10606 }
 0x41f   : > { %v7438_v37 = vsub.f32 0.0, %v13699_v7  ;;  %14855 = vst [vmem:[#allocation39_spill] sm:$0xff] %v13708_v4  ;;  %v13716_v2 = vmul.f32 %v13597_v13, %v13527_v1  ;;  %10620 = vpow2.f32 %v7473_v9  ;;  %v7475_v32 = vmul.f32 1.442695, %v7440_v41  ;;  %v9322_v59 = vpop.f32.mrb[36].mxu1  ;;  %v13718_v38 = vpop.eup %10608 }
 0x420   : > { %14856 = vst [vmem:[#allocation45_spill] sm:$0xff] %v13718_v38  ;;  %v13722_v0 = vmul.f32 %v13600_v15, %v13531_v17  ;;  %10622 = vpow2.f32 %v5129_v6  ;;  %v5131_v57 = vmul.f32 1.442695, %v5098_v47  ;;  %v13725_v23 = vadd.f32 %v9322_v59, %v13623_v12  ;;  %v9628_v44 = vpop.f32.mrb[36].mxu0  ;;  %v4914_v10 = vpop.f32.mrb[37].mxu1 }
 0x421   : > { %v13727_v39 = vpop.eup %10610  ;;  %10624 = vpow2.f32 %v7469_v58  ;;  %v7471_v1 = vmul.f32 1.442695, %v7438_v37  ;;  %v13730_v9 = vadd.f32 %v9628_v44, %v13634_v3  ;;  %v13733_v13 = vadd.f32 %v13623_v12, %v4914_v10  ;;  %v7254_v41 = vpop.f32.mrb[37].mxu0 }
 0x422   : > { %14857 = vst [vmem:[#allocation41_spill] sm:$0xff] %v13722_v0  ;;  %14858 = vst [vmem:[#allocation52_spill] sm:$0xff] %v13727_v39  ;;  %v9323_v17 = vpop.f32.mrb[38].mxu1  ;;  %v13735_v15 = vpop.eup %10612  ;;  %10626 = vpow2.f32 %v5135_v22  ;;  %v5103_v6 = vsub.f32 0.0, %v13725_v23  ;;  %v13739_v59 = vadd.f32 %v13634_v3, %v7254_v41  ;;  %v13748_v10 = vmul.f32 %v13603_v43, %v13536_v26 }
 0x423   : > { %14859 = vst [vmem:[#allocation55_spill] sm:$0xff] %v13735_v15  ;;  %v13742_v47 = vadd.f32 %v9323_v17, %v13623_v12  ;;  %v9629_v37 = vpop.f32.mrb[38].mxu0  ;;  %v4917_v58 = vpop.f32.mrb[39].mxu1  ;;  %10628 = vpow2.f32 %v7475_v32  ;;  %v7443_v15 = vsub.f32 0.0, %v13730_v9  ;;  %v5101_v22 = vsub.f32 0.0, %v13733_v13 }
 0x424   : > { %v13744_v44 = vpop.eup %10614  ;;  %14861 = vst [vmem:[#allocation10_spill] sm:$0xff] %v13748_v10  ;;  %v7257_v39 = vpop.f32.mrb[39].mxu0  ;;  %10630 = vpow2.f32 %v5131_v57  ;;  %v5141_v41 = vmul.f32 1.442695, %v5103_v6  ;;  %v7441_v17 = vsub.f32 0.0, %v13739_v59  ;;  %v13757_v26 = vadd.f32 %v9629_v37, %v13634_v3 }
 0x425   : > { %14860 = vst [vmem:[#allocation8_spill] sm:$0xff] %v13744_v44  ;;  %v13752_v38 = vpop.eup %10616  ;;  %v5104_v4 = vsub.f32 0.0, %v13742_v47  ;;  %10632 = vpow2.f32 %v7471_v1  ;;  %v7481_v44 = vmul.f32 1.442695, %v7443_v15  ;;  %v5137_v0 = vmul.f32 1.442695, %v5101_v22 }
 0x426   : > { %14862 = vst [vmem:[#allocation11_spill] sm:$0xff] %v13752_v38  ;;  %v13761_v43 = vmul.f32 %v13606_v49, %v13540_v25  ;;  %10634 = vpow2.f32 %v5141_v41  ;;  %v7477_v32 = vmul.f32 1.442695, %v7441_v17  ;;  %v13765_v57 = vmul.f32 %v13608_v30, %v13548_v50 }
 0x427   : > { %v5143_v10 = vmul.f32 1.442695, %v5104_v4  ;;  %v13769_v6 = vmul.f32 %v13611_v56, %v13553_v63  ;;  %v13773_v1 = vmul.f32 %v13614_v21, %v13557_v62  ;;  %10636 = vpow2.f32 %v7481_v44  ;;  %v9326_v15 = vpop.f32.mrb[40].mxu1 }
 0x428   : > { %14863 = vst [vmem:[#allocation33_spill] sm:$0xff] %v13761_v43  ;;  %14864 = vst [vmem:[#allocation9_spill] sm:$0xff] %v13765_v57  ;;  %v10619_v37 = vpop.eup %10618  ;;  %v13777_v25 = vmul.f32 %v13616_v18, %v13561_v42  ;;  %v13781_v49 = vmul.f32 %v13618_v31, %v13568_v46  ;;  %v13785_v50 = vmul.f32 %v13625_v61, %v14835_v40  ;;  %10638 = vpow2.f32 %v5137_v0  ;;  %v9632_v63 = vpop.f32.mrb[40].mxu0 }
 0x429   : > { %14865 = vst [vmem:[#allocation57_spill] sm:$0xff] %v13769_v6  ;;  %14866 = vst [vmem:[#allocation58_spill] sm:$0xff] %v13773_v1  ;;  %v4930_v30 = vpop.f32.mrb[41].mxu1  ;;  %v10621_v62 = vpop.eup %10620  ;;  %v13789_v21 = vmul.f32 %v13636_v11, %v14836_v36  ;;  %v5195_v56 = vadd.f32 1.0, %v10619_v37  ;;  %10640 = vpow2.f32 %v7477_v32  ;;  %v7444_v42 = vsub.f32 0.0, %v13757_v26 }
 0x42a   : > { %14867 = vst [vmem:[#allocation54_spill] sm:$0xff] %v13777_v25  ;;  %14868 = vst [vmem:[#allocation48_spill] sm:$0xff] %v13781_v49  ;;  %v7270_v18 = vpop.f32.mrb[41].mxu0  ;;  %v9327_v4 = vpop.f32.mrb[42].mxu1  ;;  %v13794_v31 = vmul.f32 %v13650_v8, %v14837_v29  ;;  %v13798_v40 = vmul.f32 %v13663_v53, %v14838_v54  ;;  %v7535_v61 = vadd.f32 1.0, %v10621_v62  ;;  %10642 = vpow2.f32 %v5143_v10 }
 0x42b   : > { %14869 = vst [vmem:[#allocation56_spill] sm:$0xff] %v13785_v50  ;;  %14870 = vst [vmem:[#allocation53_spill] sm:$0xff] %v13789_v21  ;;  %v10623_v46 = vpop.eup %10622  ;;  %v9633_v0 = vpop.f32.mrb[42].mxu0  ;;  %v13804_v44 = vmul.f32 %v13675_v24, %v14839_v5  ;;  %v13808_v22 = vmul.f32 %v13684_v52, %v14840_v28  ;;  %10644 = vrcp.f32 %v5195_v56  ;;  %v13813_v10 = vadd.f32 %v13623_v12, %v4917_v58 }
 0x42c   : > { %14871 = vst [vmem:[#allocation29_spill] sm:$0xff] %v13794_v31  ;;  %14872 = vst [vmem:[#allocation18_spill] sm:$0xff] %v13798_v40  ;;  %v13800_v36 = vpop.f32.mrb[43].mxu1  ;;  %v10625_v11 = vpop.eup %10624  ;;  %v5193_v29 = vadd.f32 1.0, %v10623_v46  ;;  %10646 = vrcp.f32 %v7535_v61  ;;  %v13816_v41 = vadd.f32 %v13634_v3, %v7257_v39  ;;  %v13818_v24 = vmul.f32 1.442695, %v7444_v42 }
 0x42d   : > { %14873 = vst [vmem:[#allocation19_spill] sm:$0xff] %v13804_v44  ;;  %14874 = vst [vmem:[#allocation22_spill] sm:$0xff] %v13808_v22  ;;  %v13810_v8 = vpop.f32.mrb[43].mxu0  ;;  %v10627_v54 = vpop.eup %10626  ;;  %v7533_v53 = vadd.f32 1.0, %v10625_v11  ;;  %v13821_v28 = vadd.f32 %v9326_v15, %v13623_v12  ;;  %v13824_v37 = vadd.f32 %v9632_v63, %v13634_v3  ;;  %v13827_v58 = vadd.f32 %v13623_v12, %v4930_v30 }
 0x42e   : > { %v10629_v17 = vpop.eup %10628  ;;  %10648 = vrcp.f32 %v5193_v29  ;;  %v5196_v5 = vadd.f32 1.0, %v10627_v54  ;;  %v13830_v56 = vadd.f32 %v13634_v3, %v7270_v18  ;;  %v13833_v42 = vadd.f32 %v9327_v4, %v13623_v12 }
 0x42f   : > { %v10631_v52 = vpop.eup %10630  ;;  %10650 = vrcp.f32 %v7533_v53  ;;  %v7536_v32 = vadd.f32 1.0, %v10629_v17  ;;  %v13835_v15 = vpop.f32.mrb[44].mxu1  ;;  %v5102_v63 = vsub.f32 0.0, %v13813_v10  ;;  %v7442_v11 = vsub.f32 0.0, %v13816_v41 }
 0x430   : > { %v10633_v62 = vpop.eup %10632  ;;  %10652 = vrcp.f32 %v5196_v5  ;;  %v5194_v39 = vadd.f32 1.0, %v10631_v52  ;;  %14875 = vst [vmem:[#allocation23_spill] sm:$0xff] %v13833_v42  ;;  %v13839_v30 = vpop.f32.mrb[44].mxu0  ;;  %v5107_v53 = vsub.f32 0.0, %v13821_v28  ;;  %v13845_v4 = vadd.f32 %v9633_v0, %v13634_v3 }
 0x431   : > { %v10635_v46 = vpop.eup %10634  ;;  %10654 = vrcp.f32 %v7536_v32  ;;  %v7534_v61 = vadd.f32 1.0, %v10633_v62  ;;  %v13841_v29 = vpop.f32.mrb[45].mxu1  ;;  %v7447_v62 = vsub.f32 0.0, %v13824_v37  ;;  %v5105_v38 = vsub.f32 0.0, %v13827_v58 }
 0x432   : > { %v10637_v54 = vpop.eup %10636  ;;  %10656 = vrcp.f32 %v5194_v39  ;;  %v5199_v18 = vadd.f32 1.0, %v10635_v46  ;;  %v13847_v17 = vpop.f32.mrb[45].mxu0  ;;  %v7445_v44 = vsub.f32 0.0, %v13830_v56  ;;  %v5108_v40 = vsub.f32 0.0, %v13833_v42 }
 0x433   : > { %v13849_v5 = vpop.f32.mrb[46].mxu1  ;;  %v10639_v52 = vpop.eup %10638  ;;  %10658 = vrcp.f32 %v7534_v61  ;;  %v7539_v32 = vadd.f32 1.0, %v10637_v54  ;;  %v5139_v21 = vmul.f32 1.442695, %v5102_v63  ;;  %v7479_v50 = vmul.f32 1.442695, %v7442_v11 }
 0x434   : > { %v13853_v22 = vpop.f32.mrb[46].mxu0  ;;  %v13855_v39 = vpop.f32.mrb[47].mxu1  ;;  %10660 = vrcp.f32 %v5199_v18  ;;  %v5197_v0 = vadd.f32 1.0, %v10639_v52  ;;  %v5149_v1 = vmul.f32 1.442695, %v5107_v53  ;;  %v7448_v18 = vsub.f32 0.0, %v13845_v4 }
 0x435   : > { %v10641_v46 = vpop.eup %10640  ;;  %v13859_v31 = vpop.f32.mrb[47].mxu0  ;;  %10662 = vrcp.f32 %v7539_v32  ;;  %v7489_v57 = vmul.f32 1.442695, %v7447_v62  ;;  %v5145_v43 = vmul.f32 1.442695, %v5105_v38  ;;  %v13870_v11 = vadd.f32 %v13623_v12, %v13800_v36 }
 0x436   : > { %v10643_v61 = vpop.eup %10642  ;;  %v7537_v54 = vadd.f32 1.0, %v10641_v46  ;;  %10664 = vrcp.f32 %v5197_v0  ;;  %v13864_v32 = vmul.f32 1.442695, %v7445_v44  ;;  %v13866_v63 = vmul.f32 1.442695, %v5108_v40 }
 0x437   : > { %v10645_v49 = vpop.eup %10644  ;;  %v5200_v25 = vadd.f32 1.0, %v10643_v61  ;;  %v13872_v46 = vpop.f32.mrb[48].mxu1  ;;  %v13887_v44 = vmul.f32 1.442695, %v7448_v18  ;;  %v13907_v18 = vadd.f32 %v13835_v15, %v13623_v12 }
 0x438   : > { %v10647_v52 = vpop.eup %10646  ;;  %v5259_v6 = vmul.f32 %v10645_v49, %v13661_v60  ;;  %10666 = vrcp.f32 %v7537_v54  ;;  %v13884_v49 = vpop.f32.mrb[49].mxu1 }
 0x439   : > { %v10649_v42 = vpop.eup %10648  ;;  %10668 = vrcp.f32 %v5200_v25  ;;  %v7599_v38 = vmul.f32 %v10647_v52, %v13670_v48  ;;  %v13882_v25 = vpop.f32.mrb[48].mxu0 }
 0x43a   : > { %v10651_v53 = vpop.eup %10650  ;;  %v5291_v0 = vadd.f32 %v5259_v6, %v13629_v20  ;;  %v5257_v60 = vmul.f32 %v10649_v42, %v13673_v51  ;;  %10670 = vpow2.f32 %v13818_v24  ;;  %v13891_v20 = vadd.f32 %v13634_v3, %v13810_v8  ;;  %v13893_v6 = vpop.f32.mrb[49].mxu0 }
 0x43b   : > { %v10653_v40 = vpop.eup %10652  ;;  %v7597_v36 = vmul.f32 %v10651_v53, %v13679_v33  ;;  %10672 = vpow2.f32 %v5139_v21  ;;  %v13895_v48 = vpop.f32.mrb[50].mxu1  ;;  %v5106_v8 = vsub.f32 0.0, %v13870_v11 }
 0x43c   : > { %v10655_v51 = vpop.eup %10654  ;;  %v7631_v24 = vadd.f32 %v7599_v38, %v5291_v0  ;;  %v5289_v42 = vadd.f32 %v5257_v60, %v13640_v14  ;;  %v5260_v62 = vmul.f32 %v10653_v40, %v13682_v55  ;;  %10674 = vpow2.f32 %v7479_v50  ;;  %v13899_v61 = vpop.f32.mrb[50].mxu0 }
 0x43d   : > { %v13901_v33 = vpop.f32.mrb[51].mxu1  ;;  %v10657_v21 = vpop.eup %10656  ;;  %v7600_v54 = vmul.f32 %v10655_v51, %v13689_v19  ;;  %10676 = vpow2.f32 %v5149_v1  ;;  %v7446_v1 = vsub.f32 0.0, %v13891_v20  ;;  %v13917_v60 = vadd.f32 %v13839_v30, %v13634_v3 }
 0x43e   : > { %v13909_v52 = vpop.f32.mrb[51].mxu0  ;;  %v10659_v14 = vpop.eup %10658  ;;  %v7663_v55 = vmul.f32 0.33333334, %v7631_v24  ;;  %v7629_v50 = vadd.f32 %v7597_v36, %v5289_v42  ;;  %v5292_v53 = vadd.f32 %v5260_v62, %v13644_v27  ;;  %v5258_v0 = vmul.f32 %v10657_v21, %v13692_v35 }
 0x43f   : > { %v10661_v38 = vpop.eup %10660  ;;  %v7598_v19 = vmul.f32 %v10659_v14, %v13699_v7  ;;  %10678 = vpow2.f32 %v7489_v57  ;;  %v13927_v51 = vmul.f32 1.442695, %v5106_v8  ;;  %v5111_v30 = vsub.f32 0.0, %v13907_v18  ;;  %v13930_v24 = vpop.f32.mrb[52].mxu1 }
 0x440   : > { %v10663_v15 = vpop.eup %10662  ;;  %7696 = vst.msk [vmem:[%s13920_s17 + $0x10] sm:$0xff] %vm7693_vm7, %v7663_v55  ;;  %v7661_v27 = vmul.f32 0.33333334, %v7629_v50  ;;  %v7632_v40 = vadd.f32 %v7600_v54, %v5292_v53  ;;  %v5290_v35 = vadd.f32 %v5258_v0, %v13648_v16  ;;  %v5263_v7 = vmul.f32 %v10661_v38, %v13725_v23  ;;  %v13936_v54 = vpop.f32.mrb[52].mxu0  ;;  %v14876_v38 = vld [vmem:[#allocation6_spill] sm:$0xff] }
 0x441   : > { %v10665_v57 = vpop.eup %10664  ;;  %v7603_v36 = vmul.f32 %v10663_v15, %v13730_v9  ;;  %10680 = vpow2.f32 %v5145_v43  ;;  %v13938_v9 = vpop.f32.mrb[53].mxu1  ;;  %v13942_v14 = vmul.f32 1.442695, %v7446_v1  ;;  %v7451_v55 = vsub.f32 0.0, %v13917_v60 }
 0x442   : > { %v10667_v42 = vpop.eup %10666  ;;  %7694 = vst.msk [vmem:[%s13920_s17] sm:$0xff] %vm7693_vm7, %v7661_v27  ;;  %v7664_v62 = vmul.f32 0.33333334, %v7632_v40  ;;  %v7630_v21 = vadd.f32 %v7598_v19, %v5290_v35  ;;  %v5295_v16 = vadd.f32 %v5263_v7, %v13654_v45  ;;  %v5261_v23 = vmul.f32 %v10665_v57, %v13733_v13  ;;  %v13945_v50 = vpop.f32.mrb[53].mxu0 }
 0x443   : > { %v10669_v43 = vpop.eup %10668  ;;  %v7601_v8 = vmul.f32 %v10667_v42, %v13739_v59  ;;  %10682 = vpow2.f32 %v13864_v32  ;;  %v13947_v53 = vpop.f32.mrb[54].mxu1  ;;  %v13958_v40 = vmul.f32 1.442695, %v5111_v30  ;;  %v13962_v35 = vadd.f32 %v13623_v12, %v13841_v29  ;;  %v14877_v42 = vld [vmem:[#allocation34_spill] sm:$0xff] }
 0x444   : > { %v10671_v45 = vpop.eup %10670  ;;  %7697 = vst.msk [vmem:[%s13920_s17 + $0x18] sm:$0xff] %vm7693_vm7, %v7664_v62  ;;  %v7662_v13 = vmul.f32 0.33333334, %v7630_v21  ;;  %v7635_v0 = vadd.f32 %v7603_v36, %v5295_v16  ;;  %v5293_v19 = vadd.f32 %v5261_v23, %v14876_v38  ;;  %v5264_v59 = vmul.f32 %v10669_v43, %v13742_v47  ;;  %v13953_v15 = vpop.f32.mrb[54].mxu0 }
 0x445   : > { %v13955_v32 = vpop.f32.mrb[55].mxu1  ;;  %v10673_v1 = vpop.eup %10672  ;;  %v7540_v27 = vadd.f32 1.0, %v10671_v45  ;;  %10684 = vpow2.f32 %v13866_v63  ;;  %v13973_v30 = vadd.f32 %v13634_v3, %v13847_v17  ;;  %v13977_v29 = vadd.f32 %v13849_v5, %v13623_v12 }
 0x446   : > { %v13964_v7 = vpop.f32.mrb[55].mxu0  ;;  %v10675_v57 = vpop.eup %10674  ;;  %7695 = vst.msk [vmem:[%s13920_s17 + $0x8] sm:$0xff] %vm7693_vm7, %v7662_v13  ;;  %v7667_v47 = vmul.f32 0.33333334, %v7635_v0  ;;  %v7633_v36 = vadd.f32 %v7601_v8, %v5293_v19  ;;  %v13969_v62 = vadd.f32 %v5264_v59, %v14877_v42  ;;  %v5198_v21 = vadd.f32 1.0, %v10673_v1 }
 0x447   : > { %v10677_v16 = vpop.eup %10676  ;;  %10686 = vrcp.f32 %v7540_v27  ;;  %v7538_v63 = vadd.f32 1.0, %v10675_v57  ;;  %v13983_v8 = vadd.f32 %v13853_v22, %v13634_v3  ;;  %v5109_v13 = vsub.f32 0.0, %v13962_v35  ;;  %v13994_v0 = vpop.f32.mrb[56].mxu1 }
 0x448   : > { %7700 = vst.msk [vmem:[%s13920_s17 + $0x30] sm:$0xff] %vm7693_vm7, %v7667_v47  ;;  %v7665_v23 = vmul.f32 0.33333334, %v7633_v36  ;;  %10688 = vrcp.f32 %v5198_v21  ;;  %v5203_v43 = vadd.f32 1.0, %v10677_v16  ;;  %v13988_v17 = vadd.f32 %v13623_v12, %v13855_v39  ;;  %v14006_v39 = vpop.f32.mrb[56].mxu0  ;;  %v14008_v59 = vpop.f32.mrb[57].mxu1 }
 0x449   : > { %v10679_v45 = vpop.eup %10678  ;;  %10690 = vrcp.f32 %v7538_v63  ;;  %v13992_v5 = vadd.f32 %v13634_v3, %v13859_v31  ;;  %v14000_v22 = vadd.f32 %v13872_v46, %v13623_v12  ;;  %v14004_v19 = vadd.f32 %v13882_v25, %v13634_v3  ;;  %14879 = vst [vmem:[#allocation26_spill] sm:$0xff] %v14008_v59  ;;  %v14017_v46 = vpop.f32.mrb[57].mxu0 }
 0x44a   : > { %7698 = vst.msk [vmem:[%s13920_s17 + $0x20] sm:$0xff] %vm7693_vm7, %v7665_v23  ;;  %10692 = vrcp.f32 %v5203_v43  ;;  %v7543_v38 = vadd.f32 1.0, %v10679_v45  ;;  %v7449_v1 = vsub.f32 0.0, %v13973_v30  ;;  %v5112_v27 = vsub.f32 0.0, %v13977_v29  ;;  %14881 = vst [vmem:[#allocation31_spill] sm:$0xff] %v14017_v46  ;;  %v14019_v47 = vpop.f32.mrb[58].mxu1 }
 0x44b   : > { %14878 = vst [vmem:[#allocation24_spill] sm:$0xff] %v14004_v19  ;;  %v10681_v31 = vpop.eup %10680  ;;  %10694 = vpow2.f32 %v13887_v44  ;;  %v14015_v57 = vadd.f32 %v13623_v12, %v13884_v49  ;;  %14882 = vst [vmem:[#allocation35_spill] sm:$0xff] %v14019_v47  ;;  %v7497_v36 = vmul.f32 1.442695, %v7451_v55  ;;  %v7452_v42 = vsub.f32 0.0, %v13983_v8  ;;  %v14022_v21 = vpop.f32.mrb[58].mxu0 }
 0x44c   : > { %10696 = vrcp.f32 %v7543_v38  ;;  %v5201_v25 = vadd.f32 1.0, %v10681_v31  ;;  %14883 = vst [vmem:[#allocation36_spill] sm:$0xff] %v14022_v21  ;;  %v14024_v44 = vpop.f32.mrb[59].mxu1  ;;  %v5153_v63 = vmul.f32 1.442695, %v5109_v13  ;;  %v5110_v49 = vsub.f32 0.0, %v13988_v17 }
 0x44d   : > { %14880 = vst [vmem:[#allocation28_spill] sm:$0xff] %v14015_v57  ;;  %14884 = vst [vmem:[#allocation37_spill] sm:$0xff] %v14024_v44  ;;  %v10683_v16 = vpop.eup %10682  ;;  %10698 = vpow2.f32 %v13927_v51  ;;  %v7450_v23 = vsub.f32 0.0, %v13992_v5  ;;  %v14029_v43 = vpop.f32.mrb[59].mxu0  ;;  %v5115_v55 = vsub.f32 0.0, %v14000_v22  ;;  %v7455_v38 = vsub.f32 0.0, %v14004_v19 }
 0x44e   : > { %14885 = vst [vmem:[#allocation12_spill] sm:$0xff] %v14029_v43  ;;  %10700 = vrcp.f32 %v5201_v25  ;;  %v7541_v45 = vadd.f32 1.0, %v10683_v16  ;;  %v7493_v44 = vmul.f32 1.442695, %v7449_v1  ;;  %v5159_v21 = vmul.f32 1.442695, %v5112_v27 }
 0x44f   : > { %v10685_v31 = vpop.eup %10684  ;;  %10702 = vpow2.f32 %v13942_v14  ;;  %v5113_v51 = vsub.f32 0.0, %v14015_v57  ;;  %v7499_v47 = vmul.f32 1.442695, %v7452_v42  ;;  %v14037_v46 = vadd.f32 %v13634_v3, %v13893_v6  ;;  %v14886_v16 = vld [vmem:[#allocation17_spill] sm:$0xff]  ;;  %v14887_v43 = vld [vmem:[#allocation38_spill] sm:$0xff]  ;;  %v14044_v1 = vpop.f32.mrb[60].mxu1 }
 0x450   : > { %10704 = vrcp.f32 %v7541_v45  ;;  %v5204_v13 = vadd.f32 1.0, %v10685_v31  ;;  %v14041_v59 = vmul.f32 %v14887_v43, %v14886_v16  ;;  %v5155_v19 = vmul.f32 1.442695, %v5110_v49  ;;  %v14051_v6 = vpop.f32.mrb[60].mxu0  ;;  %v14053_v57 = vpop.f32.mrb[61].mxu1 }
 0x451   : > { %v10687_v25 = vpop.eup %10686  ;;  %10706 = vpow2.f32 %v13958_v40  ;;  %v7495_v14 = vmul.f32 1.442695, %v7450_v23  ;;  %v14047_v42 = vmul.f32 1.442695, %v5115_v55  ;;  %v14049_v31 = vmul.f32 1.442695, %v7455_v38 }
 0x452   : > { %14888 = vst [vmem:[#allocation44_spill] sm:$0xff] %v14041_v59  ;;  %v10689_v27 = vpop.eup %10688  ;;  %v7604_v45 = vmul.f32 %v10687_v25, %v13757_v26  ;;  %10708 = vrcp.f32 %v5204_v13  ;;  %v14056_v40 = vmul.f32 1.442695, %v5113_v51  ;;  %v14060_v49 = vadd.f32 %v13895_v48, %v13623_v12  ;;  %v14062_v26 = vpop.f32.mrb[61].mxu0 }
 0x453   : > { %v10691_v43 = vpop.eup %10690  ;;  %v5262_v16 = vmul.f32 %v10689_v27, %v13813_v10  ;;  %10710 = vpow2.f32 %v7497_v36  ;;  %v14064_v23 = vpop.f32.mrb[62].mxu1  ;;  %v7453_v13 = vsub.f32 0.0, %v14037_v46  ;;  %v14070_v10 = vadd.f32 %v13899_v61, %v13634_v3 }
 0x454   : > { %14889 = vst [vmem:[#allocation67_spill] sm:$0xff] %v14064_v23  ;;  %v10693_v55 = vpop.eup %10692  ;;  %v7636_v38 = vadd.f32 %v7604_v45, %v13969_v62  ;;  %10712 = vpow2.f32 %v5153_v63  ;;  %v14072_v36 = vpop.f32.mrb[62].mxu0  ;;  %v7602_v27 = vmul.f32 %v10691_v43, %v13816_v41  ;;  %v14083_v61 = vadd.f32 %v13623_v12, %v13901_v33 }
 0x455   : > { %14890 = vst [vmem:[#allocation42_spill] sm:$0xff] %v14072_v36  ;;  %v14074_v51 = vpop.f32.mrb[63].mxu1  ;;  %v10695_v48 = vpop.eup %10694  ;;  %v5294_v25 = vadd.f32 %v5262_v16, %v13712_v34  ;;  %v5267_v59 = vmul.f32 %v10693_v55, %v13821_v28  ;;  %10714 = vpow2.f32 %v7493_v44  ;;  %v5116_v44 = vsub.f32 0.0, %v14060_v49 }
 0x456   : > { %14891 = vst [vmem:[#allocation70_spill] sm:$0xff] %v14074_v51  ;;  %v14079_v62 = vpop.f32.mrb[63].mxu0  ;;  %v10697_v63 = vpop.eup %10696  ;;  %v7668_v45 = vmul.f32 0.33333334, %v7636_v38  ;;  %v7544_v23 = vadd.f32 1.0, %v10695_v48  ;;  %10716 = vpow2.f32 %v5159_v21  ;;  %v14092_v21 = vadd.f32 %v13634_v3, %v13909_v52 }
 0x457   : > { %v10699_v51 = vpop.eup %10698  ;;  %v7634_v36 = vadd.f32 %v7602_v27, %v5294_v25  ;;  %v5299_v34 = vadd.f32 %v5267_v59, %v13716_v2  ;;  %v7607_v16 = vmul.f32 %v10697_v63, %v13824_v37  ;;  %10718 = vpow2.f32 %v7499_v47  ;;  %v14893_v63 = vld [vmem:[#allocation23_spill] sm:$0xff] }
 0x458   : > { %v10701_v41 = vpop.eup %10700  ;;  %7701 = vst.msk [vmem:[%s13920_s17 + $0x38] sm:$0xff] %vm7693_vm7, %v7668_v45  ;;  %10720 = vrcp.f32 %v7544_v23  ;;  %v5202_v28 = vadd.f32 1.0, %v10699_v51  ;;  %v14095_v47 = vmul.f32 1.442695, %v7453_v13  ;;  %v14099_v23 = vadd.f32 %v13930_v24, %v13623_v12  ;;  %v14892_v51 = vld [vmem:[#allocation41_spill] sm:$0xff] }
 0x459   : > { %v10703_v33 = vpop.eup %10702  ;;  %v7666_v43 = vmul.f32 0.33333334, %v7634_v36  ;;  %v7639_v55 = vadd.f32 %v7607_v16, %v5299_v34  ;;  %v5265_v2 = vmul.f32 %v10701_v41, %v13827_v58  ;;  %10722 = vpow2.f32 %v5155_v19 }
 0x45a   : > { %v10705_v37 = vpop.eup %10704  ;;  %10724 = vrcp.f32 %v5202_v28  ;;  %v7542_v59 = vadd.f32 1.0, %v10703_v33  ;;  %v7456_v25 = vsub.f32 0.0, %v14070_v10  ;;  %v14108_v13 = vadd.f32 %v13936_v54, %v13634_v3  ;;  %v14894_v33 = vld [vmem:[#allocation10_spill] sm:$0xff] }
 0x45b   : > { %v10707_v38 = vpop.eup %10706  ;;  %7699 = vst.msk [vmem:[%s13920_s17 + $0x28] sm:$0xff] %vm7693_vm7, %v7666_v43  ;;  %v7671_v52 = vmul.f32 0.33333334, %v7639_v55  ;;  %v5297_v36 = vadd.f32 %v5265_v2, %v14892_v51  ;;  %v7605_v48 = vmul.f32 %v10705_v37, %v13830_v56  ;;  %10726 = vpow2.f32 %v7495_v14 }
 0x45c   : > { %v10709_v58 = vpop.eup %10708  ;;  %10728 = vrcp.f32 %v7542_v59  ;;  %v5207_v19 = vadd.f32 1.0, %v10707_v38  ;;  %v5114_v56 = vsub.f32 0.0, %v14083_v61  ;;  %v7454_v16 = vsub.f32 0.0, %v14092_v21 }
 0x45d   : > { %v10711_v24 = vpop.eup %10710  ;;  %7704 = vst.msk [vmem:[%s13920_s17 + $0x50] sm:$0xff] %vm7693_vm7, %v7671_v52  ;;  %v7637_v27 = vadd.f32 %v7605_v48, %v5297_v36  ;;  %v5268_v45 = vmul.f32 %v10709_v58, %v14893_v63  ;;  %10730 = vpow2.f32 %v14047_v42  ;;  %v5119_v41 = vsub.f32 0.0, %v14099_v23 }
 0x45e   : > { %v10713_v14 = vpop.eup %10712  ;;  %10732 = vrcp.f32 %v5207_v19  ;;  %v7547_v34 = vadd.f32 1.0, %v10711_v24  ;;  %v5167_v37 = vmul.f32 1.442695, %v5116_v44  ;;  %v7459_v59 = vsub.f32 0.0, %v14108_v13 }
 0x45f   : > { %v10715_v54 = vpop.eup %10714  ;;  %v7669_v28 = vmul.f32 0.33333334, %v7637_v27  ;;  %v5300_v43 = vadd.f32 %v5268_v45, %v14894_v33  ;;  %v5205_v55 = vadd.f32 1.0, %v10713_v14  ;;  %10734 = vpow2.f32 %v14049_v31 }
 0x460   : > { %v10717_v2 = vpop.eup %10716  ;;  %10736 = vrcp.f32 %v7547_v34  ;;  %v7545_v42 = vadd.f32 1.0, %v10715_v54  ;;  %v7507_v51 = vmul.f32 1.442695, %v7456_v25  ;;  %v14124_v36 = vadd.f32 %v13623_v12, %v13938_v9 }
 0x461   : > { %v10719_v38 = vpop.eup %10718  ;;  %7702 = vst.msk [vmem:[%s13920_s17 + $0x40] sm:$0xff] %vm7693_vm7, %v7669_v28  ;;  %10738 = vrcp.f32 %v5205_v55  ;;  %v5208_v52 = vadd.f32 1.0, %v10717_v2  ;;  %v5163_v31 = vmul.f32 1.442695, %v5114_v56  ;;  %v14128_v19 = vadd.f32 %v13634_v3, %v13945_v50  ;;  %v14895_v55 = vld [vmem:[#allocation33_spill] sm:$0xff] }
 0x462   : > { %v10721_v48 = vpop.eup %10720  ;;  %10740 = vrcp.f32 %v7545_v42  ;;  %v7548_v58 = vadd.f32 1.0, %v10719_v38  ;;  %v7503_v27 = vmul.f32 1.442695, %v7454_v16  ;;  %v5173_v63 = vmul.f32 1.442695, %v5119_v41 }
 0x463   : > { %v10723_v44 = vpop.eup %10722  ;;  %v7608_v24 = vmul.f32 %v10721_v48, %v13845_v4  ;;  %10742 = vrcp.f32 %v5208_v52  ;;  %v7513_v14 = vmul.f32 1.442695, %v7459_v59  ;;  %v14133_v9 = vadd.f32 %v13947_v53, %v13623_v12 }
 0x464   : > { %v10725_v45 = vpop.eup %10724  ;;  %10744 = vrcp.f32 %v7548_v58  ;;  %v5206_v25 = vadd.f32 1.0, %v10723_v44  ;;  %v5117_v50 = vsub.f32 0.0, %v14124_v36  ;;  %v7457_v41 = vsub.f32 0.0, %v14128_v19 }
 0x465   : > { %v10727_v34 = vpop.eup %10726  ;;  %v7640_v56 = vadd.f32 %v7608_v24, %v5300_v43  ;;  %v5266_v54 = vmul.f32 %v10725_v45, %v13870_v11  ;;  %10746 = vpow2.f32 %v14056_v40  ;;  %v14141_v28 = vadd.f32 %v13953_v15, %v13634_v3  ;;  %v14896_v24 = vld [vmem:[#allocation9_spill] sm:$0xff] }
 0x466   : > { %v10729_v4 = vpop.eup %10728  ;;  %10748 = vrcp.f32 %v5206_v25  ;;  %v7546_v16 = vadd.f32 1.0, %v10727_v34  ;;  %v5120_v42 = vsub.f32 0.0, %v14133_v9  ;;  %v14149_v59 = vadd.f32 %v13623_v12, %v13955_v32 }
 0x467   : > { %v10731_v53 = vpop.eup %10730  ;;  %v7672_v33 = vmul.f32 0.33333334, %v7640_v56  ;;  %v5298_v43 = vadd.f32 %v5266_v54, %v14895_v55  ;;  %v7606_v11 = vmul.f32 %v10729_v4, %v13891_v20  ;;  %10750 = vpow2.f32 %v14095_v47 }
 0x468   : > { %v10733_v40 = vpop.eup %10732  ;;  %10752 = vrcp.f32 %v7546_v16  ;;  %v5211_v2 = vadd.f32 1.0, %v10731_v53  ;;  %v14156_v20 = vadd.f32 %v13634_v3, %v13964_v7  ;;  %v5169_v58 = vmul.f32 1.442695, %v5117_v50  ;;  %v14897_v16 = vld [vmem:[#allocation57_spill] sm:$0xff] }
 0x469   : > { %v10735_v38 = vpop.eup %10734  ;;  %7705 = vst.msk [vmem:[%s13920_s17 + $0x58] sm:$0xff] %vm7693_vm7, %v7672_v33  ;;  %v7638_v15 = vadd.f32 %v7606_v11, %v5298_v43  ;;  %v5271_v52 = vmul.f32 %v10733_v40, %v13907_v18  ;;  %10754 = vpow2.f32 %v5167_v37  ;;  %v7460_v44 = vsub.f32 0.0, %v14141_v28  ;;  %v14898_v11 = vld [vmem:[#allocation58_spill] sm:$0xff] }
 0x46a   : > { %v10737_v47 = vpop.eup %10736  ;;  %10756 = vrcp.f32 %v5211_v2  ;;  %v7551_v48 = vadd.f32 1.0, %v10735_v38  ;;  %v7509_v3 = vmul.f32 1.442695, %v7457_v41  ;;  %v5175_v7 = vmul.f32 1.442695, %v5120_v42 }
 0x46b   : > { %v10739_v12 = vpop.eup %10738  ;;  %v7670_v32 = vmul.f32 0.33333334, %v7638_v15  ;;  %v5303_v45 = vadd.f32 %v5271_v52, %v14896_v24  ;;  %v7611_v25 = vmul.f32 %v10737_v47, %v13917_v60  ;;  %10758 = vpow2.f32 %v7507_v51  ;;  %v14899_v47 = vld [vmem:[#allocation54_spill] sm:$0xff] }
 0x46c   : > { %v10741_v18 = vpop.eup %10740  ;;  %v5269_v37 = vmul.f32 %v10739_v12, %v13962_v35  ;;  %10760 = vrcp.f32 %v7551_v48  ;;  %v5118_v54 = vsub.f32 0.0, %v14149_v59  ;;  %v7458_v50 = vsub.f32 0.0, %v14156_v20 }
 0x46d   : > { %v10743_v34 = vpop.eup %10742  ;;  %7703 = vst.msk [vmem:[%s13920_s17 + $0x48] sm:$0xff] %vm7693_vm7, %v7670_v32  ;;  %v7643_v56 = vadd.f32 %v7611_v25, %v5303_v45  ;;  %10762 = vpow2.f32 %v5163_v31  ;;  %v7609_v51 = vmul.f32 %v10741_v18, %v13973_v30  ;;  %v7515_v55 = vmul.f32 1.442695, %v7460_v44  ;;  %v14900_v18 = vld [vmem:[#allocation26_spill] sm:$0xff] }
 0x46e   : > { %v10745_v4 = vpop.eup %10744  ;;  %v5301_v60 = vadd.f32 %v5269_v37, %v14897_v16  ;;  %v5272_v35 = vmul.f32 %v10743_v34, %v13977_v29  ;;  %10764 = vpow2.f32 %v7503_v27  ;;  %v5171_v29 = vmul.f32 1.442695, %v5118_v54 }
 0x46f   : > { %v10747_v41 = vpop.eup %10746  ;;  %v7675_v53 = vmul.f32 0.33333334, %v7643_v56  ;;  %v7612_v33 = vmul.f32 %v10745_v4, %v13983_v8  ;;  %10766 = vpow2.f32 %v5173_v63  ;;  %v14174_v27 = vmul.f32 1.442695, %v7458_v50  ;;  %v14901_v56 = vld [vmem:[#allocation31_spill] sm:$0xff]  ;;  %v14903_v4 = vld [vmem:[#allocation48_spill] sm:$0xff] }
 0x470   : > { %v10749_v31 = vpop.eup %10748  ;;  %v7641_v43 = vadd.f32 %v7609_v51, %v5301_v60  ;;  %v5304_v40 = vadd.f32 %v5272_v35, %v14898_v11  ;;  %v5209_v2 = vadd.f32 1.0, %v10747_v41  ;;  %10768 = vpow2.f32 %v7513_v14  ;;  %v14904_v60 = vld [vmem:[#allocation24_spill] sm:$0xff] }
 0x471   : > { %v10751_v42 = vpop.eup %10750  ;;  %7708 = vst.msk [vmem:[%s13920_s17 + $0x70] sm:$0xff] %vm7693_vm7, %v7675_v53  ;;  %v5270_v30 = vmul.f32 %v10749_v31, %v13988_v17  ;;  %10770 = vpow2.f32 %v5169_v58  ;;  %v14181_v17 = vld [vmem:[%s14417_s2 + $0x1] ss:$0 sm:$0xff] }
 0x472   : > { %v10753_v38 = vpop.eup %10752  ;;  %v7673_v8 = vmul.f32 0.33333334, %v7641_v43  ;;  %v7644_v63 = vadd.f32 %v7612_v33, %v5304_v40  ;;  %10772 = vrcp.f32 %v5209_v2  ;;  %v7549_v15 = vadd.f32 1.0, %v10751_v42  ;;  %v14905_v40 = vld [vmem:[#allocation36_spill] sm:$0xff] }
 0x473   : > { %v10755_v52 = vpop.eup %10754  ;;  %v5302_v48 = vadd.f32 %v5270_v30, %v14899_v47  ;;  %v7610_v14 = vmul.f32 %v10753_v38, %v13992_v5  ;;  %10774 = vpow2.f32 %v7509_v3  ;;  %v14185_v58 = vadd.f32 %v14181_v17, %v13994_v0  ;;  %v14192_v5 = vld [vmem:[%s14417_s2 + $0x2] ss:$0 sm:$0xff] }
 0x474   : > { %v10757_v44 = vpop.eup %10756  ;;  %7706 = vst.msk [vmem:[%s13920_s17 + $0x60] sm:$0xff] %vm7693_vm7, %v7673_v8  ;;  %v7676_v12 = vmul.f32 0.33333334, %v7644_v63  ;;  %10776 = vrcp.f32 %v7549_v15  ;;  %v5212_v32 = vadd.f32 1.0, %v10755_v52  ;;  %v14196_v24 = vadd.f32 %v14192_v5, %v14006_v39  ;;  %v14902_v39 = vld [vmem:[#allocation35_spill] sm:$0xff] }
 0x475   : > { %v10759_v45 = vpop.eup %10758  ;;  %v7642_v25 = vadd.f32 %v7610_v14, %v5302_v48  ;;  %v5275_v0 = vmul.f32 %v10757_v44, %v14000_v22  ;;  %10778 = vpow2.f32 %v5175_v7  ;;  %v14201_v37 = vadd.f32 %v14181_v17, %v14900_v18  ;;  %v14906_v14 = vld [vmem:[#allocation37_spill] sm:$0xff] }
 0x476   : > { %v10761_v3 = vpop.eup %10760  ;;  %7709 = vst.msk [vmem:[%s13920_s17 + $0x78] sm:$0xff] %vm7693_vm7, %v7676_v12  ;;  %10780 = vrcp.f32 %v5212_v32  ;;  %v7552_v34 = vadd.f32 1.0, %v10759_v45  ;;  %v14207_v54 = vadd.f32 %v14192_v5, %v14901_v56  ;;  %v14211_v50 = vadd.f32 %v14181_v17, %v14902_v39  ;;  %v14907_v32 = vld [vmem:[#allocation28_spill] sm:$0xff] }
 0x477   : > { %v10763_v22 = vpop.eup %10762  ;;  %v7674_v7 = vmul.f32 0.33333334, %v7642_v25  ;;  %v5307_v16 = vadd.f32 %v5275_v0, %v14903_v4  ;;  %v7615_v51 = vmul.f32 %v10761_v3, %v14904_v60  ;;  %10782 = vpow2.f32 %v7515_v55 }
 0x478   : > { %v10765_v35 = vpop.eup %10764  ;;  %10784 = vrcp.f32 %v7552_v34  ;;  %v5210_v41 = vadd.f32 1.0, %v10763_v22  ;;  %v5123_v53 = vsub.f32 0.0, %v14185_v58  ;;  %v7463_v33 = vsub.f32 0.0, %v14196_v24  ;;  %v14908_v22 = vld [vmem:[#allocation56_spill] sm:$0xff] }
 0x479   : > { %v10767_v31 = vpop.eup %10766  ;;  %7707 = vst.msk [vmem:[%s13920_s17 + $0x68] sm:$0xff] %vm7693_vm7, %v7674_v7  ;;  %v7647_v43 = vadd.f32 %v7615_v51, %v5307_v16  ;;  %v7550_v11 = vadd.f32 1.0, %v10765_v35  ;;  %10786 = vpow2.f32 %v5171_v29  ;;  %v14221_v2 = vadd.f32 %v14192_v5, %v14905_v40 }
 0x47a   : > { %v10769_v42 = vpop.eup %10768  ;;  %10788 = vrcp.f32 %v5210_v41  ;;  %v5215_v55 = vadd.f32 1.0, %v10767_v31  ;;  %v5121_v30 = vsub.f32 0.0, %v14201_v37  ;;  %v7461_v38 = vsub.f32 0.0, %v14207_v54  ;;  %v14909_v41 = vld [vmem:[#allocation12_spill] sm:$0xff] }
 0x47b   : > { %v10771_v8 = vpop.eup %10770  ;;  %v7679_v63 = vmul.f32 0.33333334, %v7647_v43  ;;  %10790 = vrcp.f32 %v7550_v11  ;;  %v7555_v15 = vadd.f32 1.0, %v10769_v42  ;;  %v5124_v52 = vsub.f32 0.0, %v14211_v50 }
 0x47c   : > { %v10773_v47 = vpop.eup %10772  ;;  %10792 = vrcp.f32 %v5215_v55  ;;  %v5213_v29 = vadd.f32 1.0, %v10771_v8  ;;  %v5181_v48 = vmul.f32 1.442695, %v5123_v53  ;;  %v14228_v44 = vadd.f32 %v14181_v17, %v14906_v14 }
 0x47d   : > { %v10775_v12 = vpop.eup %10774  ;;  %7712 = vst.msk [vmem:[%s13920_s17 + $0x90] sm:$0xff] %vm7693_vm7, %v7679_v63  ;;  %v5273_v45 = vmul.f32 %v10773_v47, %v14907_v32  ;;  %10794 = vrcp.f32 %v7555_v15  ;;  %v7521_v25 = vmul.f32 1.442695, %v7463_v33  ;;  %v7464_v0 = vsub.f32 0.0, %v14221_v2 }
 0x47e   : > { %v10777_v18 = vpop.eup %10776  ;;  %10796 = vrcp.f32 %v5213_v29  ;;  %v7553_v3 = vadd.f32 1.0, %v10775_v12  ;;  %v5177_v34 = vmul.f32 1.442695, %v5121_v30  ;;  %v7517_v56 = vmul.f32 1.442695, %v7461_v38  ;;  %v14910_v38 = vld [vmem:[#allocation53_spill] sm:$0xff] }
 0x47f   : > { %v10779_v39 = vpop.eup %10778  ;;  %v5305_v7 = vadd.f32 %v5273_v45, %v14908_v22  ;;  %v7613_v4 = vmul.f32 %v10777_v18, %v14037_v46  ;;  %10798 = vpow2.f32 %v14174_v27  ;;  %v5183_v16 = vmul.f32 1.442695, %v5124_v52 }
 0x480   : > { %v10781_v60 = vpop.eup %10780  ;;  %10800 = vrcp.f32 %v7553_v3  ;;  %v5216_v51 = vadd.f32 1.0, %v10779_v39  ;;  %v5122_v35 = vsub.f32 0.0, %v14228_v44  ;;  %v14240_v53 = vadd.f32 %v14192_v5, %v14909_v41 }
 0x481   : > { %v10783_v33 = vpop.eup %10782  ;;  %v7645_v31 = vadd.f32 %v7613_v4, %v5305_v7  ;;  %v5276_v43 = vmul.f32 %v10781_v60, %v14060_v49  ;;  %10802 = vpow2.f32 %v5181_v48  ;;  %v7523_v11 = vmul.f32 1.442695, %v7464_v0  ;;  %v14912_v7 = vld [vmem:[#allocation18_spill] sm:$0xff] }
 0x482   : > { %v10785_v40 = vpop.eup %10784  ;;  %10804 = vrcp.f32 %v5216_v51  ;;  %v7556_v46 = vadd.f32 1.0, %v10783_v33  ;;  %v14245_v27 = vadd.f32 %v14181_v17, %v14044_v1  ;;  %v14249_v42 = vadd.f32 %v14192_v5, %v14051_v6  ;;  %v14913_v33 = vld [vmem:[#allocation19_spill] sm:$0xff] }
 0x483   : > { %v10787_v55 = vpop.eup %10786  ;;  %v7677_v30 = vmul.f32 0.33333334, %v7645_v31  ;;  %v5308_v8 = vadd.f32 %v5276_v43, %v14910_v38  ;;  %v7616_v49 = vmul.f32 %v10785_v40, %v14070_v10  ;;  %10806 = vpow2.f32 %v7521_v25  ;;  %v14911_v25 = vld [vmem:[#allocation29_spill] sm:$0xff] }
 0x484   : > { %v10789_v63 = vpop.eup %10788  ;;  %10808 = vrcp.f32 %v7556_v46  ;;  %v5214_v15 = vadd.f32 1.0, %v10787_v55  ;;  %v7462_v52 = vsub.f32 0.0, %v14240_v53  ;;  %v14256_v1 = vadd.f32 %v14181_v17, %v14053_v57 }
 0x485   : > { %v10791_v47 = vpop.eup %10790  ;;  %7710 = vst.msk [vmem:[%s13920_s17 + $0x80] sm:$0xff] %vm7693_vm7, %v7677_v30  ;;  %v7648_v6 = vadd.f32 %v7616_v49, %v5308_v8  ;;  %v5274_v29 = vmul.f32 %v10789_v63, %v14083_v61  ;;  %10810 = vpow2.f32 %v5177_v34  ;;  %v5179_v48 = vmul.f32 1.442695, %v5122_v35 }
 0x486   : > { %v10793_v14 = vpop.eup %10792  ;;  %v7614_v10 = vmul.f32 %v10791_v47, %v14092_v21  ;;  %10812 = vrcp.f32 %v5214_v15  ;;  %v5127_v12 = vsub.f32 0.0, %v14245_v27  ;;  %v7467_v32 = vsub.f32 0.0, %v14249_v42 }
 0x487   : > { %v10795_v45 = vpop.eup %10794  ;;  %v7680_v57 = vmul.f32 0.33333334, %v7648_v6  ;;  %v5306_v0 = vadd.f32 %v5274_v29, %v14911_v25  ;;  %v5279_v18 = vmul.f32 %v10793_v14, %v14099_v23  ;;  %10814 = vpow2.f32 %v7517_v56  ;;  %v14916_v29 = vld [vmem:[#allocation22_spill] sm:$0xff] }
 0x488   : > { %v10797_v3 = vpop.eup %10796  ;;  %v7619_v61 = vmul.f32 %v10795_v45, %v14108_v13  ;;  %10816 = vpow2.f32 %v5183_v16  ;;  %v7519_v34 = vmul.f32 1.442695, %v7462_v52  ;;  %v5125_v39 = vsub.f32 0.0, %v14256_v1  ;;  %v14915_v52 = vld [vmem:[#allocation42_spill] sm:$0xff] }
 0x489   : > { %v10799_v21 = vpop.eup %10798  ;;  %7713 = vst.msk [vmem:[%s13920_s17 + $0x98] sm:$0xff] %vm7693_vm7, %v7680_v57  ;;  %v7646_v22 = vadd.f32 %v7614_v10, %v5306_v0  ;;  %v5311_v4 = vadd.f32 %v5279_v18, %v14912_v7  ;;  %v5277_v60 = vmul.f32 %v10797_v3, %v14124_v36  ;;  %10818 = vpow2.f32 %v7523_v11  ;;  %v14914_v11 = vld [vmem:[#allocation67_spill] sm:$0xff]  ;;  %v14917_v0 = vld [vmem:[#allocation70_spill] sm:$0xff] }
 0x48a   : > { %v10801_v51 = vpop.eup %10800  ;;  %v7554_v23 = vadd.f32 1.0, %v10799_v21  ;;  %10820 = vpow2.f32 %v5179_v48  ;;  %v5189_v56 = vmul.f32 1.442695, %v5127_v12  ;;  %v7529_v35 = vmul.f32 1.442695, %v7467_v32 }
 0x48b   : > { %v10803_v13 = vpop.eup %10802  ;;  %v7678_v16 = vmul.f32 0.33333334, %v7646_v22  ;;  %v7651_v41 = vadd.f32 %v7619_v61, %v5311_v4  ;;  %v5309_v31 = vadd.f32 %v5277_v60, %v14913_v33  ;;  %v7617_v43 = vmul.f32 %v10801_v51, %v14128_v19  ;;  %v14918_v22 = vld [vmem:[#allocation44_spill] sm:$0xff] }
 0x48c   : > { %v10805_v40 = vpop.eup %10804  ;;  %10822 = vrcp.f32 %v7554_v23  ;;  %v5219_v46 = vadd.f32 1.0, %v10803_v13  ;;  %v14276_v36 = vadd.f32 %v14192_v5, %v14062_v26  ;;  %v14280_v55 = vadd.f32 %v14181_v17, %v14914_v11  ;;  %v14919_v33 = vld [vmem:[#allocation16_spill] sm:$0xff] }
 0x48d   : > { %v10807_v30 = vpop.eup %10806  ;;  %7711 = vst.msk [vmem:[%s13920_s17 + $0x88] sm:$0xff] %vm7693_vm7, %v7678_v16  ;;  %v7683_v38 = vmul.f32 0.33333334, %v7651_v41  ;;  %v7649_v8 = vadd.f32 %v7617_v43, %v5309_v31  ;;  %v5280_v49 = vmul.f32 %v10805_v40, %v14133_v9  ;;  %10824 = vpow2.f32 %v7519_v34  ;;  %v14920_v31 = vld [vmem:[#allocation39_spill] sm:$0xff] }
 0x48e   : > { %v10809_v19 = vpop.eup %10808  ;;  %10826 = vrcp.f32 %v5219_v46  ;;  %v7559_v63 = vadd.f32 1.0, %v10807_v30  ;;  %v5185_v15 = vmul.f32 1.442695, %v5125_v39  ;;  %v14287_v26 = vadd.f32 %v14192_v5, %v14915_v52 }
 0x48f   : > { %v10811_v47 = vpop.eup %10810  ;;  %7716 = vst.msk [vmem:[%s13920_s17 + $0xb0] sm:$0xff] %vm7693_vm7, %v7683_v38  ;;  %v7681_v6 = vmul.f32 0.33333334, %v7649_v8  ;;  %v5312_v48 = vadd.f32 %v5280_v49, %v14916_v29  ;;  %v7620_v14 = vmul.f32 %v10809_v19, %v14141_v28  ;;  %10828 = vpow2.f32 %v5189_v56 }
 0x490   : > { %v10813_v9 = vpop.eup %10812  ;;  %10830 = vrcp.f32 %v7559_v63  ;;  %v5217_v10 = vadd.f32 1.0, %v10811_v47  ;;  %v7465_v12 = vsub.f32 0.0, %v14276_v36  ;;  %v5128_v32 = vsub.f32 0.0, %v14280_v55 }
 0x491   : > { %v10815_v45 = vpop.eup %10814  ;;  %7714 = vst.msk [vmem:[%s13920_s17 + $0xa0] sm:$0xff] %vm7693_vm7, %v7681_v6  ;;  %v7652_v57 = vadd.f32 %v7620_v14, %v5312_v48  ;;  %v5278_v25 = vmul.f32 %v10813_v9, %v14149_v59  ;;  %10832 = vpow2.f32 %v7529_v35  ;;  %v14300_v18 = vadd.f32 %v14181_v17, %v14917_v0  ;;  %v14921_v48 = vld [vmem:[#allocation21_spill] sm:$0xff] }
 0x492   : > { %v10817_v28 = vpop.eup %10816  ;;  %10834 = vrcp.f32 %v5217_v10  ;;  %v7557_v3 = vadd.f32 1.0, %v10815_v45  ;;  %v7468_v61 = vsub.f32 0.0, %v14287_v26  ;;  %v14305_v34 = vadd.f32 %v14192_v5, %v14079_v62  ;;  %v14922_v14 = vld [vmem:[#allocation45_spill] sm:$0xff] }
 0x493   : > { %v10819_v39 = vpop.eup %10818  ;;  %v7684_v21 = vmul.f32 0.33333334, %v7652_v57  ;;  %v5310_v7 = vadd.f32 %v5278_v25, %v14918_v22  ;;  %v5220_v59 = vadd.f32 1.0, %v10817_v28  ;;  %10836 = vpow2.f32 %v5185_v15  ;;  %v14923_v28 = vld [vmem:[#allocation20_spill] sm:$0xff] }
 0x494   : > { %v10821_v4 = vpop.eup %10820  ;;  %10838 = vrcp.f32 %v7557_v3  ;;  %v7560_v60 = vadd.f32 1.0, %v10819_v39  ;;  %v7525_v17 = vmul.f32 1.442695, %v7465_v12  ;;  %v5191_v23 = vmul.f32 1.442695, %v5128_v32  ;;  %v14924_v3 = vld [vmem:[#allocation52_spill] sm:$0xff] }
 0x495   : > { %7717 = vst.msk [vmem:[%s13920_s17 + $0xb8] sm:$0xff] %vm7693_vm7, %v7684_v21  ;;  %10840 = vrcp.f32 %v5220_v59  ;;  %v5218_v51 = vadd.f32 1.0, %v10821_v4  ;;  %v5126_v56 = vsub.f32 0.0, %v14300_v18  ;;  %v7466_v62 = vsub.f32 0.0, %v14305_v34  ;;  %v14925_v39 = vld [vmem:[#allocation7_spill] sm:$0xff]  ;;  %v14926_v4 = vld [vmem:[#allocation25_spill] sm:$0xff] }
 0x496   : > { %v10823_v35 = vpop.eup %10822  ;;  %10842 = vrcp.f32 %v7560_v60  ;;  %v7531_v16 = vmul.f32 1.442695, %v7468_v61  ;;  %v2831_v43 = vmul.f32 %v14920_v31, %v14919_v33  ;;  %v2832_v61 = vmul.f32 %v14924_v3, %v14923_v28  ;;  %v14927_v60 = vld [vmem:[#allocation55_spill] sm:$0xff] }
 0x497   : > { %v10825_v5 = vpop.eup %10824  ;;  %v7618_v13 = vmul.f32 %v10823_v35, %v14156_v20  ;;  %10844 = vrcp.f32 %v5218_v51  ;;  %v5187_v38 = vmul.f32 1.442695, %v5126_v56  ;;  %v7527_v19 = vmul.f32 1.442695, %v7466_v62  ;;  %v14928_v35 = vld [vmem:[#allocation40_spill] sm:$0xff] }
 0x498   : > { %v10827_v41 = vpop.eup %10826  ;;  %v7558_v40 = vadd.f32 1.0, %v10825_v5  ;;  %10846 = vpow2.f32 %v7525_v17  ;;  %v2772_v21 = vadd.f32 1.0, %v14925_v39  ;;  %v2830_v17 = vmul.f32 %v14927_v60, %v14926_v4 }
 0x499   : > { %v10829_v46 = vpop.eup %10828  ;;  %v7650_v11 = vadd.f32 %v7618_v13, %v5310_v7  ;;  %v5283_v30 = vmul.f32 %v10827_v41, %v14185_v58  ;;  %10848 = vpow2.f32 %v5191_v23  ;;  %v2829_v58 = vmul.f32 %v14922_v14, %v14921_v48  ;;  %v14932_v48 = vld [vmem:[#allocation11_spill] sm:$0xff] }
 0x49a   : > { %v10831_v8 = vpop.eup %10830  ;;  %10850 = vrcp.f32 %v7558_v40  ;;  %v5223_v49 = vadd.f32 1.0, %v10829_v46  ;;  %v2770_v62 = vadd.f32 1.0, %v14928_v35 }
 0x49b   : > { %v10833_v20 = vpop.eup %10832  ;;  %v7682_v63 = vmul.f32 0.33333334, %v7650_v11  ;;  %v5315_v15 = vadd.f32 %v5283_v30, %v2831_v43  ;;  %v7623_v52 = vmul.f32 %v10831_v8, %v14196_v24  ;;  %10852 = vpow2.f32 %v7531_v16  ;;  %v14929_v11 = vld [vmem:[#allocation30_spill] sm:$0xff]  ;;  %v14930_v30 = vld [vmem:[#allocation8_spill] sm:$0xff] }
 0x49c   : > { %v10835_v47 = vpop.eup %10834  ;;  %10854 = vrcp.f32 %v5223_v49  ;;  %v7563_v6 = vadd.f32 1.0, %v10833_v20 }
 0x49d   : > { %v10837_v29 = vpop.eup %10836  ;;  %7715 = vst.msk [vmem:[%s13920_s17 + $0xa8] sm:$0xff] %vm7693_vm7, %v7682_v63  ;;  %v7655_v9 = vadd.f32 %v7623_v52, %v5315_v15  ;;  %v5281_v10 = vmul.f32 %v10835_v47, %v14201_v37  ;;  %10856 = vpow2.f32 %v5187_v38  ;;  %v2835_v38 = vmul.f32 %v14930_v30, %v14929_v11 }
 0x49e   : > { %v10839_v12 = vpop.eup %10838  ;;  %10858 = vrcp.f32 %v7563_v6  ;;  %v5221_v32 = vadd.f32 1.0, %v10837_v29  ;;  %v14931_v29 = vld [vmem:[#allocation5_spill] sm:$0xff] }
 0x49f   : > { %v10841_v45 = vpop.eup %10840  ;;  %v7687_v24 = vmul.f32 0.33333334, %v7655_v9  ;;  %v5313_v57 = vadd.f32 %v5281_v10, %v2829_v58  ;;  %v7621_v25 = vmul.f32 %v10839_v12, %v14207_v54  ;;  %10860 = vpow2.f32 %v7527_v19 }
 0x4a0   : > { %v10843_v0 = vpop.eup %10842  ;;  %v5284_v22 = vmul.f32 %v10841_v45, %v14211_v50  ;;  %10862 = vrcp.f32 %v5221_v32  ;;  %v2833_v14 = vmul.f32 %v14932_v48, %v14931_v29 }
 0x4a1   : > { %v10845_v37 = vpop.eup %10844  ;;  %7720 = vst.msk [vmem:[%s13920_s17 + $0xd0] sm:$0xff] %vm7693_vm7, %v7687_v24  ;;  %v7653_v7 = vadd.f32 %v7621_v25, %v5313_v57  ;;  %v7624_v51 = vmul.f32 %v10843_v0, %v14221_v2  ;;  %10864 = vrcp.f32 %v2772_v21  ;;  %v14933_v57 = vld [vmem:[#allocation27_spill] sm:$0xff] }
 0x4a2   : > { %v10847_v59 = vpop.eup %10846  ;;  %v5316_v54 = vadd.f32 %v5284_v22, %v2832_v61  ;;  %v5282_v23 = vmul.f32 %v10845_v37, %v14228_v44  ;;  %v14934_v22 = vld [vmem:[#allocation32_spill] sm:$0xff] }
 0x4a3   : > { %v10849_v56 = vpop.eup %10848  ;;  %v7685_v5 = vmul.f32 0.33333334, %v7653_v7  ;;  %v7561_v50 = vadd.f32 1.0, %v10847_v59 }
 0x4a4   : > { %v10851_v13 = vpop.eup %10850  ;;  %v7656_v16 = vadd.f32 %v7624_v51, %v5316_v54  ;;  %v5314_v41 = vadd.f32 %v5282_v23, %v2830_v17  ;;  %v5224_v33 = vadd.f32 1.0, %v10849_v56 }
 0x4a5   : > { %v10853_v31 = vpop.eup %10852  ;;  %7718 = vst.msk [vmem:[%s13920_s17 + $0xc0] sm:$0xff] %vm7693_vm7, %v7685_v5  ;;  %v7622_v43 = vmul.f32 %v10851_v13, %v14240_v53  ;;  %10866 = vrcp.f32 %v7561_v50 }
 0x4a6   : > { %v10855_v2 = vpop.eup %10854  ;;  %v7688_v40 = vmul.f32 0.33333334, %v7656_v16  ;;  %10868 = vrcp.f32 %v5224_v33  ;;  %v7564_v44 = vadd.f32 1.0, %v10853_v31 }
 0x4a7   : > { %v10857_v46 = vpop.eup %10856  ;;  %10870 = vrcp.f32 %v2770_v62  ;;  %v7654_v8 = vadd.f32 %v7622_v43, %v5314_v41  ;;  %v5287_v49 = vmul.f32 %v10855_v2, %v14245_v27 }
 0x4a8   : > { %v10859_v19 = vpop.eup %10858  ;;  %7721 = vst.msk [vmem:[%s13920_s17 + $0xd8] sm:$0xff] %vm7693_vm7, %v7688_v40  ;;  %10872 = vrcp.f32 %v7564_v44  ;;  %v5222_v20 = vadd.f32 1.0, %v10857_v46 }
 0x4a9   : > { %v10861_v53 = vpop.eup %10860  ;;  %v7686_v63 = vmul.f32 0.33333334, %v7654_v8  ;;  %v5319_v15 = vadd.f32 %v5287_v49, %v2835_v38  ;;  %v7627_v52 = vmul.f32 %v10859_v19, %v14249_v42 }
 0x4aa   : > { %v10863_v47 = vpop.eup %10862  ;;  %10874 = vrcp.f32 %v5222_v20  ;;  %v7562_v6 = vadd.f32 1.0, %v10861_v53 }
 0x4ab   : > { %7719 = vst.msk [vmem:[%s13920_s17 + $0xc8] sm:$0xff] %vm7693_vm7, %v7686_v63  ;;  %v7659_v27 = vadd.f32 %v7627_v52, %v5319_v15  ;;  %v5285_v58 = vmul.f32 %v10863_v47, %v14256_v1  ;;  %v10865_v12 = vpop.eup %10864 }
 0x4ac   : > { %10876 = vrcp.f32 %v7562_v6  ;;  %v2836_v25 = vmul.f32 %v10865_v12, %v14933_v57 }
 0x4ad   : > { %v7691_v9 = vmul.f32 0.33333334, %v7659_v27  ;;  %v5317_v10 = vadd.f32 %v5285_v58, %v2833_v14 }
 0x4af   : > { %v10867_v32 = vpop.eup %10866  ;;  %7724 = vst.msk [vmem:[%s13920_s17 + $0xf0] sm:$0xff] %vm7693_vm7, %v7691_v9 }
 0x4b0   : > { %v10869_v42 = vpop.eup %10868  ;;  %v7625_v45 = vmul.f32 %v10867_v32, %v14276_v36 }
 0x4b1   : > { %v10871_v24 = vpop.eup %10870  ;;  %v5288_v0 = vmul.f32 %v10869_v42, %v14280_v55 }
 0x4b2   : > { %v10873_v28 = vpop.eup %10872  ;;  %v7657_v1 = vadd.f32 %v7625_v45, %v5317_v10  ;;  %v2834_v37 = vmul.f32 %v10871_v24, %v14934_v22 }
 0x4b3   : > { %v5320_v3 = vadd.f32 %v5288_v0, %v2836_v25  ;;  %v7628_v61 = vmul.f32 %v10873_v28, %v14287_v26 }
 0x4b4   : > { %v10875_v39 = vpop.eup %10874  ;;  %v7689_v21 = vmul.f32 0.33333334, %v7657_v1 }
 0x4b5   : > { %v7660_v36 = vadd.f32 %v7628_v61, %v5320_v3  ;;  %v5286_v7 = vmul.f32 %v10875_v39, %v14300_v18 }
 0x4b6   : > { %v10877_v59 = vpop.eup %10876  ;;  %7722 = vst.msk [vmem:[%s13920_s17 + $0xe0] sm:$0xff] %vm7693_vm7, %v7689_v21 }
 0x4b7   : > { %v7692_v55 = vmul.f32 0.33333334, %v7660_v36  ;;  %v5318_v4 = vadd.f32 %v5286_v7, %v2834_v37  ;;  %v7626_v60 = vmul.f32 %v10877_v59, %v14305_v34 }
 0x4b9   : > { %7725 = vst.msk [vmem:[%s13920_s17 + $0xf8] sm:$0xff] %vm7693_vm7, %v7692_v55  ;;  %v7658_v26 = vadd.f32 %v7626_v60, %v5318_v4 }
 0x4bb   : > { %v7690_v18 = vmul.f32 0.33333334, %v7658_v26 }
 0x4bd   : > { %7723 = vst.msk [vmem:[%s13920_s17 + $0xe8] sm:$0xff] %vm7693_vm7, %v7690_v18 }
 0x4be   : > { %10947 = shalt.err (!%p10944_p3)
}
 0x4bf   : > { %s10948_s7 = scalar_lea.hbm %s14366_s30, 4096  ;;  %s10952_s11 = scalar_lea.hbm %s14418_s3, 8192 }
 0x4c0   : > { %p10949_p4 = scmp.ne.s32.totalorder %s14366_s30, %s10948_s7  ;;  %p10953_p9 = scmp.lt.u32.totalorder %s14366_s30, %s14418_s3 }
 0x4c1   : > { %p10954_p10 = scmp.lt.u32.totalorder %s10952_s11, %s10948_s7  ;;  %p10956_p12 = scmp.lt.u32.totalorder %s10948_s7, %s14366_s30 }
 0x4c2   : > { %p10950_p7 = pnand %p10949_p4, %p11059_p5 }
 0x4c3   : > { %p10955_p11 = por %p10954_p10, %p10953_p9 }
 0x4c4   : > { %p10951_p8 = pneg %p10950_p7 }
 0x4c5   : > { %p10957_p13 = por %p10956_p12, %p10955_p11 }
 0x4c7   : > { %p10958_p0 = pnand %p10957_p13, %p10951_p8 }
 0x4c9   : > { %10961 = shalt.err (!%p10958_p0)
}
 0x4ca   : > { %s10999_s20 = smov 128   ;;  %s11000_s24 = smov 8  }
 0x4cb   : > { %10453 = dma.vmem_to_hbm [thread:$0]  (%p11059_p5), %s14368_s27, 4096, %s14366_s30, %s14374_s4, %s10999_s20, %s10999_s20, %s11000_s24  }
 0x4cc PF: > { %p10459_p1 = scmp.ge.s32.totalorder %s10996_s15, 2  ;;  %s7755_s25 = sand.u32 1, %s10984_s12  }
 0x4cd   : > { %s7756_s26 = scalar_lea.sflag [#allocation3], %s7755_s25 }
 0x4ce   : > { %p10456_p2 = pnand %p10459_p1, %p11063_p6 }
 0x4d0   : > { %10979 = dma.done.wait (!%p10456_p2), %s7756_s26, 4096  }
 0x4d1   : > { %10981 = vsyncadd (!%p10456_p2), %s7756_s26, 4294963200  ;;  %p13_p3 = scmp.ge.s32.totalorder %s11046_s18, 4   ;;  %s14935_s12 = smov %s10988_s13 }
 0x4d2   : > { %s14936_s13 = smov %s10992_s14  ;;  %s14937_s14 = smov %s11057_s21 }
 0x4d3   : > { %s14938_s15 = smov %s11046_s18  ;;  %15 = sbr.rel (!%p13_p3) target bundleno = 3 (0x3), region = 95 }
 0x4da   :  { %7761 = vsyncpa [#allocation3], 1 }
 0x4db   :  { %7763 = vsyncpa [#allocation3 + $0x1], 1 }

</bundles_post_ra>
